<compile_context>
chip_gen: v7x
topology: tpu7x:2x2x1
jax: 0.10.0
libtpu: 0.0.40
codegen_flags: <defaults>
</compile_context>

<pallas_src>
import functools

import jax
import jax.numpy as jnp
from jax import lax
from jax.experimental import pallas as pl
from jax.experimental.pallas import tpu as pltpu


# ------------------------------ kernel helpers ------------------------------ #

def _lstm_gate_activation(gates, c, H):
    """gates: (B, 4H) pre-activation, PyTorch gate order i, f, g, o."""
    i_g = jax.nn.sigmoid(gates[:, 0 * H:1 * H])
    f_g = jax.nn.sigmoid(gates[:, 1 * H:2 * H])
    g_g = jnp.tanh(gates[:, 2 * H:3 * H])
    o_g = jax.nn.sigmoid(gates[:, 3 * H:4 * H])
    c_new = f_g * c + i_g * g_g
    h_new = o_g * jnp.tanh(c_new)
    return h_new, c_new


def _bilstm_layer(x, wih, bih, whh, wemb_f, wemb_b, bemb, *, T, B):
    """One fused BidirectionalLSTM + Linear(2H -> nOut), all in VMEM/vregs.

    x:      (T*B, nIn)  f32  time-major, flattened over (T, B)
    wih:    (nIn, 8H)   f32  [W_ih_f^T | W_ih_b^T]
    bih:    (1, 8H)     f32  [b_ih_f + b_hh_f | b_ih_b + b_hh_b]
    whh:    (H, 8H)     f32  [W_hh_f^T | W_hh_b^T]
    wemb_*: (H, nOut)   f32  top / bottom halves of W_emb^T
    bemb:   (1, nOut)   f32
    returns (T*B, nOut) f32
    """
    H = whh.shape[0]

    # Hoisted input projection for BOTH directions: one wide matmul entirely
    # off the serial h -> h dependence chain, with the fused biases folded in.
    gx = jnp.dot(x, wih, preferred_element_type=jnp.float32) + bih      # (T*B, 8H)

    zeros = jnp.zeros((B, H), jnp.float32)
    h_f, c_f = zeros, zeros
    h_b, c_b = zeros, zeros

    hf_steps = [None] * T
    hb_steps = [None] * T

    # Fully unrolled interleaved recurrence (T = conv feature-map width, small
    # for CRNN). Step s advances the forward chain at time s and the backward
    # chain at time T-1-s; the single stacked matmul fuses both directions'
    # h @ W_hh into one MXU push per step (off-diagonal blocks discarded).
    # TODO(synk): replace with lax.fori_loop(..., unroll=2..4) over VMEM
    #             scratches when T is large enough to spill the vreg file.
    for s in range(T):
        tf = s
        tb = T - 1 - s

        h_cat = jnp.concatenate([h_f, h_b], axis=0)                     # (2B, H)
        gh = jnp.dot(h_cat, whh, preferred_element_type=jnp.float32)    # (2B, 8H)

        gates_f = gx[tf * B:(tf + 1) * B, 0:4 * H] + gh[0:B, 0:4 * H]
        gates_b = gx[tb * B:(tb + 1) * B, 4 * H:8 * H] + gh[B:2 * B, 4 * H:8 * H]

        h_f, c_f = _lstm_gate_activation(gates_f, c_f, H)
        h_b, c_b = _lstm_gate_activation(gates_b, c_b, H)

        hf_steps[tf] = h_f
        hb_steps[tb] = h_b

    # Post-loop embedding epilogue: two (T*B, H) x (H, nOut) matmuls + one
    # bias add; no per-step masked partial stores on the critical path.
    hf_stack = jnp.concatenate(hf_steps, axis=0)     # (T*B, H)
    hb_stack = jnp.concatenate(hb_steps, axis=0)     # (T*B, H)
    return (jnp.dot(hf_stack, wemb_f, preferred_element_type=jnp.float32)
            + jnp.dot(hb_stack, wemb_b, preferred_element_type=jnp.float32)
            + bemb)


def crnn_rnn_kernel(T, B,
                    x_ref,
                    wih1_ref, bih1_ref, whh1_ref, wembf1_ref, wembb1_ref, bemb1_ref,
                    wih2_ref, bih2_ref, whh2_ref, wembf2_ref, wembb2_ref, bemb2_ref,
                    out_ref):
    """Both BidirectionalLSTM layers fused in one kernel; single output store."""
    y1 = _bilstm_layer(x_ref[...],
                       wih1_ref[...], bih1_ref[...], whh1_ref[...],
                       wembf1_ref[...], wembb1_ref[...], bemb1_ref[...],
                       T=T, B=B)
    y2 = _bilstm_layer(y1,
                       wih2_ref[...], bih2_ref[...], whh2_ref[...],
                       wembf2_ref[...], wembb2_ref[...], bemb2_ref[...],
                       T=T, B=B)
    out_ref[...] = y2


# --------------------------------- wrappers --------------------------------- #

_VMEM = pl.BlockSpec(memory_space=pltpu.MemorySpace.VMEM)


def prepare_layer_params(p):
    """One-time weight prep (transpose / fuse); NOT redone per forward call."""
    H = p["w_hh_f"].shape[1]
    nOut = p["w_emb"].shape[0]
    w_ih_cat = jnp.concatenate([p["w_ih_f"].T, p["w_ih_b"].T], axis=1)    # (nIn, 8H)
    b_ih_cat = jnp.concatenate([p["b_ih_f"] + p["b_hh_f"],
                                p["b_ih_b"] + p["b_hh_b"]]).reshape(1, 8 * H)
    w_hh_cat = jnp.concatenate([p["w_hh_f"].T, p["w_hh_b"].T], axis=1)    # (H, 8H)
    return {
        "w_ih_cat": w_ih_cat,
        "b_ih_cat": b_ih_cat,
        "w_hh_cat": w_hh_cat,
        "w_emb_f": p["w_emb"][:, :H].T,      # (H, nOut) -- forward half
        "w_emb_b": p["w_emb"][:, H:].T,      # (H, nOut) -- backward half
        "b_emb": p["b_emb"].reshape(1, nOut),
    }


def crnn_rnn_head(x, prep1, prep2):
    """CRNN.rnn: Sequential(BidirectionalLSTM, BidirectionalLSTM), one kernel.

    x: (T, B, nIn) f32 -> (T, B, nClasses) f32
    """
    T, B, nIn = x.shape
    nOut = prep2["b_emb"].shape[-1]

    # Pad batch to a multiple of the f32 sublane count (8) so every time-slice
    # of gx / h / c is tile-aligned; padded rows are independent (per-sample
    # recurrence) and sliced off on return.
    Bp = max(8, ((B + 7) // 8) * 8)
    if Bp != B:
        x = jnp.pad(x, ((0, 0), (0, Bp - B), (0, 0)))
    x2 = x.reshape(T * Bp, nIn)              # free XLA reshape, lane-dense input

    out2 = pl.pallas_call(
        functools.partial(crnn_rnn_kernel, T, Bp),
        out_shape=jax.ShapeDtypeStruct((T * Bp, nOut), jnp.float32),
        in_specs=[_VMEM] * 13,
        out_specs=_VMEM,
        compiler_params=pltpu.CompilerParams(vmem_limit_bytes=32 * 1024 * 1024),
    )(x2,
      prep1["w_ih_cat"], prep1["b_ih_cat"], prep1["w_hh_cat"],
      prep1["w_emb_f"], prep1["w_emb_b"], prep1["b_emb"],
      prep2["w_ih_cat"], prep2["b_ih_cat"], prep2["w_hh_cat"],
      prep2["w_emb_f"], prep2["w_emb_b"], prep2["b_emb"])

    return out2.reshape(T, Bp, nOut)[:, :B, :]


# --------------------------- pure-JAX reference ----------------------------- #

def _lstm_ref_dir(x, w_ih, w_hh, b_ih, b_hh, reverse):
    H = w_hh.shape[1]
    B = x.shape[1]

    def step(carry, x_t):
        h, c = carry
        gates = x_t @ w_ih.T + b_ih + h @ w_hh.T + b_hh
        i = jax.nn.sigmoid(gates[:, :H])
        f = jax.nn.sigmoid(gates[:, H:2 * H])
        g = jnp.tanh(gates[:, 2 * H:3 * H])
        o = jax.nn.sigmoid(gates[:, 3 * H:])
        c = f * c + i * g
        h = o * jnp.tanh(c)
        return (h, c), h

    xs = x[::-1] if reverse else x
    _, hs = lax.scan(step, (jnp.zeros((B, H)), jnp.zeros((B, H))), xs)
    return hs[::-1] if reverse else hs


def bidirectional_lstm_ref(x, p):
    hf = _lstm_ref_dir(x, p["w_ih_f"], p["w_hh_f"], p["b_ih_f"], p["b_hh_f"], False)
    hb = _lstm_ref_dir(x, p["w_ih_b"], p["w_hh_b"], p["b_ih_b"], p["b_hh_b"], True)
    rec = jnp.concatenate([hf, hb], axis=-1)
    T, B, h2 = rec.shape
    out = rec.reshape(T * B, h2) @ p["w_emb"].T + p["b_emb"]
    return out.reshape(T, B, -1)


# ----------------------------------- main ----------------------------------- #

if __name__ == "__main__":
    nHidden, nClasses = 32, 16
    T, B = 8, 2
    nIn1 = 2 * nHidden          # CRNN feeds 2*nHidden conv features into layer 1

    def make_layer_params(key, nIn, H, nOut):
        keys = jax.random.split(key, 10)
        k_lstm = 1.0 / jnp.sqrt(H)
        k_emb = 1.0 / jnp.sqrt(2 * H)

        def u(k, shape, scale):
            return jax.random.uniform(k, shape, jnp.float32, -scale, scale)

        return {
            "w_ih_f": u(keys[0], (4 * H, nIn), k_lstm),
            "w_hh_f": u(keys[1], (4 * H, H), k_lstm),
            "b_ih_f": u(keys[2], (4 * H,), k_lstm),
            "b_hh_f": u(keys[3], (4 * H,), k_lstm),
            "w_ih_b": u(keys[4], (4 * H, nIn), k_lstm),
            "w_hh_b": u(keys[5], (4 * H, H), k_lstm),
            "b_ih_b": u(keys[6], (4 * H,), k_lstm),
            "b_hh_b": u(keys[7], (4 * H,), k_lstm),
            "w_emb": u(keys[8], (nOut, 2 * H), k_emb),
            "b_emb": u(keys[9], (nOut,), k_emb),
        }

    key = jax.random.PRNGKey(0)
    k1, k2, kx = jax.random.split(key, 3)

    params1 = make_layer_params(k1, nIn1, nHidden, nHidden)      # 2H -> H -> H
    params2 = make_layer_params(k2, nHidden, nHidden, nClasses)  # H -> H -> nClasses

    # One-time weight prep (done at setup, not per forward call).
    prep1 = prepare_layer_params(params1)
    prep2 = prepare_layer_params(params2)

    x = jax.random.normal(kx, (T, B, nIn1), jnp.float32)

    out = jax.block_until_ready(crnn_rnn_head(x, prep1, prep2))
    ref = jax.block_until_ready(
        bidirectional_lstm_ref(bidirectional_lstm_ref(x, params1), params2))

    assert out.shape == (T, B, nClasses), out.shape
    assert jnp.allclose(out, ref, atol=2e-3, rtol=2e-3), \
        float(jnp.max(jnp.abs(out - ref)))

    print("KERNEL_OK")
</pallas_src>

<mosaic_0001>
module attributes {stable_mosaic.version = 11 : i64} {
  func.func @crnn_rnn_kernel(%arg0: memref<64x64xf32, #tpu.memory_space<vmem>>, %arg1: memref<64x256xf32, #tpu.memory_space<vmem>>, %arg2: memref<1x256xf32, #tpu.memory_space<vmem>>, %arg3: memref<32x256xf32, #tpu.memory_space<vmem>>, %arg4: memref<32x32xf32, #tpu.memory_space<vmem>>, %arg5: memref<32x32xf32, #tpu.memory_space<vmem>>, %arg6: memref<1x32xf32, #tpu.memory_space<vmem>>, %arg7: memref<32x256xf32, #tpu.memory_space<vmem>>, %arg8: memref<1x256xf32, #tpu.memory_space<vmem>>, %arg9: memref<32x256xf32, #tpu.memory_space<vmem>>, %arg10: memref<32x16xf32, #tpu.memory_space<vmem>>, %arg11: memref<32x16xf32, #tpu.memory_space<vmem>>, %arg12: memref<1x16xf32, #tpu.memory_space<vmem>>, %arg13: memref<64x16xf32, #tpu.memory_space<vmem>>) attributes {dimension_semantics = [], scalar_prefetch = 0 : i64, scratch_operands = 0 : i64, tpu.core_type = #tpu.core_type<tc>} {
    %c0 = arith.constant 0 : index
    %c0_0 = arith.constant 0 : index
    %0 = vector.load %arg0[%c0, %c0_0] : memref<64x64xf32, #tpu.memory_space<vmem>>, vector<64x64xf32>
    %c0_1 = arith.constant 0 : index
    %c0_2 = arith.constant 0 : index
    %1 = vector.load %arg1[%c0_1, %c0_2] : memref<64x256xf32, #tpu.memory_space<vmem>>, vector<64x256xf32>
    %c0_3 = arith.constant 0 : index
    %c0_4 = arith.constant 0 : index
    %2 = vector.load %arg2[%c0_3, %c0_4] : memref<1x256xf32, #tpu.memory_space<vmem>>, vector<1x256xf32>
    %c0_5 = arith.constant 0 : index
    %c0_6 = arith.constant 0 : index
    %3 = vector.load %arg3[%c0_5, %c0_6] : memref<32x256xf32, #tpu.memory_space<vmem>>, vector<32x256xf32>
    %c0_7 = arith.constant 0 : index
    %c0_8 = arith.constant 0 : index
    %4 = vector.load %arg4[%c0_7, %c0_8] : memref<32x32xf32, #tpu.memory_space<vmem>>, vector<32x32xf32>
    %c0_9 = arith.constant 0 : index
    %c0_10 = arith.constant 0 : index
    %5 = vector.load %arg5[%c0_9, %c0_10] : memref<32x32xf32, #tpu.memory_space<vmem>>, vector<32x32xf32>
    %c0_11 = arith.constant 0 : index
    %c0_12 = arith.constant 0 : index
    %6 = vector.load %arg6[%c0_11, %c0_12] : memref<1x32xf32, #tpu.memory_space<vmem>>, vector<1x32xf32>
    %cst = arith.constant dense<0.000000e+00> : vector<64x256xf32>
    %7 = tpu.matmul %0, %1, %cst {dimension_numbers = #tpu.dot_dimension_numbers<[1], [0], [0], [1], [0, 0, 1, 1], [], []>} : vector<64x64xf32>, vector<64x256xf32>, vector<64x256xf32> -> vector<64x256xf32>
    %8 = vector.broadcast %2 : vector<1x256xf32> to vector<64x256xf32>
    %9 = arith.addf %7, %8 : vector<64x256xf32>
    %cst_13 = arith.constant 0.000000e+00 : f32
    %10 = vector.broadcast %cst_13 : f32 to vector<8x32xf32>
    %11 = tpu.concatenate %10, %10 in 0 : vector<8x32xf32>, vector<8x32xf32> -> vector<16x32xf32>
    %cst_14 = arith.constant dense<0.000000e+00> : vector<16x256xf32>
    %12 = tpu.matmul %11, %3, %cst_14 {dimension_numbers = #tpu.dot_dimension_numbers<[1], [0], [0], [1], [0, 0, 1, 1], [], []>} : vector<16x32xf32>, vector<32x256xf32>, vector<16x256xf32> -> vector<16x256xf32>
    %13 = vector.extract_strided_slice %9 {offsets = [0, 0], sizes = [8, 128], strides = [1, 1]} : vector<64x256xf32> to vector<8x128xf32>
    %14 = vector.extract_strided_slice %12 {offsets = [0, 0], sizes = [8, 128], strides = [1, 1]} : vector<16x256xf32> to vector<8x128xf32>
    %15 = arith.addf %13, %14 : vector<8x128xf32>
    %16 = vector.extract_strided_slice %9 {offsets = [56, 128], sizes = [8, 128], strides = [1, 1]} : vector<64x256xf32> to vector<8x128xf32>
    %17 = vector.extract_strided_slice %12 {offsets = [8, 128], sizes = [8, 128], strides = [1, 1]} : vector<16x256xf32> to vector<8x128xf32>
    %18 = arith.addf %16, %17 : vector<8x128xf32>
    %19 = vector.extract_strided_slice %15 {offsets = [0, 0], sizes = [8, 32], strides = [1, 1]} : vector<8x128xf32> to vector<8x32xf32>
    %20 = arith.negf %19 : vector<8x32xf32>
    %21 = math.exp %20 : vector<8x32xf32>
    %cst_15 = arith.constant 1.000000e+00 : f32
    %22 = vector.broadcast %cst_15 : f32 to vector<8x32xf32>
    %23 = arith.addf %22, %21 : vector<8x32xf32>
    %24 = arith.divf %22, %23 : vector<8x32xf32>
    %25 = vector.extract_strided_slice %15 {offsets = [0, 32], sizes = [8, 32], strides = [1, 1]} : vector<8x128xf32> to vector<8x32xf32>
    %26 = arith.negf %25 : vector<8x32xf32>
    %27 = math.exp %26 : vector<8x32xf32>
    %cst_16 = arith.constant 1.000000e+00 : f32
    %28 = vector.broadcast %cst_16 : f32 to vector<8x32xf32>
    %29 = arith.addf %28, %27 : vector<8x32xf32>
    %30 = arith.divf %28, %29 : vector<8x32xf32>
    %31 = vector.extract_strided_slice %15 {offsets = [0, 64], sizes = [8, 32], strides = [1, 1]} : vector<8x128xf32> to vector<8x32xf32>
    %32 = math.tanh %31 : vector<8x32xf32>
    %33 = vector.extract_strided_slice %15 {offsets = [0, 96], sizes = [8, 32], strides = [1, 1]} : vector<8x128xf32> to vector<8x32xf32>
    %34 = arith.negf %33 : vector<8x32xf32>
    %35 = math.exp %34 : vector<8x32xf32>
    %cst_17 = arith.constant 1.000000e+00 : f32
    %36 = vector.broadcast %cst_17 : f32 to vector<8x32xf32>
    %37 = arith.addf %36, %35 : vector<8x32xf32>
    %38 = arith.divf %36, %37 : vector<8x32xf32>
    %39 = arith.mulf %30, %10 : vector<8x32xf32>
    %40 = arith.mulf %24, %32 : vector<8x32xf32>
    %41 = arith.addf %39, %40 : vector<8x32xf32>
    %42 = math.tanh %41 : vector<8x32xf32>
    %43 = arith.mulf %38, %42 : vector<8x32xf32>
    %44 = vector.extract_strided_slice %18 {offsets = [0, 0], sizes = [8, 32], strides = [1, 1]} : vector<8x128xf32> to vector<8x32xf32>
    %45 = arith.negf %44 : vector<8x32xf32>
    %46 = math.exp %45 : vector<8x32xf32>
    %cst_18 = arith.constant 1.000000e+00 : f32
    %47 = vector.broadcast %cst_18 : f32 to vector<8x32xf32>
    %48 = arith.addf %47, %46 : vector<8x32xf32>
    %49 = arith.divf %47, %48 : vector<8x32xf32>
    %50 = vector.extract_strided_slice %18 {offsets = [0, 32], sizes = [8, 32], strides = [1, 1]} : vector<8x128xf32> to vector<8x32xf32>
    %51 = arith.negf %50 : vector<8x32xf32>
    %52 = math.exp %51 : vector<8x32xf32>
    %cst_19 = arith.constant 1.000000e+00 : f32
    %53 = vector.broadcast %cst_19 : f32 to vector<8x32xf32>
    %54 = arith.addf %53, %52 : vector<8x32xf32>
    %55 = arith.divf %53, %54 : vector<8x32xf32>
    %56 = vector.extract_strided_slice %18 {offsets = [0, 64], sizes = [8, 32], strides = [1, 1]} : vector<8x128xf32> to vector<8x32xf32>
    %57 = math.tanh %56 : vector<8x32xf32>
    %58 = vector.extract_strided_slice %18 {offsets = [0, 96], sizes = [8, 32], strides = [1, 1]} : vector<8x128xf32> to vector<8x32xf32>
    %59 = arith.negf %58 : vector<8x32xf32>
    %60 = math.exp %59 : vector<8x32xf32>
    %cst_20 = arith.constant 1.000000e+00 : f32
    %61 = vector.broadcast %cst_20 : f32 to vector<8x32xf32>
    %62 = arith.addf %61, %60 : vector<8x32xf32>
    %63 = arith.divf %61, %62 : vector<8x32xf32>
    %64 = arith.mulf %55, %10 : vector<8x32xf32>
    %65 = arith.mulf %49, %57 : vector<8x32xf32>
    %66 = arith.addf %64, %65 : vector<8x32xf32>
    %67 = math.tanh %66 : vector<8x32xf32>
    %68 = arith.mulf %63, %67 : vector<8x32xf32>
    %69 = tpu.concatenate %43, %68 in 0 : vector<8x32xf32>, vector<8x32xf32> -> vector<16x32xf32>
    %cst_21 = arith.constant dense<0.000000e+00> : vector<16x256xf32>
    %70 = tpu.matmul %69, %3, %cst_21 {dimension_numbers = #tpu.dot_dimension_numbers<[1], [0], [0], [1], [0, 0, 1, 1], [], []>} : vector<16x32xf32>, vector<32x256xf32>, vector<16x256xf32> -> vector<16x256xf32>
    %71 = vector.extract_strided_slice %9 {offsets = [8, 0], sizes = [8, 128], strides = [1, 1]} : vector<64x256xf32> to vector<8x128xf32>
    %72 = vector.extract_strided_slice %70 {offsets = [0, 0], sizes = [8, 128], strides = [1, 1]} : vector<16x256xf32> to vector<8x128xf32>
    %73 = arith.addf %71, %72 : vector<8x128xf32>
    %74 = vector.extract_strided_slice %9 {offsets = [48, 128], sizes = [8, 128], strides = [1, 1]} : vector<64x256xf32> to vector<8x128xf32>
    %75 = vector.extract_strided_slice %70 {offsets = [8, 128], sizes = [8, 128], strides = [1, 1]} : vector<16x256xf32> to vector<8x128xf32>
    %76 = arith.addf %74, %75 : vector<8x128xf32>
    %77 = vector.extract_strided_slice %73 {offsets = [0, 0], sizes = [8, 32], strides = [1, 1]} : vector<8x128xf32> to vector<8x32xf32>
    %78 = arith.negf %77 : vector<8x32xf32>
    %79 = math.exp %78 : vector<8x32xf32>
    %cst_22 = arith.constant 1.000000e+00 : f32
    %80 = vector.broadcast %cst_22 : f32 to vector<8x32xf32>
    %81 = arith.addf %80, %79 : vector<8x32xf32>
    %82 = arith.divf %80, %81 : vector<8x32xf32>
    %83 = vector.extract_strided_slice %73 {offsets = [0, 32], sizes = [8, 32], strides = [1, 1]} : vector<8x128xf32> to vector<8x32xf32>
    %84 = arith.negf %83 : vector<8x32xf32>
    %85 = math.exp %84 : vector<8x32xf32>
    %cst_23 = arith.constant 1.000000e+00 : f32
    %86 = vector.broadcast %cst_23 : f32 to vector<8x32xf32>
    %87 = arith.addf %86, %85 : vector<8x32xf32>
    %88 = arith.divf %86, %87 : vector<8x32xf32>
    %89 = vector.extract_strided_slice %73 {offsets = [0, 64], sizes = [8, 32], strides = [1, 1]} : vector<8x128xf32> to vector<8x32xf32>
    %90 = math.tanh %89 : vector<8x32xf32>
    %91 = vector.extract_strided_slice %73 {offsets = [0, 96], sizes = [8, 32], strides = [1, 1]} : vector<8x128xf32> to vector<8x32xf32>
    %92 = arith.negf %91 : vector<8x32xf32>
    %93 = math.exp %92 : vector<8x32xf32>
    %cst_24 = arith.constant 1.000000e+00 : f32
    %94 = vector.broadcast %cst_24 : f32 to vector<8x32xf32>
    %95 = arith.addf %94, %93 : vector<8x32xf32>
    %96 = arith.divf %94, %95 : vector<8x32xf32>
    %97 = arith.mulf %88, %41 : vector<8x32xf32>
    %98 = arith.mulf %82, %90 : vector<8x32xf32>
    %99 = arith.addf %97, %98 : vector<8x32xf32>
    %100 = math.tanh %99 : vector<8x32xf32>
    %101 = arith.mulf %96, %100 : vector<8x32xf32>
    %102 = vector.extract_strided_slice %76 {offsets = [0, 0], sizes = [8, 32], strides = [1, 1]} : vector<8x128xf32> to vector<8x32xf32>
    %103 = arith.negf %102 : vector<8x32xf32>
    %104 = math.exp %103 : vector<8x32xf32>
    %cst_25 = arith.constant 1.000000e+00 : f32
    %105 = vector.broadcast %cst_25 : f32 to vector<8x32xf32>
    %106 = arith.addf %105, %104 : vector<8x32xf32>
    %107 = arith.divf %105, %106 : vector<8x32xf32>
    %108 = vector.extract_strided_slice %76 {offsets = [0, 32], sizes = [8, 32], strides = [1, 1]} : vector<8x128xf32> to vector<8x32xf32>
    %109 = arith.negf %108 : vector<8x32xf32>
    %110 = math.exp %109 : vector<8x32xf32>
    %cst_26 = arith.constant 1.000000e+00 : f32
    %111 = vector.broadcast %cst_26 : f32 to vector<8x32xf32>
    %112 = arith.addf %111, %110 : vector<8x32xf32>
    %113 = arith.divf %111, %112 : vector<8x32xf32>
    %114 = vector.extract_strided_slice %76 {offsets = [0, 64], sizes = [8, 32], strides = [1, 1]} : vector<8x128xf32> to vector<8x32xf32>
    %115 = math.tanh %114 : vector<8x32xf32>
    %116 = vector.extract_strided_slice %76 {offsets = [0, 96], sizes = [8, 32], strides = [1, 1]} : vector<8x128xf32> to vector<8x32xf32>
    %117 = arith.negf %116 : vector<8x32xf32>
    %118 = math.exp %117 : vector<8x32xf32>
    %cst_27 = arith.constant 1.000000e+00 : f32
    %119 = vector.broadcast %cst_27 : f32 to vector<8x32xf32>
    %120 = arith.addf %119, %118 : vector<8x32xf32>
    %121 = arith.divf %119, %120 : vector<8x32xf32>
    %122 = arith.mulf %113, %66 : vector<8x32xf32>
    %123 = arith.mulf %107, %115 : vector<8x32xf32>
    %124 = arith.addf %122, %123 : vector<8x32xf32>
    %125 = math.tanh %124 : vector<8x32xf32>
    %126 = arith.mulf %121, %125 : vector<8x32xf32>
    %127 = tpu.concatenate %101, %126 in 0 : vector<8x32xf32>, vector<8x32xf32> -> vector<16x32xf32>
    %cst_28 = arith.constant dense<0.000000e+00> : vector<16x256xf32>
    %128 = tpu.matmul %127, %3, %cst_28 {dimension_numbers = #tpu.dot_dimension_numbers<[1], [0], [0], [1], [0, 0, 1, 1], [], []>} : vector<16x32xf32>, vector<32x256xf32>, vector<16x256xf32> -> vector<16x256xf32>
    %129 = vector.extract_strided_slice %9 {offsets = [16, 0], sizes = [8, 128], strides = [1, 1]} : vector<64x256xf32> to vector<8x128xf32>
    %130 = vector.extract_strided_slice %128 {offsets = [0, 0], sizes = [8, 128], strides = [1, 1]} : vector<16x256xf32> to vector<8x128xf32>
    %131 = arith.addf %129, %130 : vector<8x128xf32>
    %132 = vector.extract_strided_slice %9 {offsets = [40, 128], sizes = [8, 128], strides = [1, 1]} : vector<64x256xf32> to vector<8x128xf32>
    %133 = vector.extract_strided_slice %128 {offsets = [8, 128], sizes = [8, 128], strides = [1, 1]} : vector<16x256xf32> to vector<8x128xf32>
    %134 = arith.addf %132, %133 : vector<8x128xf32>
    %135 = vector.extract_strided_slice %131 {offsets = [0, 0], sizes = [8, 32], strides = [1, 1]} : vector<8x128xf32> to vector<8x32xf32>
    %136 = arith.negf %135 : vector<8x32xf32>
    %137 = math.exp %136 : vector<8x32xf32>
    %cst_29 = arith.constant 1.000000e+00 : f32
    %138 = vector.broadcast %cst_29 : f32 to vector<8x32xf32>
    %139 = arith.addf %138, %137 : vector<8x32xf32>
    %140 = arith.divf %138, %139 : vector<8x32xf32>
    %141 = vector.extract_strided_slice %131 {offsets = [0, 32], sizes = [8, 32], strides = [1, 1]} : vector<8x128xf32> to vector<8x32xf32>
    %142 = arith.negf %141 : vector<8x32xf32>
    %143 = math.exp %142 : vector<8x32xf32>
    %cst_30 = arith.constant 1.000000e+00 : f32
    %144 = vector.broadcast %cst_30 : f32 to vector<8x32xf32>
    %145 = arith.addf %144, %143 : vector<8x32xf32>
    %146 = arith.divf %144, %145 : vector<8x32xf32>
    %147 = vector.extract_strided_slice %131 {offsets = [0, 64], sizes = [8, 32], strides = [1, 1]} : vector<8x128xf32> to vector<8x32xf32>
    %148 = math.tanh %147 : vector<8x32xf32>
    %149 = vector.extract_strided_slice %131 {offsets = [0, 96], sizes = [8, 32], strides = [1, 1]} : vector<8x128xf32> to vector<8x32xf32>
    %150 = arith.negf %149 : vector<8x32xf32>
    %151 = math.exp %150 : vector<8x32xf32>
    %cst_31 = arith.constant 1.000000e+00 : f32
    %152 = vector.broadcast %cst_31 : f32 to vector<8x32xf32>
    %153 = arith.addf %152, %151 : vector<8x32xf32>
    %154 = arith.divf %152, %153 : vector<8x32xf32>
    %155 = arith.mulf %146, %99 : vector<8x32xf32>
    %156 = arith.mulf %140, %148 : vector<8x32xf32>
    %157 = arith.addf %155, %156 : vector<8x32xf32>
    %158 = math.tanh %157 : vector<8x32xf32>
    %159 = arith.mulf %154, %158 : vector<8x32xf32>
    %160 = vector.extract_strided_slice %134 {offsets = [0, 0], sizes = [8, 32], strides = [1, 1]} : vector<8x128xf32> to vector<8x32xf32>
    %161 = arith.negf %160 : vector<8x32xf32>
    %162 = math.exp %161 : vector<8x32xf32>
    %cst_32 = arith.constant 1.000000e+00 : f32
    %163 = vector.broadcast %cst_32 : f32 to vector<8x32xf32>
    %164 = arith.addf %163, %162 : vector<8x32xf32>
    %165 = arith.divf %163, %164 : vector<8x32xf32>
    %166 = vector.extract_strided_slice %134 {offsets = [0, 32], sizes = [8, 32], strides = [1, 1]} : vector<8x128xf32> to vector<8x32xf32>
    %167 = arith.negf %166 : vector<8x32xf32>
    %168 = math.exp %167 : vector<8x32xf32>
    %cst_33 = arith.constant 1.000000e+00 : f32
    %169 = vector.broadcast %cst_33 : f32 to vector<8x32xf32>
    %170 = arith.addf %169, %168 : vector<8x32xf32>
    %171 = arith.divf %169, %170 : vector<8x32xf32>
    %172 = vector.extract_strided_slice %134 {offsets = [0, 64], sizes = [8, 32], strides = [1, 1]} : vector<8x128xf32> to vector<8x32xf32>
    %173 = math.tanh %172 : vector<8x32xf32>
    %174 = vector.extract_strided_slice %134 {offsets = [0, 96], sizes = [8, 32], strides = [1, 1]} : vector<8x128xf32> to vector<8x32xf32>
    %175 = arith.negf %174 : vector<8x32xf32>
    %176 = math.exp %175 : vector<8x32xf32>
    %cst_34 = arith.constant 1.000000e+00 : f32
    %177 = vector.broadcast %cst_34 : f32 to vector<8x32xf32>
    %178 = arith.addf %177, %176 : vector<8x32xf32>
    %179 = arith.divf %177, %178 : vector<8x32xf32>
    %180 = arith.mulf %171, %124 : vector<8x32xf32>
    %181 = arith.mulf %165, %173 : vector<8x32xf32>
    %182 = arith.addf %180, %181 : vector<8x32xf32>
    %183 = math.tanh %182 : vector<8x32xf32>
    %184 = arith.mulf %179, %183 : vector<8x32xf32>
    %185 = tpu.concatenate %159, %184 in 0 : vector<8x32xf32>, vector<8x32xf32> -> vector<16x32xf32>
    %cst_35 = arith.constant dense<0.000000e+00> : vector<16x256xf32>
    %186 = tpu.matmul %185, %3, %cst_35 {dimension_numbers = #tpu.dot_dimension_numbers<[1], [0], [0], [1], [0, 0, 1, 1], [], []>} : vector<16x32xf32>, vector<32x256xf32>, vector<16x256xf32> -> vector<16x256xf32>
    %187 = vector.extract_strided_slice %9 {offsets = [24, 0], sizes = [8, 128], strides = [1, 1]} : vector<64x256xf32> to vector<8x128xf32>
    %188 = vector.extract_strided_slice %186 {offsets = [0, 0], sizes = [8, 128], strides = [1, 1]} : vector<16x256xf32> to vector<8x128xf32>
    %189 = arith.addf %187, %188 : vector<8x128xf32>
    %190 = vector.extract_strided_slice %9 {offsets = [32, 128], sizes = [8, 128], strides = [1, 1]} : vector<64x256xf32> to vector<8x128xf32>
    %191 = vector.extract_strided_slice %186 {offsets = [8, 128], sizes = [8, 128], strides = [1, 1]} : vector<16x256xf32> to vector<8x128xf32>
    %192 = arith.addf %190, %191 : vector<8x128xf32>
    %193 = vector.extract_strided_slice %189 {offsets = [0, 0], sizes = [8, 32], strides = [1, 1]} : vector<8x128xf32> to vector<8x32xf32>
    %194 = arith.negf %193 : vector<8x32xf32>
    %195 = math.exp %194 : vector<8x32xf32>
    %cst_36 = arith.constant 1.000000e+00 : f32
    %196 = vector.broadcast %cst_36 : f32 to vector<8x32xf32>
    %197 = arith.addf %196, %195 : vector<8x32xf32>
    %198 = arith.divf %196, %197 : vector<8x32xf32>
    %199 = vector.extract_strided_slice %189 {offsets = [0, 32], sizes = [8, 32], strides = [1, 1]} : vector<8x128xf32> to vector<8x32xf32>
    %200 = arith.negf %199 : vector<8x32xf32>
    %201 = math.exp %200 : vector<8x32xf32>
    %cst_37 = arith.constant 1.000000e+00 : f32
    %202 = vector.broadcast %cst_37 : f32 to vector<8x32xf32>
    %203 = arith.addf %202, %201 : vector<8x32xf32>
    %204 = arith.divf %202, %203 : vector<8x32xf32>
    %205 = vector.extract_strided_slice %189 {offsets = [0, 64], sizes = [8, 32], strides = [1, 1]} : vector<8x128xf32> to vector<8x32xf32>
    %206 = math.tanh %205 : vector<8x32xf32>
    %207 = vector.extract_strided_slice %189 {offsets = [0, 96], sizes = [8, 32], strides = [1, 1]} : vector<8x128xf32> to vector<8x32xf32>
    %208 = arith.negf %207 : vector<8x32xf32>
    %209 = math.exp %208 : vector<8x32xf32>
    %cst_38 = arith.constant 1.000000e+00 : f32
    %210 = vector.broadcast %cst_38 : f32 to vector<8x32xf32>
    %211 = arith.addf %210, %209 : vector<8x32xf32>
    %212 = arith.divf %210, %211 : vector<8x32xf32>
    %213 = arith.mulf %204, %157 : vector<8x32xf32>
    %214 = arith.mulf %198, %206 : vector<8x32xf32>
    %215 = arith.addf %213, %214 : vector<8x32xf32>
    %216 = math.tanh %215 : vector<8x32xf32>
    %217 = arith.mulf %212, %216 : vector<8x32xf32>
    %218 = vector.extract_strided_slice %192 {offsets = [0, 0], sizes = [8, 32], strides = [1, 1]} : vector<8x128xf32> to vector<8x32xf32>
    %219 = arith.negf %218 : vector<8x32xf32>
    %220 = math.exp %219 : vector<8x32xf32>
    %cst_39 = arith.constant 1.000000e+00 : f32
    %221 = vector.broadcast %cst_39 : f32 to vector<8x32xf32>
    %222 = arith.addf %221, %220 : vector<8x32xf32>
    %223 = arith.divf %221, %222 : vector<8x32xf32>
    %224 = vector.extract_strided_slice %192 {offsets = [0, 32], sizes = [8, 32], strides = [1, 1]} : vector<8x128xf32> to vector<8x32xf32>
    %225 = arith.negf %224 : vector<8x32xf32>
    %226 = math.exp %225 : vector<8x32xf32>
    %cst_40 = arith.constant 1.000000e+00 : f32
    %227 = vector.broadcast %cst_40 : f32 to vector<8x32xf32>
    %228 = arith.addf %227, %226 : vector<8x32xf32>
    %229 = arith.divf %227, %228 : vector<8x32xf32>
    %230 = vector.extract_strided_slice %192 {offsets = [0, 64], sizes = [8, 32], strides = [1, 1]} : vector<8x128xf32> to vector<8x32xf32>
    %231 = math.tanh %230 : vector<8x32xf32>
    %232 = vector.extract_strided_slice %192 {offsets = [0, 96], sizes = [8, 32], strides = [1, 1]} : vector<8x128xf32> to vector<8x32xf32>
    %233 = arith.negf %232 : vector<8x32xf32>
    %234 = math.exp %233 : vector<8x32xf32>
    %cst_41 = arith.constant 1.000000e+00 : f32
    %235 = vector.broadcast %cst_41 : f32 to vector<8x32xf32>
    %236 = arith.addf %235, %234 : vector<8x32xf32>
    %237 = arith.divf %235, %236 : vector<8x32xf32>
    %238 = arith.mulf %229, %182 : vector<8x32xf32>
    %239 = arith.mulf %223, %231 : vector<8x32xf32>
    %240 = arith.addf %238, %239 : vector<8x32xf32>
    %241 = math.tanh %240 : vector<8x32xf32>
    %242 = arith.mulf %237, %241 : vector<8x32xf32>
    %243 = tpu.concatenate %217, %242 in 0 : vector<8x32xf32>, vector<8x32xf32> -> vector<16x32xf32>
    %cst_42 = arith.constant dense<0.000000e+00> : vector<16x256xf32>
    %244 = tpu.matmul %243, %3, %cst_42 {dimension_numbers = #tpu.dot_dimension_numbers<[1], [0], [0], [1], [0, 0, 1, 1], [], []>} : vector<16x32xf32>, vector<32x256xf32>, vector<16x256xf32> -> vector<16x256xf32>
    %245 = vector.extract_strided_slice %9 {offsets = [32, 0], sizes = [8, 128], strides = [1, 1]} : vector<64x256xf32> to vector<8x128xf32>
    %246 = vector.extract_strided_slice %244 {offsets = [0, 0], sizes = [8, 128], strides = [1, 1]} : vector<16x256xf32> to vector<8x128xf32>
    %247 = arith.addf %245, %246 : vector<8x128xf32>
    %248 = vector.extract_strided_slice %9 {offsets = [24, 128], sizes = [8, 128], strides = [1, 1]} : vector<64x256xf32> to vector<8x128xf32>
    %249 = vector.extract_strided_slice %244 {offsets = [8, 128], sizes = [8, 128], strides = [1, 1]} : vector<16x256xf32> to vector<8x128xf32>
    %250 = arith.addf %248, %249 : vector<8x128xf32>
    %251 = vector.extract_strided_slice %247 {offsets = [0, 0], sizes = [8, 32], strides = [1, 1]} : vector<8x128xf32> to vector<8x32xf32>
    %252 = arith.negf %251 : vector<8x32xf32>
    %253 = math.exp %252 : vector<8x32xf32>
    %cst_43 = arith.constant 1.000000e+00 : f32
    %254 = vector.broadcast %cst_43 : f32 to vector<8x32xf32>
    %255 = arith.addf %254, %253 : vector<8x32xf32>
    %256 = arith.divf %254, %255 : vector<8x32xf32>
    %257 = vector.extract_strided_slice %247 {offsets = [0, 32], sizes = [8, 32], strides = [1, 1]} : vector<8x128xf32> to vector<8x32xf32>
    %258 = arith.negf %257 : vector<8x32xf32>
    %259 = math.exp %258 : vector<8x32xf32>
    %cst_44 = arith.constant 1.000000e+00 : f32
    %260 = vector.broadcast %cst_44 : f32 to vector<8x32xf32>
    %261 = arith.addf %260, %259 : vector<8x32xf32>
    %262 = arith.divf %260, %261 : vector<8x32xf32>
    %263 = vector.extract_strided_slice %247 {offsets = [0, 64], sizes = [8, 32], strides = [1, 1]} : vector<8x128xf32> to vector<8x32xf32>
    %264 = math.tanh %263 : vector<8x32xf32>
    %265 = vector.extract_strided_slice %247 {offsets = [0, 96], sizes = [8, 32], strides = [1, 1]} : vector<8x128xf32> to vector<8x32xf32>
    %266 = arith.negf %265 : vector<8x32xf32>
    %267 = math.exp %266 : vector<8x32xf32>
    %cst_45 = arith.constant 1.000000e+00 : f32
    %268 = vector.broadcast %cst_45 : f32 to vector<8x32xf32>
    %269 = arith.addf %268, %267 : vector<8x32xf32>
    %270 = arith.divf %268, %269 : vector<8x32xf32>
    %271 = arith.mulf %262, %215 : vector<8x32xf32>
    %272 = arith.mulf %256, %264 : vector<8x32xf32>
    %273 = arith.addf %271, %272 : vector<8x32xf32>
    %274 = math.tanh %273 : vector<8x32xf32>
    %275 = arith.mulf %270, %274 : vector<8x32xf32>
    %276 = vector.extract_strided_slice %250 {offsets = [0, 0], sizes = [8, 32], strides = [1, 1]} : vector<8x128xf32> to vector<8x32xf32>
    %277 = arith.negf %276 : vector<8x32xf32>
    %278 = math.exp %277 : vector<8x32xf32>
    %cst_46 = arith.constant 1.000000e+00 : f32
    %279 = vector.broadcast %cst_46 : f32 to vector<8x32xf32>
    %280 = arith.addf %279, %278 : vector<8x32xf32>
    %281 = arith.divf %279, %280 : vector<8x32xf32>
    %282 = vector.extract_strided_slice %250 {offsets = [0, 32], sizes = [8, 32], strides = [1, 1]} : vector<8x128xf32> to vector<8x32xf32>
    %283 = arith.negf %282 : vector<8x32xf32>
    %284 = math.exp %283 : vector<8x32xf32>
    %cst_47 = arith.constant 1.000000e+00 : f32
    %285 = vector.broadcast %cst_47 : f32 to vector<8x32xf32>
    %286 = arith.addf %285, %284 : vector<8x32xf32>
    %287 = arith.divf %285, %286 : vector<8x32xf32>
    %288 = vector.extract_strided_slice %250 {offsets = [0, 64], sizes = [8, 32], strides = [1, 1]} : vector<8x128xf32> to vector<8x32xf32>
    %289 = math.tanh %288 : vector<8x32xf32>
    %290 = vector.extract_strided_slice %250 {offsets = [0, 96], sizes = [8, 32], strides = [1, 1]} : vector<8x128xf32> to vector<8x32xf32>
    %291 = arith.negf %290 : vector<8x32xf32>
    %292 = math.exp %291 : vector<8x32xf32>
    %cst_48 = arith.constant 1.000000e+00 : f32
    %293 = vector.broadcast %cst_48 : f32 to vector<8x32xf32>
    %294 = arith.addf %293, %292 : vector<8x32xf32>
    %295 = arith.divf %293, %294 : vector<8x32xf32>
    %296 = arith.mulf %287, %240 : vector<8x32xf32>
    %297 = arith.mulf %281, %289 : vector<8x32xf32>
    %298 = arith.addf %296, %297 : vector<8x32xf32>
    %299 = math.tanh %298 : vector<8x32xf32>
    %300 = arith.mulf %295, %299 : vector<8x32xf32>
    %301 = tpu.concatenate %275, %300 in 0 : vector<8x32xf32>, vector<8x32xf32> -> vector<16x32xf32>
    %cst_49 = arith.constant dense<0.000000e+00> : vector<16x256xf32>
    %302 = tpu.matmul %301, %3, %cst_49 {dimension_numbers = #tpu.dot_dimension_numbers<[1], [0], [0], [1], [0, 0, 1, 1], [], []>} : vector<16x32xf32>, vector<32x256xf32>, vector<16x256xf32> -> vector<16x256xf32>
    %303 = vector.extract_strided_slice %9 {offsets = [40, 0], sizes = [8, 128], strides = [1, 1]} : vector<64x256xf32> to vector<8x128xf32>
    %304 = vector.extract_strided_slice %302 {offsets = [0, 0], sizes = [8, 128], strides = [1, 1]} : vector<16x256xf32> to vector<8x128xf32>
    %305 = arith.addf %303, %304 : vector<8x128xf32>
    %306 = vector.extract_strided_slice %9 {offsets = [16, 128], sizes = [8, 128], strides = [1, 1]} : vector<64x256xf32> to vector<8x128xf32>
    %307 = vector.extract_strided_slice %302 {offsets = [8, 128], sizes = [8, 128], strides = [1, 1]} : vector<16x256xf32> to vector<8x128xf32>
    %308 = arith.addf %306, %307 : vector<8x128xf32>
    %309 = vector.extract_strided_slice %305 {offsets = [0, 0], sizes = [8, 32], strides = [1, 1]} : vector<8x128xf32> to vector<8x32xf32>
    %310 = arith.negf %309 : vector<8x32xf32>
    %311 = math.exp %310 : vector<8x32xf32>
    %cst_50 = arith.constant 1.000000e+00 : f32
    %312 = vector.broadcast %cst_50 : f32 to vector<8x32xf32>
    %313 = arith.addf %312, %311 : vector<8x32xf32>
    %314 = arith.divf %312, %313 : vector<8x32xf32>
    %315 = vector.extract_strided_slice %305 {offsets = [0, 32], sizes = [8, 32], strides = [1, 1]} : vector<8x128xf32> to vector<8x32xf32>
    %316 = arith.negf %315 : vector<8x32xf32>
    %317 = math.exp %316 : vector<8x32xf32>
    %cst_51 = arith.constant 1.000000e+00 : f32
    %318 = vector.broadcast %cst_51 : f32 to vector<8x32xf32>
    %319 = arith.addf %318, %317 : vector<8x32xf32>
    %320 = arith.divf %318, %319 : vector<8x32xf32>
    %321 = vector.extract_strided_slice %305 {offsets = [0, 64], sizes = [8, 32], strides = [1, 1]} : vector<8x128xf32> to vector<8x32xf32>
    %322 = math.tanh %321 : vector<8x32xf32>
    %323 = vector.extract_strided_slice %305 {offsets = [0, 96], sizes = [8, 32], strides = [1, 1]} : vector<8x128xf32> to vector<8x32xf32>
    %324 = arith.negf %323 : vector<8x32xf32>
    %325 = math.exp %324 : vector<8x32xf32>
    %cst_52 = arith.constant 1.000000e+00 : f32
    %326 = vector.broadcast %cst_52 : f32 to vector<8x32xf32>
    %327 = arith.addf %326, %325 : vector<8x32xf32>
    %328 = arith.divf %326, %327 : vector<8x32xf32>
    %329 = arith.mulf %320, %273 : vector<8x32xf32>
    %330 = arith.mulf %314, %322 : vector<8x32xf32>
    %331 = arith.addf %329, %330 : vector<8x32xf32>
    %332 = math.tanh %331 : vector<8x32xf32>
    %333 = arith.mulf %328, %332 : vector<8x32xf32>
    %334 = vector.extract_strided_slice %308 {offsets = [0, 0], sizes = [8, 32], strides = [1, 1]} : vector<8x128xf32> to vector<8x32xf32>
    %335 = arith.negf %334 : vector<8x32xf32>
    %336 = math.exp %335 : vector<8x32xf32>
    %cst_53 = arith.constant 1.000000e+00 : f32
    %337 = vector.broadcast %cst_53 : f32 to vector<8x32xf32>
    %338 = arith.addf %337, %336 : vector<8x32xf32>
    %339 = arith.divf %337, %338 : vector<8x32xf32>
    %340 = vector.extract_strided_slice %308 {offsets = [0, 32], sizes = [8, 32], strides = [1, 1]} : vector<8x128xf32> to vector<8x32xf32>
    %341 = arith.negf %340 : vector<8x32xf32>
    %342 = math.exp %341 : vector<8x32xf32>
    %cst_54 = arith.constant 1.000000e+00 : f32
    %343 = vector.broadcast %cst_54 : f32 to vector<8x32xf32>
    %344 = arith.addf %343, %342 : vector<8x32xf32>
    %345 = arith.divf %343, %344 : vector<8x32xf32>
    %346 = vector.extract_strided_slice %308 {offsets = [0, 64], sizes = [8, 32], strides = [1, 1]} : vector<8x128xf32> to vector<8x32xf32>
    %347 = math.tanh %346 : vector<8x32xf32>
    %348 = vector.extract_strided_slice %308 {offsets = [0, 96], sizes = [8, 32], strides = [1, 1]} : vector<8x128xf32> to vector<8x32xf32>
    %349 = arith.negf %348 : vector<8x32xf32>
    %350 = math.exp %349 : vector<8x32xf32>
    %cst_55 = arith.constant 1.000000e+00 : f32
    %351 = vector.broadcast %cst_55 : f32 to vector<8x32xf32>
    %352 = arith.addf %351, %350 : vector<8x32xf32>
    %353 = arith.divf %351, %352 : vector<8x32xf32>
    %354 = arith.mulf %345, %298 : vector<8x32xf32>
    %355 = arith.mulf %339, %347 : vector<8x32xf32>
    %356 = arith.addf %354, %355 : vector<8x32xf32>
    %357 = math.tanh %356 : vector<8x32xf32>
    %358 = arith.mulf %353, %357 : vector<8x32xf32>
    %359 = tpu.concatenate %333, %358 in 0 : vector<8x32xf32>, vector<8x32xf32> -> vector<16x32xf32>
    %cst_56 = arith.constant dense<0.000000e+00> : vector<16x256xf32>
    %360 = tpu.matmul %359, %3, %cst_56 {dimension_numbers = #tpu.dot_dimension_numbers<[1], [0], [0], [1], [0, 0, 1, 1], [], []>} : vector<16x32xf32>, vector<32x256xf32>, vector<16x256xf32> -> vector<16x256xf32>
    %361 = vector.extract_strided_slice %9 {offsets = [48, 0], sizes = [8, 128], strides = [1, 1]} : vector<64x256xf32> to vector<8x128xf32>
    %362 = vector.extract_strided_slice %360 {offsets = [0, 0], sizes = [8, 128], strides = [1, 1]} : vector<16x256xf32> to vector<8x128xf32>
    %363 = arith.addf %361, %362 : vector<8x128xf32>
    %364 = vector.extract_strided_slice %9 {offsets = [8, 128], sizes = [8, 128], strides = [1, 1]} : vector<64x256xf32> to vector<8x128xf32>
    %365 = vector.extract_strided_slice %360 {offsets = [8, 128], sizes = [8, 128], strides = [1, 1]} : vector<16x256xf32> to vector<8x128xf32>
    %366 = arith.addf %364, %365 : vector<8x128xf32>
    %367 = vector.extract_strided_slice %363 {offsets = [0, 0], sizes = [8, 32], strides = [1, 1]} : vector<8x128xf32> to vector<8x32xf32>
    %368 = arith.negf %367 : vector<8x32xf32>
    %369 = math.exp %368 : vector<8x32xf32>
    %cst_57 = arith.constant 1.000000e+00 : f32
    %370 = vector.broadcast %cst_57 : f32 to vector<8x32xf32>
    %371 = arith.addf %370, %369 : vector<8x32xf32>
    %372 = arith.divf %370, %371 : vector<8x32xf32>
    %373 = vector.extract_strided_slice %363 {offsets = [0, 32], sizes = [8, 32], strides = [1, 1]} : vector<8x128xf32> to vector<8x32xf32>
    %374 = arith.negf %373 : vector<8x32xf32>
    %375 = math.exp %374 : vector<8x32xf32>
    %cst_58 = arith.constant 1.000000e+00 : f32
    %376 = vector.broadcast %cst_58 : f32 to vector<8x32xf32>
    %377 = arith.addf %376, %375 : vector<8x32xf32>
    %378 = arith.divf %376, %377 : vector<8x32xf32>
    %379 = vector.extract_strided_slice %363 {offsets = [0, 64], sizes = [8, 32], strides = [1, 1]} : vector<8x128xf32> to vector<8x32xf32>
    %380 = math.tanh %379 : vector<8x32xf32>
    %381 = vector.extract_strided_slice %363 {offsets = [0, 96], sizes = [8, 32], strides = [1, 1]} : vector<8x128xf32> to vector<8x32xf32>
    %382 = arith.negf %381 : vector<8x32xf32>
    %383 = math.exp %382 : vector<8x32xf32>
    %cst_59 = arith.constant 1.000000e+00 : f32
    %384 = vector.broadcast %cst_59 : f32 to vector<8x32xf32>
    %385 = arith.addf %384, %383 : vector<8x32xf32>
    %386 = arith.divf %384, %385 : vector<8x32xf32>
    %387 = arith.mulf %378, %331 : vector<8x32xf32>
    %388 = arith.mulf %372, %380 : vector<8x32xf32>
    %389 = arith.addf %387, %388 : vector<8x32xf32>
    %390 = math.tanh %389 : vector<8x32xf32>
    %391 = arith.mulf %386, %390 : vector<8x32xf32>
    %392 = vector.extract_strided_slice %366 {offsets = [0, 0], sizes = [8, 32], strides = [1, 1]} : vector<8x128xf32> to vector<8x32xf32>
    %393 = arith.negf %392 : vector<8x32xf32>
    %394 = math.exp %393 : vector<8x32xf32>
    %cst_60 = arith.constant 1.000000e+00 : f32
    %395 = vector.broadcast %cst_60 : f32 to vector<8x32xf32>
    %396 = arith.addf %395, %394 : vector<8x32xf32>
    %397 = arith.divf %395, %396 : vector<8x32xf32>
    %398 = vector.extract_strided_slice %366 {offsets = [0, 32], sizes = [8, 32], strides = [1, 1]} : vector<8x128xf32> to vector<8x32xf32>
    %399 = arith.negf %398 : vector<8x32xf32>
    %400 = math.exp %399 : vector<8x32xf32>
    %cst_61 = arith.constant 1.000000e+00 : f32
    %401 = vector.broadcast %cst_61 : f32 to vector<8x32xf32>
    %402 = arith.addf %401, %400 : vector<8x32xf32>
    %403 = arith.divf %401, %402 : vector<8x32xf32>
    %404 = vector.extract_strided_slice %366 {offsets = [0, 64], sizes = [8, 32], strides = [1, 1]} : vector<8x128xf32> to vector<8x32xf32>
    %405 = math.tanh %404 : vector<8x32xf32>
    %406 = vector.extract_strided_slice %366 {offsets = [0, 96], sizes = [8, 32], strides = [1, 1]} : vector<8x128xf32> to vector<8x32xf32>
    %407 = arith.negf %406 : vector<8x32xf32>
    %408 = math.exp %407 : vector<8x32xf32>
    %cst_62 = arith.constant 1.000000e+00 : f32
    %409 = vector.broadcast %cst_62 : f32 to vector<8x32xf32>
    %410 = arith.addf %409, %408 : vector<8x32xf32>
    %411 = arith.divf %409, %410 : vector<8x32xf32>
    %412 = arith.mulf %403, %356 : vector<8x32xf32>
    %413 = arith.mulf %397, %405 : vector<8x32xf32>
    %414 = arith.addf %412, %413 : vector<8x32xf32>
    %415 = math.tanh %414 : vector<8x32xf32>
    %416 = arith.mulf %411, %415 : vector<8x32xf32>
    %417 = tpu.concatenate %391, %416 in 0 : vector<8x32xf32>, vector<8x32xf32> -> vector<16x32xf32>
    %cst_63 = arith.constant dense<0.000000e+00> : vector<16x256xf32>
    %418 = tpu.matmul %417, %3, %cst_63 {dimension_numbers = #tpu.dot_dimension_numbers<[1], [0], [0], [1], [0, 0, 1, 1], [], []>} : vector<16x32xf32>, vector<32x256xf32>, vector<16x256xf32> -> vector<16x256xf32>
    %419 = vector.extract_strided_slice %9 {offsets = [56, 0], sizes = [8, 128], strides = [1, 1]} : vector<64x256xf32> to vector<8x128xf32>
    %420 = vector.extract_strided_slice %418 {offsets = [0, 0], sizes = [8, 128], strides = [1, 1]} : vector<16x256xf32> to vector<8x128xf32>
    %421 = arith.addf %419, %420 : vector<8x128xf32>
    %422 = vector.extract_strided_slice %9 {offsets = [0, 128], sizes = [8, 128], strides = [1, 1]} : vector<64x256xf32> to vector<8x128xf32>
    %423 = vector.extract_strided_slice %418 {offsets = [8, 128], sizes = [8, 128], strides = [1, 1]} : vector<16x256xf32> to vector<8x128xf32>
    %424 = arith.addf %422, %423 : vector<8x128xf32>
    %425 = vector.extract_strided_slice %421 {offsets = [0, 0], sizes = [8, 32], strides = [1, 1]} : vector<8x128xf32> to vector<8x32xf32>
    %426 = arith.negf %425 : vector<8x32xf32>
    %427 = math.exp %426 : vector<8x32xf32>
    %cst_64 = arith.constant 1.000000e+00 : f32
    %428 = vector.broadcast %cst_64 : f32 to vector<8x32xf32>
    %429 = arith.addf %428, %427 : vector<8x32xf32>
    %430 = arith.divf %428, %429 : vector<8x32xf32>
    %431 = vector.extract_strided_slice %421 {offsets = [0, 32], sizes = [8, 32], strides = [1, 1]} : vector<8x128xf32> to vector<8x32xf32>
    %432 = arith.negf %431 : vector<8x32xf32>
    %433 = math.exp %432 : vector<8x32xf32>
    %cst_65 = arith.constant 1.000000e+00 : f32
    %434 = vector.broadcast %cst_65 : f32 to vector<8x32xf32>
    %435 = arith.addf %434, %433 : vector<8x32xf32>
    %436 = arith.divf %434, %435 : vector<8x32xf32>
    %437 = vector.extract_strided_slice %421 {offsets = [0, 64], sizes = [8, 32], strides = [1, 1]} : vector<8x128xf32> to vector<8x32xf32>
    %438 = math.tanh %437 : vector<8x32xf32>
    %439 = vector.extract_strided_slice %421 {offsets = [0, 96], sizes = [8, 32], strides = [1, 1]} : vector<8x128xf32> to vector<8x32xf32>
    %440 = arith.negf %439 : vector<8x32xf32>
    %441 = math.exp %440 : vector<8x32xf32>
    %cst_66 = arith.constant 1.000000e+00 : f32
    %442 = vector.broadcast %cst_66 : f32 to vector<8x32xf32>
    %443 = arith.addf %442, %441 : vector<8x32xf32>
    %444 = arith.divf %442, %443 : vector<8x32xf32>
    %445 = arith.mulf %436, %389 : vector<8x32xf32>
    %446 = arith.mulf %430, %438 : vector<8x32xf32>
    %447 = arith.addf %445, %446 : vector<8x32xf32>
    %448 = math.tanh %447 : vector<8x32xf32>
    %449 = arith.mulf %444, %448 : vector<8x32xf32>
    %450 = vector.extract_strided_slice %424 {offsets = [0, 0], sizes = [8, 32], strides = [1, 1]} : vector<8x128xf32> to vector<8x32xf32>
    %451 = arith.negf %450 : vector<8x32xf32>
    %452 = math.exp %451 : vector<8x32xf32>
    %cst_67 = arith.constant 1.000000e+00 : f32
    %453 = vector.broadcast %cst_67 : f32 to vector<8x32xf32>
    %454 = arith.addf %453, %452 : vector<8x32xf32>
    %455 = arith.divf %453, %454 : vector<8x32xf32>
    %456 = vector.extract_strided_slice %424 {offsets = [0, 32], sizes = [8, 32], strides = [1, 1]} : vector<8x128xf32> to vector<8x32xf32>
    %457 = arith.negf %456 : vector<8x32xf32>
    %458 = math.exp %457 : vector<8x32xf32>
    %cst_68 = arith.constant 1.000000e+00 : f32
    %459 = vector.broadcast %cst_68 : f32 to vector<8x32xf32>
    %460 = arith.addf %459, %458 : vector<8x32xf32>
    %461 = arith.divf %459, %460 : vector<8x32xf32>
    %462 = vector.extract_strided_slice %424 {offsets = [0, 64], sizes = [8, 32], strides = [1, 1]} : vector<8x128xf32> to vector<8x32xf32>
    %463 = math.tanh %462 : vector<8x32xf32>
    %464 = vector.extract_strided_slice %424 {offsets = [0, 96], sizes = [8, 32], strides = [1, 1]} : vector<8x128xf32> to vector<8x32xf32>
    %465 = arith.negf %464 : vector<8x32xf32>
    %466 = math.exp %465 : vector<8x32xf32>
    %cst_69 = arith.constant 1.000000e+00 : f32
    %467 = vector.broadcast %cst_69 : f32 to vector<8x32xf32>
    %468 = arith.addf %467, %466 : vector<8x32xf32>
    %469 = arith.divf %467, %468 : vector<8x32xf32>
    %470 = arith.mulf %461, %414 : vector<8x32xf32>
    %471 = arith.mulf %455, %463 : vector<8x32xf32>
    %472 = arith.addf %470, %471 : vector<8x32xf32>
    %473 = math.tanh %472 : vector<8x32xf32>
    %474 = arith.mulf %469, %473 : vector<8x32xf32>
    %475 = tpu.concatenate %43, %101, %159, %217, %275, %333, %391, %449 in 0 : vector<8x32xf32>, vector<8x32xf32>, vector<8x32xf32>, vector<8x32xf32>, vector<8x32xf32>, vector<8x32xf32>, vector<8x32xf32>, vector<8x32xf32> -> vector<64x32xf32>
    %476 = tpu.concatenate %474, %416, %358, %300, %242, %184, %126, %68 in 0 : vector<8x32xf32>, vector<8x32xf32>, vector<8x32xf32>, vector<8x32xf32>, vector<8x32xf32>, vector<8x32xf32>, vector<8x32xf32>, vector<8x32xf32> -> vector<64x32xf32>
    %cst_70 = arith.constant dense<0.000000e+00> : vector<64x32xf32>
    %477 = tpu.matmul %475, %4, %cst_70 {dimension_numbers = #tpu.dot_dimension_numbers<[1], [0], [0], [1], [0, 0, 1, 1], [], []>} : vector<64x32xf32>, vector<32x32xf32>, vector<64x32xf32> -> vector<64x32xf32>
    %cst_71 = arith.constant dense<0.000000e+00> : vector<64x32xf32>
    %478 = tpu.matmul %476, %5, %cst_71 {dimension_numbers = #tpu.dot_dimension_numbers<[1], [0], [0], [1], [0, 0, 1, 1], [], []>} : vector<64x32xf32>, vector<32x32xf32>, vector<64x32xf32> -> vector<64x32xf32>
    %479 = arith.addf %477, %478 : vector<64x32xf32>
    %480 = vector.broadcast %6 : vector<1x32xf32> to vector<64x32xf32>
    %481 = arith.addf %479, %480 : vector<64x32xf32>
    %c0_72 = arith.constant 0 : index
    %c0_73 = arith.constant 0 : index
    %482 = vector.load %arg7[%c0_72, %c0_73] : memref<32x256xf32, #tpu.memory_space<vmem>>, vector<32x256xf32>
    %c0_74 = arith.constant 0 : index
    %c0_75 = arith.constant 0 : index
    %483 = vector.load %arg8[%c0_74, %c0_75] : memref<1x256xf32, #tpu.memory_space<vmem>>, vector<1x256xf32>
    %c0_76 = arith.constant 0 : index
    %c0_77 = arith.constant 0 : index
    %484 = vector.load %arg9[%c0_76, %c0_77] : memref<32x256xf32, #tpu.memory_space<vmem>>, vector<32x256xf32>
    %c0_78 = arith.constant 0 : index
    %c0_79 = arith.constant 0 : index
    %485 = vector.load %arg10[%c0_78, %c0_79] : memref<32x16xf32, #tpu.memory_space<vmem>>, vector<32x16xf32>
    %c0_80 = arith.constant 0 : index
    %c0_81 = arith.constant 0 : index
    %486 = vector.load %arg11[%c0_80, %c0_81] : memref<32x16xf32, #tpu.memory_space<vmem>>, vector<32x16xf32>
    %c0_82 = arith.constant 0 : index
    %c0_83 = arith.constant 0 : index
    %487 = vector.load %arg12[%c0_82, %c0_83] : memref<1x16xf32, #tpu.memory_space<vmem>>, vector<1x16xf32>
    %cst_84 = arith.constant dense<0.000000e+00> : vector<64x256xf32>
    %488 = tpu.matmul %481, %482, %cst_84 {dimension_numbers = #tpu.dot_dimension_numbers<[1], [0], [0], [1], [0, 0, 1, 1], [], []>} : vector<64x32xf32>, vector<32x256xf32>, vector<64x256xf32> -> vector<64x256xf32>
    %489 = vector.broadcast %483 : vector<1x256xf32> to vector<64x256xf32>
    %490 = arith.addf %488, %489 : vector<64x256xf32>
    %cst_85 = arith.constant 0.000000e+00 : f32
    %491 = vector.broadcast %cst_85 : f32 to vector<8x32xf32>
    %492 = tpu.concatenate %491, %491 in 0 : vector<8x32xf32>, vector<8x32xf32> -> vector<16x32xf32>
    %cst_86 = arith.constant dense<0.000000e+00> : vector<16x256xf32>
    %493 = tpu.matmul %492, %484, %cst_86 {dimension_numbers = #tpu.dot_dimension_numbers<[1], [0], [0], [1], [0, 0, 1, 1], [], []>} : vector<16x32xf32>, vector<32x256xf32>, vector<16x256xf32> -> vector<16x256xf32>
    %494 = vector.extract_strided_slice %490 {offsets = [0, 0], sizes = [8, 128], strides = [1, 1]} : vector<64x256xf32> to vector<8x128xf32>
    %495 = vector.extract_strided_slice %493 {offsets = [0, 0], sizes = [8, 128], strides = [1, 1]} : vector<16x256xf32> to vector<8x128xf32>
    %496 = arith.addf %494, %495 : vector<8x128xf32>
    %497 = vector.extract_strided_slice %490 {offsets = [56, 128], sizes = [8, 128], strides = [1, 1]} : vector<64x256xf32> to vector<8x128xf32>
    %498 = vector.extract_strided_slice %493 {offsets = [8, 128], sizes = [8, 128], strides = [1, 1]} : vector<16x256xf32> to vector<8x128xf32>
    %499 = arith.addf %497, %498 : vector<8x128xf32>
    %500 = vector.extract_strided_slice %496 {offsets = [0, 0], sizes = [8, 32], strides = [1, 1]} : vector<8x128xf32> to vector<8x32xf32>
    %501 = arith.negf %500 : vector<8x32xf32>
    %502 = math.exp %501 : vector<8x32xf32>
    %cst_87 = arith.constant 1.000000e+00 : f32
    %503 = vector.broadcast %cst_87 : f32 to vector<8x32xf32>
    %504 = arith.addf %503, %502 : vector<8x32xf32>
    %505 = arith.divf %503, %504 : vector<8x32xf32>
    %506 = vector.extract_strided_slice %496 {offsets = [0, 32], sizes = [8, 32], strides = [1, 1]} : vector<8x128xf32> to vector<8x32xf32>
    %507 = arith.negf %506 : vector<8x32xf32>
    %508 = math.exp %507 : vector<8x32xf32>
    %cst_88 = arith.constant 1.000000e+00 : f32
    %509 = vector.broadcast %cst_88 : f32 to vector<8x32xf32>
    %510 = arith.addf %509, %508 : vector<8x32xf32>
    %511 = arith.divf %509, %510 : vector<8x32xf32>
    %512 = vector.extract_strided_slice %496 {offsets = [0, 64], sizes = [8, 32], strides = [1, 1]} : vector<8x128xf32> to vector<8x32xf32>
    %513 = math.tanh %512 : vector<8x32xf32>
    %514 = vector.extract_strided_slice %496 {offsets = [0, 96], sizes = [8, 32], strides = [1, 1]} : vector<8x128xf32> to vector<8x32xf32>
    %515 = arith.negf %514 : vector<8x32xf32>
    %516 = math.exp %515 : vector<8x32xf32>
    %cst_89 = arith.constant 1.000000e+00 : f32
    %517 = vector.broadcast %cst_89 : f32 to vector<8x32xf32>
    %518 = arith.addf %517, %516 : vector<8x32xf32>
    %519 = arith.divf %517, %518 : vector<8x32xf32>
    %520 = arith.mulf %511, %491 : vector<8x32xf32>
    %521 = arith.mulf %505, %513 : vector<8x32xf32>
    %522 = arith.addf %520, %521 : vector<8x32xf32>
    %523 = math.tanh %522 : vector<8x32xf32>
    %524 = arith.mulf %519, %523 : vector<8x32xf32>
    %525 = vector.extract_strided_slice %499 {offsets = [0, 0], sizes = [8, 32], strides = [1, 1]} : vector<8x128xf32> to vector<8x32xf32>
    %526 = arith.negf %525 : vector<8x32xf32>
    %527 = math.exp %526 : vector<8x32xf32>
    %cst_90 = arith.constant 1.000000e+00 : f32
    %528 = vector.broadcast %cst_90 : f32 to vector<8x32xf32>
    %529 = arith.addf %528, %527 : vector<8x32xf32>
    %530 = arith.divf %528, %529 : vector<8x32xf32>
    %531 = vector.extract_strided_slice %499 {offsets = [0, 32], sizes = [8, 32], strides = [1, 1]} : vector<8x128xf32> to vector<8x32xf32>
    %532 = arith.negf %531 : vector<8x32xf32>
    %533 = math.exp %532 : vector<8x32xf32>
    %cst_91 = arith.constant 1.000000e+00 : f32
    %534 = vector.broadcast %cst_91 : f32 to vector<8x32xf32>
    %535 = arith.addf %534, %533 : vector<8x32xf32>
    %536 = arith.divf %534, %535 : vector<8x32xf32>
    %537 = vector.extract_strided_slice %499 {offsets = [0, 64], sizes = [8, 32], strides = [1, 1]} : vector<8x128xf32> to vector<8x32xf32>
    %538 = math.tanh %537 : vector<8x32xf32>
    %539 = vector.extract_strided_slice %499 {offsets = [0, 96], sizes = [8, 32], strides = [1, 1]} : vector<8x128xf32> to vector<8x32xf32>
    %540 = arith.negf %539 : vector<8x32xf32>
    %541 = math.exp %540 : vector<8x32xf32>
    %cst_92 = arith.constant 1.000000e+00 : f32
    %542 = vector.broadcast %cst_92 : f32 to vector<8x32xf32>
    %543 = arith.addf %542, %541 : vector<8x32xf32>
    %544 = arith.divf %542, %543 : vector<8x32xf32>
    %545 = arith.mulf %536, %491 : vector<8x32xf32>
    %546 = arith.mulf %530, %538 : vector<8x32xf32>
    %547 = arith.addf %545, %546 : vector<8x32xf32>
    %548 = math.tanh %547 : vector<8x32xf32>
    %549 = arith.mulf %544, %548 : vector<8x32xf32>
    %550 = tpu.concatenate %524, %549 in 0 : vector<8x32xf32>, vector<8x32xf32> -> vector<16x32xf32>
    %cst_93 = arith.constant dense<0.000000e+00> : vector<16x256xf32>
    %551 = tpu.matmul %550, %484, %cst_93 {dimension_numbers = #tpu.dot_dimension_numbers<[1], [0], [0], [1], [0, 0, 1, 1], [], []>} : vector<16x32xf32>, vector<32x256xf32>, vector<16x256xf32> -> vector<16x256xf32>
    %552 = vector.extract_strided_slice %490 {offsets = [8, 0], sizes = [8, 128], strides = [1, 1]} : vector<64x256xf32> to vector<8x128xf32>
    %553 = vector.extract_strided_slice %551 {offsets = [0, 0], sizes = [8, 128], strides = [1, 1]} : vector<16x256xf32> to vector<8x128xf32>
    %554 = arith.addf %552, %553 : vector<8x128xf32>
    %555 = vector.extract_strided_slice %490 {offsets = [48, 128], sizes = [8, 128], strides = [1, 1]} : vector<64x256xf32> to vector<8x128xf32>
    %556 = vector.extract_strided_slice %551 {offsets = [8, 128], sizes = [8, 128], strides = [1, 1]} : vector<16x256xf32> to vector<8x128xf32>
    %557 = arith.addf %555, %556 : vector<8x128xf32>
    %558 = vector.extract_strided_slice %554 {offsets = [0, 0], sizes = [8, 32], strides = [1, 1]} : vector<8x128xf32> to vector<8x32xf32>
    %559 = arith.negf %558 : vector<8x32xf32>
    %560 = math.exp %559 : vector<8x32xf32>
    %cst_94 = arith.constant 1.000000e+00 : f32
    %561 = vector.broadcast %cst_94 : f32 to vector<8x32xf32>
    %562 = arith.addf %561, %560 : vector<8x32xf32>
    %563 = arith.divf %561, %562 : vector<8x32xf32>
    %564 = vector.extract_strided_slice %554 {offsets = [0, 32], sizes = [8, 32], strides = [1, 1]} : vector<8x128xf32> to vector<8x32xf32>
    %565 = arith.negf %564 : vector<8x32xf32>
    %566 = math.exp %565 : vector<8x32xf32>
    %cst_95 = arith.constant 1.000000e+00 : f32
    %567 = vector.broadcast %cst_95 : f32 to vector<8x32xf32>
    %568 = arith.addf %567, %566 : vector<8x32xf32>
    %569 = arith.divf %567, %568 : vector<8x32xf32>
    %570 = vector.extract_strided_slice %554 {offsets = [0, 64], sizes = [8, 32], strides = [1, 1]} : vector<8x128xf32> to vector<8x32xf32>
    %571 = math.tanh %570 : vector<8x32xf32>
    %572 = vector.extract_strided_slice %554 {offsets = [0, 96], sizes = [8, 32], strides = [1, 1]} : vector<8x128xf32> to vector<8x32xf32>
    %573 = arith.negf %572 : vector<8x32xf32>
    %574 = math.exp %573 : vector<8x32xf32>
    %cst_96 = arith.constant 1.000000e+00 : f32
    %575 = vector.broadcast %cst_96 : f32 to vector<8x32xf32>
    %576 = arith.addf %575, %574 : vector<8x32xf32>
    %577 = arith.divf %575, %576 : vector<8x32xf32>
    %578 = arith.mulf %569, %522 : vector<8x32xf32>
    %579 = arith.mulf %563, %571 : vector<8x32xf32>
    %580 = arith.addf %578, %579 : vector<8x32xf32>
    %581 = math.tanh %580 : vector<8x32xf32>
    %582 = arith.mulf %577, %581 : vector<8x32xf32>
    %583 = vector.extract_strided_slice %557 {offsets = [0, 0], sizes = [8, 32], strides = [1, 1]} : vector<8x128xf32> to vector<8x32xf32>
    %584 = arith.negf %583 : vector<8x32xf32>
    %585 = math.exp %584 : vector<8x32xf32>
    %cst_97 = arith.constant 1.000000e+00 : f32
    %586 = vector.broadcast %cst_97 : f32 to vector<8x32xf32>
    %587 = arith.addf %586, %585 : vector<8x32xf32>
    %588 = arith.divf %586, %587 : vector<8x32xf32>
    %589 = vector.extract_strided_slice %557 {offsets = [0, 32], sizes = [8, 32], strides = [1, 1]} : vector<8x128xf32> to vector<8x32xf32>
    %590 = arith.negf %589 : vector<8x32xf32>
    %591 = math.exp %590 : vector<8x32xf32>
    %cst_98 = arith.constant 1.000000e+00 : f32
    %592 = vector.broadcast %cst_98 : f32 to vector<8x32xf32>
    %593 = arith.addf %592, %591 : vector<8x32xf32>
    %594 = arith.divf %592, %593 : vector<8x32xf32>
    %595 = vector.extract_strided_slice %557 {offsets = [0, 64], sizes = [8, 32], strides = [1, 1]} : vector<8x128xf32> to vector<8x32xf32>
    %596 = math.tanh %595 : vector<8x32xf32>
    %597 = vector.extract_strided_slice %557 {offsets = [0, 96], sizes = [8, 32], strides = [1, 1]} : vector<8x128xf32> to vector<8x32xf32>
    %598 = arith.negf %597 : vector<8x32xf32>
    %599 = math.exp %598 : vector<8x32xf32>
    %cst_99 = arith.constant 1.000000e+00 : f32
    %600 = vector.broadcast %cst_99 : f32 to vector<8x32xf32>
    %601 = arith.addf %600, %599 : vector<8x32xf32>
    %602 = arith.divf %600, %601 : vector<8x32xf32>
    %603 = arith.mulf %594, %547 : vector<8x32xf32>
    %604 = arith.mulf %588, %596 : vector<8x32xf32>
    %605 = arith.addf %603, %604 : vector<8x32xf32>
    %606 = math.tanh %605 : vector<8x32xf32>
    %607 = arith.mulf %602, %606 : vector<8x32xf32>
    %608 = tpu.concatenate %582, %607 in 0 : vector<8x32xf32>, vector<8x32xf32> -> vector<16x32xf32>
    %cst_100 = arith.constant dense<0.000000e+00> : vector<16x256xf32>
    %609 = tpu.matmul %608, %484, %cst_100 {dimension_numbers = #tpu.dot_dimension_numbers<[1], [0], [0], [1], [0, 0, 1, 1], [], []>} : vector<16x32xf32>, vector<32x256xf32>, vector<16x256xf32> -> vector<16x256xf32>
    %610 = vector.extract_strided_slice %490 {offsets = [16, 0], sizes = [8, 128], strides = [1, 1]} : vector<64x256xf32> to vector<8x128xf32>
    %611 = vector.extract_strided_slice %609 {offsets = [0, 0], sizes = [8, 128], strides = [1, 1]} : vector<16x256xf32> to vector<8x128xf32>
    %612 = arith.addf %610, %611 : vector<8x128xf32>
    %613 = vector.extract_strided_slice %490 {offsets = [40, 128], sizes = [8, 128], strides = [1, 1]} : vector<64x256xf32> to vector<8x128xf32>
    %614 = vector.extract_strided_slice %609 {offsets = [8, 128], sizes = [8, 128], strides = [1, 1]} : vector<16x256xf32> to vector<8x128xf32>
    %615 = arith.addf %613, %614 : vector<8x128xf32>
    %616 = vector.extract_strided_slice %612 {offsets = [0, 0], sizes = [8, 32], strides = [1, 1]} : vector<8x128xf32> to vector<8x32xf32>
    %617 = arith.negf %616 : vector<8x32xf32>
    %618 = math.exp %617 : vector<8x32xf32>
    %cst_101 = arith.constant 1.000000e+00 : f32
    %619 = vector.broadcast %cst_101 : f32 to vector<8x32xf32>
    %620 = arith.addf %619, %618 : vector<8x32xf32>
    %621 = arith.divf %619, %620 : vector<8x32xf32>
    %622 = vector.extract_strided_slice %612 {offsets = [0, 32], sizes = [8, 32], strides = [1, 1]} : vector<8x128xf32> to vector<8x32xf32>
    %623 = arith.negf %622 : vector<8x32xf32>
    %624 = math.exp %623 : vector<8x32xf32>
    %cst_102 = arith.constant 1.000000e+00 : f32
    %625 = vector.broadcast %cst_102 : f32 to vector<8x32xf32>
    %626 = arith.addf %625, %624 : vector<8x32xf32>
    %627 = arith.divf %625, %626 : vector<8x32xf32>
    %628 = vector.extract_strided_slice %612 {offsets = [0, 64], sizes = [8, 32], strides = [1, 1]} : vector<8x128xf32> to vector<8x32xf32>
    %629 = math.tanh %628 : vector<8x32xf32>
    %630 = vector.extract_strided_slice %612 {offsets = [0, 96], sizes = [8, 32], strides = [1, 1]} : vector<8x128xf32> to vector<8x32xf32>
    %631 = arith.negf %630 : vector<8x32xf32>
    %632 = math.exp %631 : vector<8x32xf32>
    %cst_103 = arith.constant 1.000000e+00 : f32
    %633 = vector.broadcast %cst_103 : f32 to vector<8x32xf32>
    %634 = arith.addf %633, %632 : vector<8x32xf32>
    %635 = arith.divf %633, %634 : vector<8x32xf32>
    %636 = arith.mulf %627, %580 : vector<8x32xf32>
    %637 = arith.mulf %621, %629 : vector<8x32xf32>
    %638 = arith.addf %636, %637 : vector<8x32xf32>
    %639 = math.tanh %638 : vector<8x32xf32>
    %640 = arith.mulf %635, %639 : vector<8x32xf32>
    %641 = vector.extract_strided_slice %615 {offsets = [0, 0], sizes = [8, 32], strides = [1, 1]} : vector<8x128xf32> to vector<8x32xf32>
    %642 = arith.negf %641 : vector<8x32xf32>
    %643 = math.exp %642 : vector<8x32xf32>
    %cst_104 = arith.constant 1.000000e+00 : f32
    %644 = vector.broadcast %cst_104 : f32 to vector<8x32xf32>
    %645 = arith.addf %644, %643 : vector<8x32xf32>
    %646 = arith.divf %644, %645 : vector<8x32xf32>
    %647 = vector.extract_strided_slice %615 {offsets = [0, 32], sizes = [8, 32], strides = [1, 1]} : vector<8x128xf32> to vector<8x32xf32>
    %648 = arith.negf %647 : vector<8x32xf32>
    %649 = math.exp %648 : vector<8x32xf32>
    %cst_105 = arith.constant 1.000000e+00 : f32
    %650 = vector.broadcast %cst_105 : f32 to vector<8x32xf32>
    %651 = arith.addf %650, %649 : vector<8x32xf32>
    %652 = arith.divf %650, %651 : vector<8x32xf32>
    %653 = vector.extract_strided_slice %615 {offsets = [0, 64], sizes = [8, 32], strides = [1, 1]} : vector<8x128xf32> to vector<8x32xf32>
    %654 = math.tanh %653 : vector<8x32xf32>
    %655 = vector.extract_strided_slice %615 {offsets = [0, 96], sizes = [8, 32], strides = [1, 1]} : vector<8x128xf32> to vector<8x32xf32>
    %656 = arith.negf %655 : vector<8x32xf32>
    %657 = math.exp %656 : vector<8x32xf32>
    %cst_106 = arith.constant 1.000000e+00 : f32
    %658 = vector.broadcast %cst_106 : f32 to vector<8x32xf32>
    %659 = arith.addf %658, %657 : vector<8x32xf32>
    %660 = arith.divf %658, %659 : vector<8x32xf32>
    %661 = arith.mulf %652, %605 : vector<8x32xf32>
    %662 = arith.mulf %646, %654 : vector<8x32xf32>
    %663 = arith.addf %661, %662 : vector<8x32xf32>
    %664 = math.tanh %663 : vector<8x32xf32>
    %665 = arith.mulf %660, %664 : vector<8x32xf32>
    %666 = tpu.concatenate %640, %665 in 0 : vector<8x32xf32>, vector<8x32xf32> -> vector<16x32xf32>
    %cst_107 = arith.constant dense<0.000000e+00> : vector<16x256xf32>
    %667 = tpu.matmul %666, %484, %cst_107 {dimension_numbers = #tpu.dot_dimension_numbers<[1], [0], [0], [1], [0, 0, 1, 1], [], []>} : vector<16x32xf32>, vector<32x256xf32>, vector<16x256xf32> -> vector<16x256xf32>
    %668 = vector.extract_strided_slice %490 {offsets = [24, 0], sizes = [8, 128], strides = [1, 1]} : vector<64x256xf32> to vector<8x128xf32>
    %669 = vector.extract_strided_slice %667 {offsets = [0, 0], sizes = [8, 128], strides = [1, 1]} : vector<16x256xf32> to vector<8x128xf32>
    %670 = arith.addf %668, %669 : vector<8x128xf32>
    %671 = vector.extract_strided_slice %490 {offsets = [32, 128], sizes = [8, 128], strides = [1, 1]} : vector<64x256xf32> to vector<8x128xf32>
    %672 = vector.extract_strided_slice %667 {offsets = [8, 128], sizes = [8, 128], strides = [1, 1]} : vector<16x256xf32> to vector<8x128xf32>
    %673 = arith.addf %671, %672 : vector<8x128xf32>
    %674 = vector.extract_strided_slice %670 {offsets = [0, 0], sizes = [8, 32], strides = [1, 1]} : vector<8x128xf32> to vector<8x32xf32>
    %675 = arith.negf %674 : vector<8x32xf32>
    %676 = math.exp %675 : vector<8x32xf32>
    %cst_108 = arith.constant 1.000000e+00 : f32
    %677 = vector.broadcast %cst_108 : f32 to vector<8x32xf32>
    %678 = arith.addf %677, %676 : vector<8x32xf32>
    %679 = arith.divf %677, %678 : vector<8x32xf32>
    %680 = vector.extract_strided_slice %670 {offsets = [0, 32], sizes = [8, 32], strides = [1, 1]} : vector<8x128xf32> to vector<8x32xf32>
    %681 = arith.negf %680 : vector<8x32xf32>
    %682 = math.exp %681 : vector<8x32xf32>
    %cst_109 = arith.constant 1.000000e+00 : f32
    %683 = vector.broadcast %cst_109 : f32 to vector<8x32xf32>
    %684 = arith.addf %683, %682 : vector<8x32xf32>
    %685 = arith.divf %683, %684 : vector<8x32xf32>
    %686 = vector.extract_strided_slice %670 {offsets = [0, 64], sizes = [8, 32], strides = [1, 1]} : vector<8x128xf32> to vector<8x32xf32>
    %687 = math.tanh %686 : vector<8x32xf32>
    %688 = vector.extract_strided_slice %670 {offsets = [0, 96], sizes = [8, 32], strides = [1, 1]} : vector<8x128xf32> to vector<8x32xf32>
    %689 = arith.negf %688 : vector<8x32xf32>
    %690 = math.exp %689 : vector<8x32xf32>
    %cst_110 = arith.constant 1.000000e+00 : f32
    %691 = vector.broadcast %cst_110 : f32 to vector<8x32xf32>
    %692 = arith.addf %691, %690 : vector<8x32xf32>
    %693 = arith.divf %691, %692 : vector<8x32xf32>
    %694 = arith.mulf %685, %638 : vector<8x32xf32>
    %695 = arith.mulf %679, %687 : vector<8x32xf32>
    %696 = arith.addf %694, %695 : vector<8x32xf32>
    %697 = math.tanh %696 : vector<8x32xf32>
    %698 = arith.mulf %693, %697 : vector<8x32xf32>
    %699 = vector.extract_strided_slice %673 {offsets = [0, 0], sizes = [8, 32], strides = [1, 1]} : vector<8x128xf32> to vector<8x32xf32>
    %700 = arith.negf %699 : vector<8x32xf32>
    %701 = math.exp %700 : vector<8x32xf32>
    %cst_111 = arith.constant 1.000000e+00 : f32
    %702 = vector.broadcast %cst_111 : f32 to vector<8x32xf32>
    %703 = arith.addf %702, %701 : vector<8x32xf32>
    %704 = arith.divf %702, %703 : vector<8x32xf32>
    %705 = vector.extract_strided_slice %673 {offsets = [0, 32], sizes = [8, 32], strides = [1, 1]} : vector<8x128xf32> to vector<8x32xf32>
    %706 = arith.negf %705 : vector<8x32xf32>
    %707 = math.exp %706 : vector<8x32xf32>
    %cst_112 = arith.constant 1.000000e+00 : f32
    %708 = vector.broadcast %cst_112 : f32 to vector<8x32xf32>
    %709 = arith.addf %708, %707 : vector<8x32xf32>
    %710 = arith.divf %708, %709 : vector<8x32xf32>
    %711 = vector.extract_strided_slice %673 {offsets = [0, 64], sizes = [8, 32], strides = [1, 1]} : vector<8x128xf32> to vector<8x32xf32>
    %712 = math.tanh %711 : vector<8x32xf32>
    %713 = vector.extract_strided_slice %673 {offsets = [0, 96], sizes = [8, 32], strides = [1, 1]} : vector<8x128xf32> to vector<8x32xf32>
    %714 = arith.negf %713 : vector<8x32xf32>
    %715 = math.exp %714 : vector<8x32xf32>
    %cst_113 = arith.constant 1.000000e+00 : f32
    %716 = vector.broadcast %cst_113 : f32 to vector<8x32xf32>
    %717 = arith.addf %716, %715 : vector<8x32xf32>
    %718 = arith.divf %716, %717 : vector<8x32xf32>
    %719 = arith.mulf %710, %663 : vector<8x32xf32>
    %720 = arith.mulf %704, %712 : vector<8x32xf32>
    %721 = arith.addf %719, %720 : vector<8x32xf32>
    %722 = math.tanh %721 : vector<8x32xf32>
    %723 = arith.mulf %718, %722 : vector<8x32xf32>
    %724 = tpu.concatenate %698, %723 in 0 : vector<8x32xf32>, vector<8x32xf32> -> vector<16x32xf32>
    %cst_114 = arith.constant dense<0.000000e+00> : vector<16x256xf32>
    %725 = tpu.matmul %724, %484, %cst_114 {dimension_numbers = #tpu.dot_dimension_numbers<[1], [0], [0], [1], [0, 0, 1, 1], [], []>} : vector<16x32xf32>, vector<32x256xf32>, vector<16x256xf32> -> vector<16x256xf32>
    %726 = vector.extract_strided_slice %490 {offsets = [32, 0], sizes = [8, 128], strides = [1, 1]} : vector<64x256xf32> to vector<8x128xf32>
    %727 = vector.extract_strided_slice %725 {offsets = [0, 0], sizes = [8, 128], strides = [1, 1]} : vector<16x256xf32> to vector<8x128xf32>
    %728 = arith.addf %726, %727 : vector<8x128xf32>
    %729 = vector.extract_strided_slice %490 {offsets = [24, 128], sizes = [8, 128], strides = [1, 1]} : vector<64x256xf32> to vector<8x128xf32>
    %730 = vector.extract_strided_slice %725 {offsets = [8, 128], sizes = [8, 128], strides = [1, 1]} : vector<16x256xf32> to vector<8x128xf32>
    %731 = arith.addf %729, %730 : vector<8x128xf32>
    %732 = vector.extract_strided_slice %728 {offsets = [0, 0], sizes = [8, 32], strides = [1, 1]} : vector<8x128xf32> to vector<8x32xf32>
    %733 = arith.negf %732 : vector<8x32xf32>
    %734 = math.exp %733 : vector<8x32xf32>
    %cst_115 = arith.constant 1.000000e+00 : f32
    %735 = vector.broadcast %cst_115 : f32 to vector<8x32xf32>
    %736 = arith.addf %735, %734 : vector<8x32xf32>
    %737 = arith.divf %735, %736 : vector<8x32xf32>
    %738 = vector.extract_strided_slice %728 {offsets = [0, 32], sizes = [8, 32], strides = [1, 1]} : vector<8x128xf32> to vector<8x32xf32>
    %739 = arith.negf %738 : vector<8x32xf32>
    %740 = math.exp %739 : vector<8x32xf32>
    %cst_116 = arith.constant 1.000000e+00 : f32
    %741 = vector.broadcast %cst_116 : f32 to vector<8x32xf32>
    %742 = arith.addf %741, %740 : vector<8x32xf32>
    %743 = arith.divf %741, %742 : vector<8x32xf32>
    %744 = vector.extract_strided_slice %728 {offsets = [0, 64], sizes = [8, 32], strides = [1, 1]} : vector<8x128xf32> to vector<8x32xf32>
    %745 = math.tanh %744 : vector<8x32xf32>
    %746 = vector.extract_strided_slice %728 {offsets = [0, 96], sizes = [8, 32], strides = [1, 1]} : vector<8x128xf32> to vector<8x32xf32>
    %747 = arith.negf %746 : vector<8x32xf32>
    %748 = math.exp %747 : vector<8x32xf32>
    %cst_117 = arith.constant 1.000000e+00 : f32
    %749 = vector.broadcast %cst_117 : f32 to vector<8x32xf32>
    %750 = arith.addf %749, %748 : vector<8x32xf32>
    %751 = arith.divf %749, %750 : vector<8x32xf32>
    %752 = arith.mulf %743, %696 : vector<8x32xf32>
    %753 = arith.mulf %737, %745 : vector<8x32xf32>
    %754 = arith.addf %752, %753 : vector<8x32xf32>
    %755 = math.tanh %754 : vector<8x32xf32>
    %756 = arith.mulf %751, %755 : vector<8x32xf32>
    %757 = vector.extract_strided_slice %731 {offsets = [0, 0], sizes = [8, 32], strides = [1, 1]} : vector<8x128xf32> to vector<8x32xf32>
    %758 = arith.negf %757 : vector<8x32xf32>
    %759 = math.exp %758 : vector<8x32xf32>
    %cst_118 = arith.constant 1.000000e+00 : f32
    %760 = vector.broadcast %cst_118 : f32 to vector<8x32xf32>
    %761 = arith.addf %760, %759 : vector<8x32xf32>
    %762 = arith.divf %760, %761 : vector<8x32xf32>
    %763 = vector.extract_strided_slice %731 {offsets = [0, 32], sizes = [8, 32], strides = [1, 1]} : vector<8x128xf32> to vector<8x32xf32>
    %764 = arith.negf %763 : vector<8x32xf32>
    %765 = math.exp %764 : vector<8x32xf32>
    %cst_119 = arith.constant 1.000000e+00 : f32
    %766 = vector.broadcast %cst_119 : f32 to vector<8x32xf32>
    %767 = arith.addf %766, %765 : vector<8x32xf32>
    %768 = arith.divf %766, %767 : vector<8x32xf32>
    %769 = vector.extract_strided_slice %731 {offsets = [0, 64], sizes = [8, 32], strides = [1, 1]} : vector<8x128xf32> to vector<8x32xf32>
    %770 = math.tanh %769 : vector<8x32xf32>
    %771 = vector.extract_strided_slice %731 {offsets = [0, 96], sizes = [8, 32], strides = [1, 1]} : vector<8x128xf32> to vector<8x32xf32>
    %772 = arith.negf %771 : vector<8x32xf32>
    %773 = math.exp %772 : vector<8x32xf32>
    %cst_120 = arith.constant 1.000000e+00 : f32
    %774 = vector.broadcast %cst_120 : f32 to vector<8x32xf32>
    %775 = arith.addf %774, %773 : vector<8x32xf32>
    %776 = arith.divf %774, %775 : vector<8x32xf32>
    %777 = arith.mulf %768, %721 : vector<8x32xf32>
    %778 = arith.mulf %762, %770 : vector<8x32xf32>
    %779 = arith.addf %777, %778 : vector<8x32xf32>
    %780 = math.tanh %779 : vector<8x32xf32>
    %781 = arith.mulf %776, %780 : vector<8x32xf32>
    %782 = tpu.concatenate %756, %781 in 0 : vector<8x32xf32>, vector<8x32xf32> -> vector<16x32xf32>
    %cst_121 = arith.constant dense<0.000000e+00> : vector<16x256xf32>
    %783 = tpu.matmul %782, %484, %cst_121 {dimension_numbers = #tpu.dot_dimension_numbers<[1], [0], [0], [1], [0, 0, 1, 1], [], []>} : vector<16x32xf32>, vector<32x256xf32>, vector<16x256xf32> -> vector<16x256xf32>
    %784 = vector.extract_strided_slice %490 {offsets = [40, 0], sizes = [8, 128], strides = [1, 1]} : vector<64x256xf32> to vector<8x128xf32>
    %785 = vector.extract_strided_slice %783 {offsets = [0, 0], sizes = [8, 128], strides = [1, 1]} : vector<16x256xf32> to vector<8x128xf32>
    %786 = arith.addf %784, %785 : vector<8x128xf32>
    %787 = vector.extract_strided_slice %490 {offsets = [16, 128], sizes = [8, 128], strides = [1, 1]} : vector<64x256xf32> to vector<8x128xf32>
    %788 = vector.extract_strided_slice %783 {offsets = [8, 128], sizes = [8, 128], strides = [1, 1]} : vector<16x256xf32> to vector<8x128xf32>
    %789 = arith.addf %787, %788 : vector<8x128xf32>
    %790 = vector.extract_strided_slice %786 {offsets = [0, 0], sizes = [8, 32], strides = [1, 1]} : vector<8x128xf32> to vector<8x32xf32>
    %791 = arith.negf %790 : vector<8x32xf32>
    %792 = math.exp %791 : vector<8x32xf32>
    %cst_122 = arith.constant 1.000000e+00 : f32
    %793 = vector.broadcast %cst_122 : f32 to vector<8x32xf32>
    %794 = arith.addf %793, %792 : vector<8x32xf32>
    %795 = arith.divf %793, %794 : vector<8x32xf32>
    %796 = vector.extract_strided_slice %786 {offsets = [0, 32], sizes = [8, 32], strides = [1, 1]} : vector<8x128xf32> to vector<8x32xf32>
    %797 = arith.negf %796 : vector<8x32xf32>
    %798 = math.exp %797 : vector<8x32xf32>
    %cst_123 = arith.constant 1.000000e+00 : f32
    %799 = vector.broadcast %cst_123 : f32 to vector<8x32xf32>
    %800 = arith.addf %799, %798 : vector<8x32xf32>
    %801 = arith.divf %799, %800 : vector<8x32xf32>
    %802 = vector.extract_strided_slice %786 {offsets = [0, 64], sizes = [8, 32], strides = [1, 1]} : vector<8x128xf32> to vector<8x32xf32>
    %803 = math.tanh %802 : vector<8x32xf32>
    %804 = vector.extract_strided_slice %786 {offsets = [0, 96], sizes = [8, 32], strides = [1, 1]} : vector<8x128xf32> to vector<8x32xf32>
    %805 = arith.negf %804 : vector<8x32xf32>
    %806 = math.exp %805 : vector<8x32xf32>
    %cst_124 = arith.constant 1.000000e+00 : f32
    %807 = vector.broadcast %cst_124 : f32 to vector<8x32xf32>
    %808 = arith.addf %807, %806 : vector<8x32xf32>
    %809 = arith.divf %807, %808 : vector<8x32xf32>
    %810 = arith.mulf %801, %754 : vector<8x32xf32>
    %811 = arith.mulf %795, %803 : vector<8x32xf32>
    %812 = arith.addf %810, %811 : vector<8x32xf32>
    %813 = math.tanh %812 : vector<8x32xf32>
    %814 = arith.mulf %809, %813 : vector<8x32xf32>
    %815 = vector.extract_strided_slice %789 {offsets = [0, 0], sizes = [8, 32], strides = [1, 1]} : vector<8x128xf32> to vector<8x32xf32>
    %816 = arith.negf %815 : vector<8x32xf32>
    %817 = math.exp %816 : vector<8x32xf32>
    %cst_125 = arith.constant 1.000000e+00 : f32
    %818 = vector.broadcast %cst_125 : f32 to vector<8x32xf32>
    %819 = arith.addf %818, %817 : vector<8x32xf32>
    %820 = arith.divf %818, %819 : vector<8x32xf32>
    %821 = vector.extract_strided_slice %789 {offsets = [0, 32], sizes = [8, 32], strides = [1, 1]} : vector<8x128xf32> to vector<8x32xf32>
    %822 = arith.negf %821 : vector<8x32xf32>
    %823 = math.exp %822 : vector<8x32xf32>
    %cst_126 = arith.constant 1.000000e+00 : f32
    %824 = vector.broadcast %cst_126 : f32 to vector<8x32xf32>
    %825 = arith.addf %824, %823 : vector<8x32xf32>
    %826 = arith.divf %824, %825 : vector<8x32xf32>
    %827 = vector.extract_strided_slice %789 {offsets = [0, 64], sizes = [8, 32], strides = [1, 1]} : vector<8x128xf32> to vector<8x32xf32>
    %828 = math.tanh %827 : vector<8x32xf32>
    %829 = vector.extract_strided_slice %789 {offsets = [0, 96], sizes = [8, 32], strides = [1, 1]} : vector<8x128xf32> to vector<8x32xf32>
    %830 = arith.negf %829 : vector<8x32xf32>
    %831 = math.exp %830 : vector<8x32xf32>
    %cst_127 = arith.constant 1.000000e+00 : f32
    %832 = vector.broadcast %cst_127 : f32 to vector<8x32xf32>
    %833 = arith.addf %832, %831 : vector<8x32xf32>
    %834 = arith.divf %832, %833 : vector<8x32xf32>
    %835 = arith.mulf %826, %779 : vector<8x32xf32>
    %836 = arith.mulf %820, %828 : vector<8x32xf32>
    %837 = arith.addf %835, %836 : vector<8x32xf32>
    %838 = math.tanh %837 : vector<8x32xf32>
    %839 = arith.mulf %834, %838 : vector<8x32xf32>
    %840 = tpu.concatenate %814, %839 in 0 : vector<8x32xf32>, vector<8x32xf32> -> vector<16x32xf32>
    %cst_128 = arith.constant dense<0.000000e+00> : vector<16x256xf32>
    %841 = tpu.matmul %840, %484, %cst_128 {dimension_numbers = #tpu.dot_dimension_numbers<[1], [0], [0], [1], [0, 0, 1, 1], [], []>} : vector<16x32xf32>, vector<32x256xf32>, vector<16x256xf32> -> vector<16x256xf32>
    %842 = vector.extract_strided_slice %490 {offsets = [48, 0], sizes = [8, 128], strides = [1, 1]} : vector<64x256xf32> to vector<8x128xf32>
    %843 = vector.extract_strided_slice %841 {offsets = [0, 0], sizes = [8, 128], strides = [1, 1]} : vector<16x256xf32> to vector<8x128xf32>
    %844 = arith.addf %842, %843 : vector<8x128xf32>
    %845 = vector.extract_strided_slice %490 {offsets = [8, 128], sizes = [8, 128], strides = [1, 1]} : vector<64x256xf32> to vector<8x128xf32>
    %846 = vector.extract_strided_slice %841 {offsets = [8, 128], sizes = [8, 128], strides = [1, 1]} : vector<16x256xf32> to vector<8x128xf32>
    %847 = arith.addf %845, %846 : vector<8x128xf32>
    %848 = vector.extract_strided_slice %844 {offsets = [0, 0], sizes = [8, 32], strides = [1, 1]} : vector<8x128xf32> to vector<8x32xf32>
    %849 = arith.negf %848 : vector<8x32xf32>
    %850 = math.exp %849 : vector<8x32xf32>
    %cst_129 = arith.constant 1.000000e+00 : f32
    %851 = vector.broadcast %cst_129 : f32 to vector<8x32xf32>
    %852 = arith.addf %851, %850 : vector<8x32xf32>
    %853 = arith.divf %851, %852 : vector<8x32xf32>
    %854 = vector.extract_strided_slice %844 {offsets = [0, 32], sizes = [8, 32], strides = [1, 1]} : vector<8x128xf32> to vector<8x32xf32>
    %855 = arith.negf %854 : vector<8x32xf32>
    %856 = math.exp %855 : vector<8x32xf32>
    %cst_130 = arith.constant 1.000000e+00 : f32
    %857 = vector.broadcast %cst_130 : f32 to vector<8x32xf32>
    %858 = arith.addf %857, %856 : vector<8x32xf32>
    %859 = arith.divf %857, %858 : vector<8x32xf32>
    %860 = vector.extract_strided_slice %844 {offsets = [0, 64], sizes = [8, 32], strides = [1, 1]} : vector<8x128xf32> to vector<8x32xf32>
    %861 = math.tanh %860 : vector<8x32xf32>
    %862 = vector.extract_strided_slice %844 {offsets = [0, 96], sizes = [8, 32], strides = [1, 1]} : vector<8x128xf32> to vector<8x32xf32>
    %863 = arith.negf %862 : vector<8x32xf32>
    %864 = math.exp %863 : vector<8x32xf32>
    %cst_131 = arith.constant 1.000000e+00 : f32
    %865 = vector.broadcast %cst_131 : f32 to vector<8x32xf32>
    %866 = arith.addf %865, %864 : vector<8x32xf32>
    %867 = arith.divf %865, %866 : vector<8x32xf32>
    %868 = arith.mulf %859, %812 : vector<8x32xf32>
    %869 = arith.mulf %853, %861 : vector<8x32xf32>
    %870 = arith.addf %868, %869 : vector<8x32xf32>
    %871 = math.tanh %870 : vector<8x32xf32>
    %872 = arith.mulf %867, %871 : vector<8x32xf32>
    %873 = vector.extract_strided_slice %847 {offsets = [0, 0], sizes = [8, 32], strides = [1, 1]} : vector<8x128xf32> to vector<8x32xf32>
    %874 = arith.negf %873 : vector<8x32xf32>
    %875 = math.exp %874 : vector<8x32xf32>
    %cst_132 = arith.constant 1.000000e+00 : f32
    %876 = vector.broadcast %cst_132 : f32 to vector<8x32xf32>
    %877 = arith.addf %876, %875 : vector<8x32xf32>
    %878 = arith.divf %876, %877 : vector<8x32xf32>
    %879 = vector.extract_strided_slice %847 {offsets = [0, 32], sizes = [8, 32], strides = [1, 1]} : vector<8x128xf32> to vector<8x32xf32>
    %880 = arith.negf %879 : vector<8x32xf32>
    %881 = math.exp %880 : vector<8x32xf32>
    %cst_133 = arith.constant 1.000000e+00 : f32
    %882 = vector.broadcast %cst_133 : f32 to vector<8x32xf32>
    %883 = arith.addf %882, %881 : vector<8x32xf32>
    %884 = arith.divf %882, %883 : vector<8x32xf32>
    %885 = vector.extract_strided_slice %847 {offsets = [0, 64], sizes = [8, 32], strides = [1, 1]} : vector<8x128xf32> to vector<8x32xf32>
    %886 = math.tanh %885 : vector<8x32xf32>
    %887 = vector.extract_strided_slice %847 {offsets = [0, 96], sizes = [8, 32], strides = [1, 1]} : vector<8x128xf32> to vector<8x32xf32>
    %888 = arith.negf %887 : vector<8x32xf32>
    %889 = math.exp %888 : vector<8x32xf32>
    %cst_134 = arith.constant 1.000000e+00 : f32
    %890 = vector.broadcast %cst_134 : f32 to vector<8x32xf32>
    %891 = arith.addf %890, %889 : vector<8x32xf32>
    %892 = arith.divf %890, %891 : vector<8x32xf32>
    %893 = arith.mulf %884, %837 : vector<8x32xf32>
    %894 = arith.mulf %878, %886 : vector<8x32xf32>
    %895 = arith.addf %893, %894 : vector<8x32xf32>
    %896 = math.tanh %895 : vector<8x32xf32>
    %897 = arith.mulf %892, %896 : vector<8x32xf32>
    %898 = tpu.concatenate %872, %897 in 0 : vector<8x32xf32>, vector<8x32xf32> -> vector<16x32xf32>
    %cst_135 = arith.constant dense<0.000000e+00> : vector<16x256xf32>
    %899 = tpu.matmul %898, %484, %cst_135 {dimension_numbers = #tpu.dot_dimension_numbers<[1], [0], [0], [1], [0, 0, 1, 1], [], []>} : vector<16x32xf32>, vector<32x256xf32>, vector<16x256xf32> -> vector<16x256xf32>
    %900 = vector.extract_strided_slice %490 {offsets = [56, 0], sizes = [8, 128], strides = [1, 1]} : vector<64x256xf32> to vector<8x128xf32>
    %901 = vector.extract_strided_slice %899 {offsets = [0, 0], sizes = [8, 128], strides = [1, 1]} : vector<16x256xf32> to vector<8x128xf32>
    %902 = arith.addf %900, %901 : vector<8x128xf32>
    %903 = vector.extract_strided_slice %490 {offsets = [0, 128], sizes = [8, 128], strides = [1, 1]} : vector<64x256xf32> to vector<8x128xf32>
    %904 = vector.extract_strided_slice %899 {offsets = [8, 128], sizes = [8, 128], strides = [1, 1]} : vector<16x256xf32> to vector<8x128xf32>
    %905 = arith.addf %903, %904 : vector<8x128xf32>
    %906 = vector.extract_strided_slice %902 {offsets = [0, 0], sizes = [8, 32], strides = [1, 1]} : vector<8x128xf32> to vector<8x32xf32>
    %907 = arith.negf %906 : vector<8x32xf32>
    %908 = math.exp %907 : vector<8x32xf32>
    %cst_136 = arith.constant 1.000000e+00 : f32
    %909 = vector.broadcast %cst_136 : f32 to vector<8x32xf32>
    %910 = arith.addf %909, %908 : vector<8x32xf32>
    %911 = arith.divf %909, %910 : vector<8x32xf32>
    %912 = vector.extract_strided_slice %902 {offsets = [0, 32], sizes = [8, 32], strides = [1, 1]} : vector<8x128xf32> to vector<8x32xf32>
    %913 = arith.negf %912 : vector<8x32xf32>
    %914 = math.exp %913 : vector<8x32xf32>
    %cst_137 = arith.constant 1.000000e+00 : f32
    %915 = vector.broadcast %cst_137 : f32 to vector<8x32xf32>
    %916 = arith.addf %915, %914 : vector<8x32xf32>
    %917 = arith.divf %915, %916 : vector<8x32xf32>
    %918 = vector.extract_strided_slice %902 {offsets = [0, 64], sizes = [8, 32], strides = [1, 1]} : vector<8x128xf32> to vector<8x32xf32>
    %919 = math.tanh %918 : vector<8x32xf32>
    %920 = vector.extract_strided_slice %902 {offsets = [0, 96], sizes = [8, 32], strides = [1, 1]} : vector<8x128xf32> to vector<8x32xf32>
    %921 = arith.negf %920 : vector<8x32xf32>
    %922 = math.exp %921 : vector<8x32xf32>
    %cst_138 = arith.constant 1.000000e+00 : f32
    %923 = vector.broadcast %cst_138 : f32 to vector<8x32xf32>
    %924 = arith.addf %923, %922 : vector<8x32xf32>
    %925 = arith.divf %923, %924 : vector<8x32xf32>
    %926 = arith.mulf %917, %870 : vector<8x32xf32>
    %927 = arith.mulf %911, %919 : vector<8x32xf32>
    %928 = arith.addf %926, %927 : vector<8x32xf32>
    %929 = math.tanh %928 : vector<8x32xf32>
    %930 = arith.mulf %925, %929 : vector<8x32xf32>
    %931 = vector.extract_strided_slice %905 {offsets = [0, 0], sizes = [8, 32], strides = [1, 1]} : vector<8x128xf32> to vector<8x32xf32>
    %932 = arith.negf %931 : vector<8x32xf32>
    %933 = math.exp %932 : vector<8x32xf32>
    %cst_139 = arith.constant 1.000000e+00 : f32
    %934 = vector.broadcast %cst_139 : f32 to vector<8x32xf32>
    %935 = arith.addf %934, %933 : vector<8x32xf32>
    %936 = arith.divf %934, %935 : vector<8x32xf32>
    %937 = vector.extract_strided_slice %905 {offsets = [0, 32], sizes = [8, 32], strides = [1, 1]} : vector<8x128xf32> to vector<8x32xf32>
    %938 = arith.negf %937 : vector<8x32xf32>
    %939 = math.exp %938 : vector<8x32xf32>
    %cst_140 = arith.constant 1.000000e+00 : f32
    %940 = vector.broadcast %cst_140 : f32 to vector<8x32xf32>
    %941 = arith.addf %940, %939 : vector<8x32xf32>
    %942 = arith.divf %940, %941 : vector<8x32xf32>
    %943 = vector.extract_strided_slice %905 {offsets = [0, 64], sizes = [8, 32], strides = [1, 1]} : vector<8x128xf32> to vector<8x32xf32>
    %944 = math.tanh %943 : vector<8x32xf32>
    %945 = vector.extract_strided_slice %905 {offsets = [0, 96], sizes = [8, 32], strides = [1, 1]} : vector<8x128xf32> to vector<8x32xf32>
    %946 = arith.negf %945 : vector<8x32xf32>
    %947 = math.exp %946 : vector<8x32xf32>
    %cst_141 = arith.constant 1.000000e+00 : f32
    %948 = vector.broadcast %cst_141 : f32 to vector<8x32xf32>
    %949 = arith.addf %948, %947 : vector<8x32xf32>
    %950 = arith.divf %948, %949 : vector<8x32xf32>
    %951 = arith.mulf %942, %895 : vector<8x32xf32>
    %952 = arith.mulf %936, %944 : vector<8x32xf32>
    %953 = arith.addf %951, %952 : vector<8x32xf32>
    %954 = math.tanh %953 : vector<8x32xf32>
    %955 = arith.mulf %950, %954 : vector<8x32xf32>
    %956 = tpu.concatenate %524, %582, %640, %698, %756, %814, %872, %930 in 0 : vector<8x32xf32>, vector<8x32xf32>, vector<8x32xf32>, vector<8x32xf32>, vector<8x32xf32>, vector<8x32xf32>, vector<8x32xf32>, vector<8x32xf32> -> vector<64x32xf32>
    %957 = tpu.concatenate %955, %897, %839, %781, %723, %665, %607, %549 in 0 : vector<8x32xf32>, vector<8x32xf32>, vector<8x32xf32>, vector<8x32xf32>, vector<8x32xf32>, vector<8x32xf32>, vector<8x32xf32>, vector<8x32xf32> -> vector<64x32xf32>
    %cst_142 = arith.constant dense<0.000000e+00> : vector<64x16xf32>
    %958 = tpu.matmul %956, %485, %cst_142 {dimension_numbers = #tpu.dot_dimension_numbers<[1], [0], [0], [1], [0, 0, 1, 1], [], []>} : vector<64x32xf32>, vector<32x16xf32>, vector<64x16xf32> -> vector<64x16xf32>
    %cst_143 = arith.constant dense<0.000000e+00> : vector<64x16xf32>
    %959 = tpu.matmul %957, %486, %cst_143 {dimension_numbers = #tpu.dot_dimension_numbers<[1], [0], [0], [1], [0, 0, 1, 1], [], []>} : vector<64x32xf32>, vector<32x16xf32>, vector<64x16xf32> -> vector<64x16xf32>
    %960 = arith.addf %958, %959 : vector<64x16xf32>
    %961 = vector.broadcast %487 : vector<1x16xf32> to vector<64x16xf32>
    %962 = arith.addf %960, %961 : vector<64x16xf32>
    %c0_144 = arith.constant 0 : index
    %c0_145 = arith.constant 0 : index
    %963 = vector.load %arg13[%c0_144, %c0_145] : memref<64x16xf32, #tpu.memory_space<vmem>>, vector<64x16xf32>
    tpu.vector_store %arg13[%c0_144, %c0_145], %962 {strides = array<i32>} : memref<64x16xf32, #tpu.memory_space<vmem>>, vector<64x16xf32>,
    return
  }
}

</mosaic_0001>

<bundles_post_ra>
// kernel: tpu_custom_call.1
= control target key start
LH: loop header
LB: loop body
LE: loop exit
PB: predicated region body
PF: predicated region fallthrough
CT: control target
= control target key end

     0   :  { %18 = vsyncpa [#allocation3], 0  ;;  %s4878_s0 = inlined_call_operand.vmem [shape: f32[64,64], index: 0, kind: input, shape index: {}]   ;;  %s4879_s1 = inlined_call_operand.hbm [shape: f32[64,256], index: 1, kind: input, shape index: {}]   ;;  %s4880_s2 = inlined_call_operand.vmem [shape: f32[1,256], index: 2, kind: input, shape index: {}]   ;;  %s4881_s3 = inlined_call_operand.hbm [shape: f32[32,256], index: 3, kind: input, shape index: {}]   ;;  %s4882_s4 = inlined_call_operand.hbm [shape: f32[32,32], index: 4, kind: input, shape index: {}]   ;;  %s4883_s5 = inlined_call_operand.hbm [shape: f32[32,32], index: 5, kind: input, shape index: {}]   ;;  %s4884_s6 = inlined_call_operand.hbm [shape: f32[1,32], index: 6, kind: input, shape index: {}]   ;;  %s4885_s7 = inlined_call_operand.hbm [shape: f32[32,256], index: 7, kind: input, shape index: {}]   ;;  %s4886_s8 = inlined_call_operand.hbm [shape: f32[1,256], index: 8, kind: input, shape index: {}]   ;;  %s4887_s9 = inlined_call_operand.vmem [shape: f32[32,256], index: 9, kind: input, shape index: {}]   ;;  %s4888_s10 = inlined_call_operand.vmem [shape: f32[32,16], index: 10, kind: input, shape index: {}]   ;;  %s4889_s11 = inlined_call_operand.vmem [shape: f32[32,16], index: 11, kind: input, shape index: {}]   ;;  %s4890_s12 = inlined_call_operand.vmem [shape: f32[1,16], index: 12, kind: input, shape index: {}]   ;;  %s4891_s13 = inlined_call_operand.vmem [shape: f32[64,16], index: 13, kind: output, shape index: {}]  }
   0x1   :  { %19 = vsyncpa [#allocation5], 0 }
   0x2   :  { %20 = vsyncpa [#allocation8], 0 }
   0x3   :  { %21 = vsyncpa [#allocation11], 0  ;;  %s4003_s25 = smov [#allocation4]   ;;  %s3841_s29 = scalar_lea.hbm %s4881_s3, 1024 }
   0x4   :  { %s43_s26 = sshll.u32 %s4003_s25, 4  ;;  %p3842_p0 = scmp.ne.s32.totalorder %s4881_s3, %s3841_s29  ;;  %s44_s26 = int_to_ptr.vmem [resolvable:$true] %s43_s26 }
   0x5   :  { %p3845_p1 = scmp.lt.u32.totalorder %s3841_s29, %s4881_s3 }
   0x7   :  { %p3847_p2 = pnand %p3845_p1, %p3842_p0 }
   0x9   :  { %3850 = shalt.err (!%p3847_p2)
}
   0xa   :  { %s3851_s17 = scalar_lea.vmem %s44_s26, 1024  ;;  %p3856_p4 = scmp.lt.s32.totalorder %s44_s26, %s44_s26 }
   0xb   :  { %p3852_p3 = scmp.ne.s32.totalorder %s44_s26, %s3851_s17  ;;  %p3857_p5 = scmp.lt.s32.totalorder %s3851_s17, %s3851_s17 }
   0xd   :  { %p3858_p6 = por %p3857_p5, %p3856_p4 }
   0xf   :  { %p3859_p7 = pnand %p3858_p6, %p3852_p3 }
  0x11   :  { %3862 = shalt.err (!%p3859_p7)
}
  0x12   :  { %s4004_s18 = smov 256   ;;  %s4005_s19 = smov 16  }
  0x13   :  { %49 = dma.hbm_to_vmem [thread:$0]  %s4881_s3, 1024, %s44_s26, [#allocation5], %s4004_s18, %s4004_s18, %s4005_s19  }
  0x14   :  { %s4006_s22 = smov [#allocation7]   ;;  %s4007_s24 = smov [#allocation10]  }
  0x15   :  { %s67_s23 = sshll.u32 %s4006_s22, 4  ;;  %s89_s25 = sshll.u32 %s4007_s24, 4  ;;  %s68_s23 = int_to_ptr.vmem [resolvable:$true] %s67_s23  ;;  %s90_s25 = int_to_ptr.vmem [resolvable:$true] %s89_s25 }
  0x16   :  { %s3863_s29 = scalar_lea.hbm %s4883_s5, 512 }
  0x17   :  { %p3864_p8 = scmp.ne.s32.totalorder %s4883_s5, %s3863_s29  ;;  %p3867_p9 = scmp.lt.u32.totalorder %s3863_s29, %s4883_s5 }
  0x19   :  { %p3869_p10 = pnand %p3867_p9, %p3864_p8 }
  0x1b   :  { %3872 = shalt.err (!%p3869_p10)
}
  0x1c   :  { %s3873_s3 = scalar_lea.vmem %s68_s23, 512  ;;  %p3878_p12 = scmp.lt.s32.totalorder %s68_s23, %s68_s23 }
  0x1d   :  { %p3874_p11 = scmp.ne.s32.totalorder %s68_s23, %s3873_s3  ;;  %p3879_p13 = scmp.lt.s32.totalorder %s3873_s3, %s3873_s3 }
  0x1f   :  { %p3880_p0 = por %p3879_p13, %p3878_p12 }
  0x21   :  { %p3881_p1 = pnand %p3880_p0, %p3874_p11 }
  0x23   :  { %3884 = shalt.err (!%p3881_p1)
}
  0x24   :  { %s4008_s26 = smov 128   ;;  %s4009_s17 = smov 8  }
  0x25   :  { %73 = dma.hbm_to_vmem [thread:$0]  %s4883_s5, 512, %s68_s23, [#allocation8], %s4008_s26, %s4008_s26, %s4009_s17  }
  0x26   :  { %s3885_s27 = scalar_lea.hbm %s4885_s7, 1024 }
  0x27   :  { %p3886_p2 = scmp.ne.s32.totalorder %s4885_s7, %s3885_s27  ;;  %p3889_p3 = scmp.lt.u32.totalorder %s3885_s27, %s4885_s7 }
  0x29   :  { %p3891_p4 = pnand %p3889_p3, %p3886_p2 }
  0x2b   :  { %3894 = shalt.err (!%p3891_p4)
}
  0x2c   :  { %s3895_s15 = scalar_lea.vmem %s90_s25, 1024  ;;  %p3900_p6 = scmp.lt.s32.totalorder %s90_s25, %s90_s25 }
  0x2d   :  { %p3896_p5 = scmp.ne.s32.totalorder %s90_s25, %s3895_s15  ;;  %p3901_p7 = scmp.lt.s32.totalorder %s3895_s15, %s3895_s15 }
  0x2f   :  { %p3902_p8 = por %p3901_p7, %p3900_p6 }
  0x31   :  { %p3903_p9 = pnand %p3902_p8, %p3896_p5 }
  0x33   :  { %3906 = shalt.err (!%p3903_p9)
}
  0x34   :  { %95 = dma.hbm_to_vmem [thread:$0]  %s4885_s7, 1024, %s90_s25, [#allocation11], %s4004_s18, %s4004_s18, %s4005_s19  }
  0x35   :  { %s4010_s16 = smov [#allocation2]   ;;  %s4011_s20 = smov [#allocation6]  }
  0x36   :  { %s29_s3 = sshll.u32 %s4010_s16, 4  ;;  %s55_s21 = sshll.u32 %s4011_s20, 4  ;;  %s30_s3 = int_to_ptr.vmem [resolvable:$true] %s29_s3  ;;  %s56_s21 = int_to_ptr.vmem [resolvable:$true] %s55_s21 }
  0x37   :  { %s3907_s27 = scalar_lea.hbm %s4879_s1, 2048 }
  0x38   :  { %p3908_p10 = scmp.ne.s32.totalorder %s4879_s1, %s3907_s27  ;;  %p3911_p11 = scmp.lt.u32.totalorder %s3907_s27, %s4879_s1 }
  0x3a   :  { %p3913_p12 = pnand %p3911_p11, %p3908_p10 }
  0x3c   :  { %3916 = shalt.err (!%p3913_p12)
}
  0x3d   :  { %s3917_s7 = scalar_lea.vmem %s30_s3, 2048  ;;  %p3922_p0 = scmp.lt.s32.totalorder %s30_s3, %s30_s3 }
  0x3e   :  { %p3918_p13 = scmp.ne.s32.totalorder %s30_s3, %s3917_s7  ;;  %p3923_p1 = scmp.lt.s32.totalorder %s3917_s7, %s3917_s7 }
  0x40   :  { %p3924_p2 = por %p3923_p1, %p3922_p0 }
  0x42   :  { %p3925_p3 = pnand %p3924_p2, %p3918_p13 }
  0x44   :  { %3928 = shalt.err (!%p3925_p3)
}
  0x45   :  { %35 = dma.hbm_to_vmem [thread:$0]  %s4879_s1, 2048, %s30_s3, [#allocation3], %s4004_s18, %s4004_s18, %s4005_s19  }
  0x46   :  { %s3929_s16 = scalar_lea.hbm %s4882_s4, 512 }
  0x47   :  { %p3930_p4 = scmp.ne.s32.totalorder %s4882_s4, %s3929_s16  ;;  %p3933_p5 = scmp.lt.u32.totalorder %s3929_s16, %s4882_s4 }
  0x49   :  { %p3935_p6 = pnand %p3933_p5, %p3930_p4 }
  0x4b   :  { %3938 = shalt.err (!%p3935_p6)
}
  0x4c   :  { %s3939_s28 = scalar_lea.vmem %s56_s21, 512  ;;  %p3944_p8 = scmp.lt.s32.totalorder %s56_s21, %s56_s21 }
  0x4d   :  { %p3940_p7 = scmp.ne.s32.totalorder %s56_s21, %s3939_s28  ;;  %p3945_p9 = scmp.lt.s32.totalorder %s3939_s28, %s3939_s28 }
  0x4f   :  { %p3946_p10 = por %p3945_p9, %p3944_p8 }
  0x51   :  { %p3947_p11 = pnand %p3946_p10, %p3940_p7 }
  0x53   :  { %3950 = shalt.err (!%p3947_p11)
}
  0x54   :  { %61 = dma.hbm_to_vmem [thread:$0]  %s4882_s4, 512, %s56_s21, [#allocation5], %s4008_s26, %s4008_s26, %s4009_s17  }
  0x55   :  { %s4012_s19 = smov [#allocation9]   ;;  %s4013_s29 = smov [#allocation12]  }
  0x56   :  { %s80_s3 = sshll.u32 %s4012_s19, 4  ;;  %s102_s30 = sshll.u32 %s4013_s29, 4  ;;  %s81_s3 = int_to_ptr.vmem [resolvable:$true] %s80_s3  ;;  %s103_s30 = int_to_ptr.vmem [resolvable:$true] %s102_s30 }
  0x57   :  { %s3951_s25 = scalar_lea.hbm %s4884_s6, 16 }
  0x58   :  { %p3952_p12 = scmp.ne.s32.totalorder %s4884_s6, %s3951_s25  ;;  %p3955_p13 = scmp.lt.u32.totalorder %s3951_s25, %s4884_s6 }
  0x5a   :  { %p3957_p0 = pnand %p3955_p13, %p3952_p12 }
  0x5c   :  { %3960 = shalt.err (!%p3957_p0)
}
  0x5d   :  { %s3961_s4 = scalar_lea.vmem %s81_s3, 16  ;;  %s3965_s26 = scalar_lea.vmem %s81_s3, 32 }
  0x5e   :  { %p3962_p1 = scmp.ne.s32.totalorder %s81_s3, %s3961_s4  ;;  %p3966_p2 = scmp.lt.s32.totalorder %s81_s3, %s81_s3 }
  0x5f   :  { %p3967_p3 = scmp.lt.s32.totalorder %s3965_s26, %s3961_s4 }
  0x61   :  { %p3968_p4 = por %p3967_p3, %p3966_p2 }
  0x63   :  { %p3969_p5 = pnand %p3968_p4, %p3962_p1 }
  0x65   :  { %3972 = shalt.err (!%p3969_p5)
}
  0x66   :  { %83 = dma.hbm_to_vmem [thread:$0]  %s4884_s6, 16, %s81_s3, [#allocation8]  }
  0x67   :  { %s3973_s24 = scalar_lea.hbm %s4886_s8, 32 }
  0x68   :  { %p3974_p6 = scmp.ne.s32.totalorder %s4886_s8, %s3973_s24  ;;  %p3977_p7 = scmp.lt.u32.totalorder %s3973_s24, %s4886_s8 }
  0x6a   :  { %p3979_p8 = pnand %p3977_p7, %p3974_p6 }
  0x6c   :  { %3982 = shalt.err (!%p3979_p8)
}
  0x6d   :  { %s3983_s19 = scalar_lea.vmem %s103_s30, 32  ;;  %p3988_p10 = scmp.lt.s32.totalorder %s103_s30, %s103_s30 }
  0x6e   :  { %p3984_p9 = scmp.ne.s32.totalorder %s103_s30, %s3983_s19  ;;  %p3989_p11 = scmp.lt.s32.totalorder %s3983_s19, %s3983_s19 }
  0x70   :  { %p3990_p12 = por %p3989_p11, %p3988_p10 }
  0x72   :  { %p3991_p13 = pnand %p3990_p12, %p3984_p9 }
  0x74   :  { %3994 = shalt.err (!%p3991_p13)
}
  0x75   :  { %105 = dma.hbm_to_vmem [thread:$0]  %s4886_s8, 32, %s103_s30, [#allocation11]  }
  0x76   :  { %3995 = dma.done.wait [#allocation3], 2048  }
  0x77   :  { %3996 = vsyncadd [#allocation3], 4294965248 }
  0x78   :  { %3997 = dma.done.wait [#allocation5], 1536  }
  0x79   :  { %3998 = vsyncadd [#allocation5], 4294965760 }
  0x7a   :  { %3999 = dma.done.wait [#allocation8], 528  }
  0x7b   :  { %4000 = vsyncadd [#allocation8], 4294966768 }
  0x7c   :  { %4001 = dma.done.wait [#allocation11], 1056  }
  0x7d   :  { %4002 = vsyncadd [#allocation11], 4294966240  ;;  %v4014_v0 = vmov 0.0   ;;  %v144_v1 = vld [vmem:[#allocation2 + $0x8] sm:$0xff]  ;;  %v146_v2 = vld [vmem:[#allocation2 + $0x18] sm:$0xff]  ;;  %vm188_vm0 = vcmask 523264   ;;  %v178_v45 = vlaneseq }
  0x7e   :  { %277 = vmatprep.mubr.f32.mxu0 %v4014_v0  ;;  %394 = vmatprep.mubr.f32.mxu1 %v4014_v0  ;;  %v143_v3 = vld [vmem:[#allocation2] sm:$0xff]  ;;  %v3367_v4 = vpack.c.bf16 %v146_v2, %v144_v1  ;;  %v145_v5 = vld [vmem:[#allocation2 + $0x10] sm:$0xff]  ;;  %v148_v6 = vld [vmem:[#allocation2 + $0x28] sm:$0xff]  ;;  %vm326_vm1 = vcmask 261120   ;;  %vm3112_vm2 = vcmask 130048  }
  0x7f   :  { %v150_v7 = vld [vmem:[#allocation2 + $0x38] sm:$0xff]  ;;  %v3369_v8 = vpack.c.bf16 %v145_v5, %v143_v3  ;;  %v147_v10 = vld [vmem:[#allocation2 + $0x20] sm:$0xff]  ;;  %v149_v11 = vld [vmem:[#allocation2 + $0x30] sm:$0xff]  ;;  %v4254_v46 = vshrl.u32 %v178_v45, 7 }
  0x80   :  { %v3371_v9 = vpack.c.bf16 %v150_v7, %v148_v6  ;;  %v152_v12 = vld [vmem:[#allocation2 + $0x48] sm:$0xff]  ;;  %3368 = vmatprep.subr.bf16.mxu0 %v3367_v4  ;;  %v154_v13 = vld [vmem:[#allocation2 + $0x58] sm:$0xff]  ;;  %v3373_v14 = vpack.c.bf16 %v149_v11, %v147_v10  ;;  %v160_v17 = vld [vmem:[#allocation4] sm:$0xff] }
  0x81   :  { %3370 = vmatpush1.bf16.msra.mxu0 %v3369_v8  ;;  %v161_v15 = vld [vmem:[#allocation4 + $0x8] sm:$0xff]  ;;  %v163_v16 = vld [vmem:[#allocation4 + $0x18] sm:$0xff]  ;;  %v3375_v18 = vpack.c.bf16 %v154_v13, %v152_v12  ;;  %v151_v19 = vld [vmem:[#allocation2 + $0x40] sm:$0xff]  ;;  %v180_v47 = vsub.s32 0, %v4254_v46  ;;  %v184_v49 = vsub.s32 1, %v4254_v46 }
  0x82   :  { %3372 = vmatprep.subr.bf16.mxu0 %v3371_v9  ;;  %v153_v20 = vld [vmem:[#allocation2 + $0x50] sm:$0xff]  ;;  %v4188_v21 = vpack.c.bf16 %v163_v16, %v161_v15  ;;  %v156_v24 = vld [vmem:[#allocation2 + $0x68] sm:$0xff]  ;;  %v158_v25 = vld [vmem:[#allocation2 + $0x78] sm:$0xff] }
  0x83   :  { %v162_v22 = vld [vmem:[#allocation4 + $0x10] sm:$0xff]  ;;  %v165_v26 = vld [vmem:[#allocation4 + $0x28] sm:$0xff]  ;;  %v167_v27 = vld [vmem:[#allocation4 + $0x38] sm:$0xff]  ;;  %v3377_v30 = vpack.c.bf16 %v153_v20, %v151_v19  ;;  %v3379_v33 = vpack.c.bf16 %v158_v25, %v156_v24 }
  0x84   :  { %v4190_v23 = vpack.c.bf16 %v162_v22, %v160_v17  ;;  %3384 = vmatprep.subr.bf16.mxu1 %v4188_v21  ;;  %v164_v28 = vld [vmem:[#allocation4 + $0x20] sm:$0xff]  ;;  %v166_v29 = vld [vmem:[#allocation4 + $0x30] sm:$0xff]  ;;  %v4194_v31 = vpack.c.bf16 %v167_v27, %v165_v26  ;;  %v136_v38 = vld [vmem:[%s4878_s0 + $0x8] sm:$0xff] }
  0x85   :  { %3374 = vmatpush1.bf16.msra.mxu0 %v3373_v14  ;;  %v4196_v32 = vpack.c.bf16 %v166_v29, %v164_v28  ;;  %v155_v34 = vld [vmem:[#allocation2 + $0x60] sm:$0xff]  ;;  %v157_v35 = vld [vmem:[#allocation2 + $0x70] sm:$0xff]  ;;  %v138_v40 = vld [vmem:[%s4878_s0 + $0x18] sm:$0xff] }
  0x86   :  { %3386 = vmatpush1.bf16.msra.mxu1 %v4190_v23  ;;  %3376 = vmatprep.subr.bf16.mxu0 %v3375_v18  ;;  %v3381_v36 = vpack.c.bf16 %v157_v35, %v155_v34  ;;  %v135_v37 = vld [vmem:[%s4878_s0] sm:$0xff]  ;;  %v137_v39 = vld [vmem:[%s4878_s0 + $0x10] sm:$0xff]  ;;  %v140_v42 = vld [vmem:[%s4878_s0 + $0x28] sm:$0xff] }
  0x87   :  { %3388 = vmatprep.subr.bf16.mxu1 %v4194_v31  ;;  %v139_v41 = vld [vmem:[%s4878_s0 + $0x20] sm:$0xff]  ;;  %v141_v43 = vld [vmem:[%s4878_s0 + $0x30] sm:$0xff]  ;;  %v142_v44 = vld [vmem:[%s4878_s0 + $0x38] sm:$0xff]  ;;  %s4015_s0 = smov 64  }
  0x88   :  { %v159_v48 = vld [vmem:[%s4880_s2] sm:$0x3]  ;;  %s4016_s2 = smov 32  }
  0x89   :  { %3378 = vmatpush1.bf16.msra.mxu0 %v3377_v30  ;;  %v181_v51 = vrot.slane %v159_v48, %v180_v47  ;;  %v185_v53 = vrot.slane %v159_v48, %v184_v49 }
  0x8a   :  { %3390 = vmatpush1.bf16.msra.mxu1 %v4196_v32  ;;  %3380 = vmatprep.subr.bf16.mxu0 %v3379_v33 }
  0x8b   :  { %3392 = vmatprep.subr.bf16.mxu1 %v4188_v21 }
  0x8d   :  { %395 = vmatmul.mubr.f32.vlgmr.msra.gmra.mrb[0].mxu1 %v4014_v0  ;;  %3382 = vmatpush1.bf16.msra.mxu0 %v3381_v36 }
  0x8e   :  { %399 = vmatprep.mubr.f32.mxu1 %v4014_v0  ;;  %3394 = vmatpush1.bf16.msra.mxu1 %v4190_v23 }
  0x8f   :  { %3424 = vmatprep.subr.bf16.mxu0 %v4188_v21  ;;  %3396 = vmatprep.subr.bf16.mxu1 %v4194_v31 }
  0x90   :  { %3129 = vmatmul.mubr.msk.f32.vlgmr.msra.gmra.mrb[0].mxu0 %vm188_vm0, %v135_v37 }
  0x91   :  { %400 = vmatmul.mubr.f32.gmra.mrb[2].mxu1 %v4014_v0  ;;  %283 = vmatprep.mubr.f32.mxu0 %v4014_v0 }
  0x92   :  { %529 = vmatprep.mubr.f32.mxu1 %v4014_v0  ;;  %3398 = vmatpush1.bf16.msra.mxu1 %v4196_v32 }
  0x93   :  { %3426 = vmatpush1.bf16.msra.mxu0 %v4190_v23  ;;  %3400 = vmatprep.subr.bf16.mxu1 %v4188_v21 }
  0x94   :  { %3428 = vmatprep.subr.bf16.mxu0 %v4194_v31  ;;  %3130 = vmatmul.mubr.msk.f32.gmra.mrb[2].mxu0 %vm188_vm0, %v136_v38 }
  0x95   :  { %289 = vmatprep.mubr.f32.mxu0 %v4014_v0 }
  0x97   :  { %3430 = vmatpush1.bf16.msra.mxu0 %v4196_v32 }
  0x98   :  { %3440 = vmatprep.subr.bf16.mxu0 %v4188_v21  ;;  %3131 = vmatmul.mubr.msk.f32.gmra.mrb[4].mxu0 %vm188_vm0, %v137_v39 }
  0x99   :  { %295 = vmatprep.mubr.f32.mxu0 %v4014_v0 }
  0x9c   :  { %3132 = vmatmul.mubr.msk.f32.gmra.mrb[6].mxu0 %vm188_vm0, %v138_v40 }
  0x9d   :  { %301 = vmatprep.mubr.f32.mxu0 %v4014_v0 }
  0xa0   :  { %3133 = vmatmul.mubr.msk.f32.gmra.mrb[8].mxu0 %vm188_vm0, %v139_v41 }
  0xa1   :  { %307 = vmatprep.mubr.f32.mxu0 %v4014_v0 }
  0xa4   :  { %3134 = vmatmul.mubr.msk.f32.gmra.mrb[10].mxu0 %vm188_vm0, %v140_v42 }
  0xa5   :  { %313 = vmatprep.mubr.f32.mxu0 %v4014_v0 }
  0xa8   :  { %3135 = vmatmul.mubr.msk.f32.gmra.mrb[12].mxu0 %vm188_vm0, %v141_v43 }
  0xa9   :  { %319 = vmatprep.mubr.f32.mxu0 %v4014_v0 }
  0xac   :  { %3136 = vmatmul.mubr.msk.f32.gmra.mrb[14].mxu0 %vm188_vm0, %v142_v44 }
  0xad   :  { %1069 = vmatprep.mubr.f32.mxu0 %v4014_v0 }
 0x160   :  { %v396_v50 = vpop.f32.mrb[0].mxu1 }
 0x161   :  { %v398_v52 = vpop.f32.mrb[1].mxu1 }
 0x163   :  { %v279_v54 = vpop.f32.mrb[0].mxu0 }
 0x164   :  { %v401_v55 = vpop.f32.mrb[2].mxu1  ;;  %v280_v56 = vadd.f32 %v279_v54, %v181_v51  ;;  %v281_v57 = vpop.f32.mrb[1].mxu0 }
 0x165   :  { %v402_v58 = vpop.f32.mrb[3].mxu1  ;;  %v4265_v59 = vadd.f32 %v281_v57, %v185_v53 }
 0x166   :  { %v405_v60 = vadd.f32 %v396_v50, %v280_v56 }
 0x167   :  { %v285_v61 = vpop.f32.mrb[2].mxu0 }
 0x168   :  { %3585 = vtanh.f32 %v405_v60  ;;  %v4267_v62 = vadd.f32 %v285_v61, %v181_v51  ;;  %v287_v63 = vpop.f32.mrb[3].mxu0  ;;  %v3137_v33 = vmul.f32 -1.442695, %v405_v60 }
 0x169   :  { %v4269_v1 = vadd.f32 %v287_v63, %v185_v53 }
 0x16b   :  { %v291_v2 = vpop.f32.mrb[4].mxu0 }
 0x16c   :  { %v4271_v3 = vadd.f32 %v291_v2, %v181_v51  ;;  %v293_v4 = vpop.f32.mrb[5].mxu0 }
 0x16d   :  { %v4273_v5 = vadd.f32 %v293_v4, %v185_v53 }
 0x16f   :  { %v297_v6 = vpop.f32.mrb[6].mxu0 }
 0x170   :  { %v4275_v7 = vadd.f32 %v297_v6, %v181_v51  ;;  %v299_v8 = vpop.f32.mrb[7].mxu0 }
 0x171   :  { %v4277_v9 = vadd.f32 %v299_v8, %v185_v53 }
 0x172   :  { %v3586_v10 = vpop.eup %3585 }
 0x173   :  { %v303_v11 = vpop.f32.mrb[8].mxu0  ;;  %416 = vrot.lane.b32.xlu0 %v3586_v10, %s4015_s0 }
 0x174   :  { %v4280_v12 = vadd.f32 %v303_v11, %v181_v51  ;;  %v305_v13 = vpop.f32.mrb[9].mxu0 }
 0x175   :  { %v4282_v14 = vadd.f32 %v305_v13, %v185_v53 }
 0x177   :  { %v309_v15 = vpop.f32.mrb[10].mxu0 }
 0x178   :  { %v4284_v16 = vadd.f32 %v309_v15, %v181_v51  ;;  %v311_v17 = vpop.f32.mrb[11].mxu0 }
 0x179   :  { %v4286_v18 = vadd.f32 %v311_v17, %v185_v53 }
 0x17b   :  { %v315_v19 = vpop.f32.mrb[12].mxu0 }
 0x17c   :  { %v4288_v20 = vadd.f32 %v315_v19, %v181_v51  ;;  %v317_v22 = vpop.f32.mrb[13].mxu0 }
 0x17d   :  { %v4290_v24 = vadd.f32 %v317_v22, %v185_v53 }
 0x17f   :  { %v321_v25 = vpop.f32.mrb[14].mxu0 }
 0x180   :  { %v4292_v26 = vadd.f32 %v321_v25, %v181_v51  ;;  %v323_v27 = vpop.f32.mrb[15].mxu0 }
 0x181   :  { %v324_v28 = vadd.f32 %v323_v27, %v185_v53 }
 0x183   :  { %v406_v29 = vadd.f32 %v402_v58, %v324_v28 }
 0x185   :  { %3587 = vtanh.f32 %v406_v29  ;;  %v3138_v36 = vmul.f32 -1.442695, %v406_v29 }
 0x186   :  { %3589 = vpow2.f32 %v3137_v33 }
 0x18f   :  { %v3588_v30 = vpop.eup %3587 }
 0x190   :  { %440 = vrot.lane.b32.xlu0 %v3588_v30, %s4015_s0  ;;  %v3590_v34 = vpop.eup %3589 }
 0x191   :  { %v410_v35 = vadd.f32 1.0, %v3590_v34 }
 0x193   :  { %3591 = vrcp.f32 %v410_v35 }
 0x194   :  { %3593 = vpow2.f32 %v3138_v36 }
 0x19d   :  { %v3592_v37 = vpop.eup %3591 }
 0x19e   :  { %v3594_v40 = vpop.eup %3593  ;;  %v414_v45 = vmul.f32 0.0, %v3592_v37 }
 0x19f   :  { %v434_v41 = vadd.f32 1.0, %v3594_v40 }
 0x1a1   :  { %3595 = vrcp.f32 %v434_v41 }
 0x1ab   :  { %v3596_v42 = vpop.eup %3595 }
 0x1ac   :  { %v438_v52 = vmul.f32 0.0, %v3596_v42 }
 0x1e5   :  { %v417_v38 = vpop.permute.xlu0 %416 }
 0x1e6   :  { %v419_v39 = vmul.f32 %v3592_v37, %v417_v38 }
 0x1e8   :  { %421 = vrot.lane.b32.xlu1 %v419_v39, %s4016_s2 }
 0x202   :  { %v441_v43 = vpop.permute.xlu0 %440 }
 0x203   :  { %v443_v44 = vmul.f32 %v3596_v42, %v441_v43 }
 0x205   :  { %445 = vrot.lane.b32.xlu1 %v443_v44, %s4016_s2 }
 0x25a   :  { %v422_v48 = vpop.permute.xlu1 %421 }
 0x25b   :  { %v424_v50 = vadd.f32 %v422_v48, %v414_v45 }
 0x25d   :  { %3597 = vtanh.f32 %v424_v50 }
 0x267   :  { %v3598_v51 = vpop.eup %3597 }
 0x268   :  { %427 = vrot.lane.b32.xlu0 %v3598_v51, %s4015_s0 }
 0x277   :  { %v446_v53 = vpop.permute.xlu1 %445 }
 0x278   :  { %v448_v54 = vadd.f32 %v446_v53, %v438_v52 }
 0x27a   :  { %3599 = vtanh.f32 %v448_v54 }
 0x284   :  { %v3600_v55 = vpop.eup %3599 }
 0x285   :  { %451 = vrot.lane.b32.xlu1 %v3600_v55, %s4015_s0 }
 0x2da   :  { %v428_v56 = vpop.permute.xlu0 %427 }
 0x2db   :  { %v430_v57 = vmul.f32 %v3592_v37, %v428_v56 }
 0x2dd   :  { %457 = vrot.lane.b32.xlu0 %v430_v57, %s4016_s2 }
 0x2f7   :  { %v452_v58 = vpop.permute.xlu1 %451 }
 0x2f8   :  { %v454_v60 = vmul.f32 %v3596_v42, %v452_v58 }
 0x2fa   :  { %459 = vrot.lane.b32.xlu1 %v454_v60, %s4016_s2 }
 0x34f   :  { %v4301_v61 = vpop.permute.xlu0 %457 }
 0x350   :  { %3139 = vmatmul.mubr.msk.f32.vlgmr.msra.gmra.mrb[4].mxu1 %vm326_vm1, %v4301_v61 }
 0x351   :  { %534 = vmatprep.mubr.f32.mxu1 %v4014_v0  ;;  %3402 = vmatpush1.bf16.msra.mxu1 %v4190_v23 }
 0x352   :  { %3404 = vmatprep.subr.bf16.mxu1 %v4194_v31 }
 0x355   :  { %3406 = vmatpush1.bf16.msra.mxu1 %v4196_v32 }
 0x356   :  { %3408 = vmatprep.subr.bf16.mxu1 %v4188_v21 }
 0x36c   :  { %v4310_v63 = vpop.permute.xlu1 %459 }
 0x36d   :  { %3140 = vmatmul.mubr.msk.f32.gmra.mrb[6].mxu1 %vm326_vm1, %v4310_v63 }
 0x36e   :  { %664 = vmatprep.mubr.f32.mxu1 %v4014_v0 }
 0x423   :  { %v531_v2 = vpop.f32.mrb[4].mxu1 }
 0x424   :  { %v540_v4 = vadd.f32 %v531_v2, %v4267_v62  ;;  %v533_v6 = vpop.f32.mrb[5].mxu1 }
 0x426   :  { %3601 = vtanh.f32 %v540_v4  ;;  %v3141_v17 = vmul.f32 -1.442695, %v540_v4 }
 0x430   :  { %v3602_v8 = vpop.eup %3601 }
 0x431   :  { %551 = vrot.lane.b32.xlu0 %v3602_v8, %s4015_s0 }
 0x440   :  { %v536_v10 = vpop.f32.mrb[6].mxu1 }
 0x441   :  { %v537_v11 = vpop.f32.mrb[7].mxu1 }
 0x442   :  { %v541_v13 = vadd.f32 %v537_v11, %v4290_v24 }
 0x444   :  { %3603 = vtanh.f32 %v541_v13  ;;  %v3142_v25 = vmul.f32 -1.442695, %v541_v13 }
 0x445   :  { %3605 = vpow2.f32 %v3141_v17 }
 0x44e   :  { %v3604_v15 = vpop.eup %3603 }
 0x44f   :  { %575 = vrot.lane.b32.xlu1 %v3604_v15, %s4015_s0  ;;  %v3606_v19 = vpop.eup %3605 }
 0x450   :  { %v545_v22 = vadd.f32 1.0, %v3606_v19 }
 0x452   :  { %3607 = vrcp.f32 %v545_v22 }
 0x453   :  { %3609 = vpow2.f32 %v3142_v25 }
 0x45c   :  { %v3608_v62 = vpop.eup %3607 }
 0x45d   :  { %v3610_v29 = vpop.eup %3609  ;;  %v549_v35 = vmul.f32 %v3608_v62, %v424_v50 }
 0x45e   :  { %v569_v30 = vadd.f32 1.0, %v3610_v29 }
 0x460   :  { %3611 = vrcp.f32 %v569_v30 }
 0x46a   :  { %v3612_v24 = vpop.eup %3611 }
 0x46b   :  { %v573_v39 = vmul.f32 %v3612_v24, %v448_v54 }
 0x4a3   :  { %v552_v27 = vpop.permute.xlu0 %551 }
 0x4a4   :  { %v554_v28 = vmul.f32 %v3608_v62, %v552_v27 }
 0x4a6   :  { %556 = vrot.lane.b32.xlu0 %v554_v28, %s4016_s2 }
 0x4c1   :  { %v576_v33 = vpop.permute.xlu1 %575 }
 0x4c2   :  { %v578_v34 = vmul.f32 %v3612_v24, %v576_v33 }
 0x4c4   :  { %580 = vrot.lane.b32.xlu1 %v578_v34, %s4016_s2 }
 0x518   :  { %v557_v36 = vpop.permute.xlu0 %556 }
 0x519   :  { %v559_v37 = vadd.f32 %v557_v36, %v549_v35 }
 0x51b   :  { %3613 = vtanh.f32 %v559_v37 }
 0x525   :  { %v3614_v38 = vpop.eup %3613 }
 0x526   :  { %562 = vrot.lane.b32.xlu0 %v3614_v38, %s4015_s0 }
 0x536   :  { %v581_v40 = vpop.permute.xlu1 %580 }
 0x537   :  { %v583_v41 = vadd.f32 %v581_v40, %v573_v39 }
 0x539   :  { %3615 = vtanh.f32 %v583_v41 }
 0x543   :  { %v3616_v42 = vpop.eup %3615 }
 0x544   :  { %586 = vrot.lane.b32.xlu1 %v3616_v42, %s4015_s0 }
 0x598   :  { %v563_v43 = vpop.permute.xlu0 %562 }
 0x599   :  { %v565_v44 = vmul.f32 %v3608_v62, %v563_v43 }
 0x59b   :  { %592 = vrot.lane.b32.xlu0 %v565_v44, %s4016_s2 }
 0x5b6   :  { %v587_v45 = vpop.permute.xlu1 %586 }
 0x5b7   :  { %v589_v48 = vmul.f32 %v3612_v24, %v587_v45 }
 0x5b9   :  { %594 = vrot.lane.b32.xlu1 %v589_v48, %s4016_s2 }
 0x60d   :  { %v4325_v50 = vpop.permute.xlu0 %592 }
 0x60e   :  { %3143 = vmatmul.mubr.msk.f32.vlgmr.msra.gmra.mrb[8].mxu1 %vm326_vm1, %v4325_v50 }
 0x60f   :  { %669 = vmatprep.mubr.f32.mxu1 %v4014_v0  ;;  %3410 = vmatpush1.bf16.msra.mxu1 %v4190_v23 }
 0x610   :  { %3412 = vmatprep.subr.bf16.mxu1 %v4194_v31 }
 0x613   :  { %3414 = vmatpush1.bf16.msra.mxu1 %v4196_v32 }
 0x614   :  { %3416 = vmatprep.subr.bf16.mxu1 %v4188_v21 }
 0x62b   :  { %v4334_v51 = vpop.permute.xlu1 %594 }
 0x62c   :  { %3144 = vmatmul.mubr.msk.f32.gmra.mrb[10].mxu1 %vm326_vm1, %v4334_v51 }
 0x62d   :  { %799 = vmatprep.mubr.f32.mxu1 %v4014_v0 }
 0x6e1   :  { %v666_v52 = vpop.f32.mrb[8].mxu1 }
 0x6e2   :  { %v675_v53 = vadd.f32 %v666_v52, %v4271_v3  ;;  %v668_v54 = vpop.f32.mrb[9].mxu1 }
 0x6e4   :  { %3617 = vtanh.f32 %v675_v53  ;;  %v3145_v2 = vmul.f32 -1.442695, %v675_v53 }
 0x6ee   :  { %v3618_v55 = vpop.eup %3617 }
 0x6ef   :  { %686 = vrot.lane.b32.xlu0 %v3618_v55, %s4015_s0 }
 0x6ff   :  { %v671_v56 = vpop.f32.mrb[10].mxu1 }
 0x700   :  { %v672_v57 = vpop.f32.mrb[11].mxu1 }
 0x701   :  { %v676_v58 = vadd.f32 %v672_v57, %v4286_v18 }
 0x703   :  { %3619 = vtanh.f32 %v676_v58  ;;  %v3146_v3 = vmul.f32 -1.442695, %v676_v58 }
 0x704   :  { %3621 = vpow2.f32 %v3145_v2 }
 0x70d   :  { %v3620_v60 = vpop.eup %3619 }
 0x70e   :  { %710 = vrot.lane.b32.xlu1 %v3620_v60, %s4015_s0  ;;  %v3622_v4 = vpop.eup %3621 }
 0x70f   :  { %v680_v6 = vadd.f32 1.0, %v3622_v4 }
 0x711   :  { %3623 = vrcp.f32 %v680_v6 }
 0x712   :  { %3625 = vpow2.f32 %v3146_v3 }
 0x71b   :  { %v3624_v8 = vpop.eup %3623 }
 0x71c   :  { %v3626_v13 = vpop.eup %3625  ;;  %v684_v22 = vmul.f32 %v3624_v8, %v559_v37 }
 0x71d   :  { %v704_v15 = vadd.f32 1.0, %v3626_v13 }
 0x71f   :  { %3627 = vrcp.f32 %v704_v15 }
 0x729   :  { %v3628_v18 = vpop.eup %3627 }
 0x72a   :  { %v708_v28 = vmul.f32 %v3628_v18, %v583_v41 }
 0x761   :  { %v687_v10 = vpop.permute.xlu0 %686 }
 0x762   :  { %v689_v11 = vmul.f32 %v3624_v8, %v687_v10 }
 0x764   :  { %691 = vrot.lane.b32.xlu0 %v689_v11, %s4016_s2 }
 0x780   :  { %v711_v17 = vpop.permute.xlu1 %710 }
 0x781   :  { %v713_v19 = vmul.f32 %v3628_v18, %v711_v17 }
 0x783   :  { %715 = vrot.lane.b32.xlu1 %v713_v19, %s4016_s2 }
 0x7d6   :  { %v692_v25 = vpop.permute.xlu0 %691 }
 0x7d7   :  { %v694_v62 = vadd.f32 %v692_v25, %v684_v22 }
 0x7d9   :  { %3629 = vtanh.f32 %v694_v62 }
 0x7e3   :  { %v3630_v27 = vpop.eup %3629 }
 0x7e4   :  { %697 = vrot.lane.b32.xlu0 %v3630_v27, %s4015_s0 }
 0x7f5   :  { %v716_v29 = vpop.permute.xlu1 %715 }
 0x7f6   :  { %v718_v30 = vadd.f32 %v716_v29, %v708_v28 }
 0x7f8   :  { %3631 = vtanh.f32 %v718_v30 }
 0x802   :  { %v3632_v24 = vpop.eup %3631 }
 0x803   :  { %721 = vrot.lane.b32.xlu1 %v3632_v24, %s4015_s0 }
 0x856   :  { %v698_v33 = vpop.permute.xlu0 %697 }
 0x857   :  { %v700_v34 = vmul.f32 %v3624_v8, %v698_v33 }
 0x859   :  { %727 = vrot.lane.b32.xlu0 %v700_v34, %s4016_s2 }
 0x875   :  { %v722_v35 = vpop.permute.xlu1 %721 }
 0x876   :  { %v724_v36 = vmul.f32 %v3628_v18, %v722_v35 }
 0x878   :  { %729 = vrot.lane.b32.xlu1 %v724_v36, %s4016_s2 }
 0x8cb   :  { %v4349_v37 = vpop.permute.xlu0 %727 }
 0x8cc   :  { %3147 = vmatmul.mubr.msk.f32.vlgmr.msra.gmra.mrb[12].mxu1 %vm326_vm1, %v4349_v37 }
 0x8cd   :  { %804 = vmatprep.mubr.f32.mxu1 %v4014_v0  ;;  %3418 = vmatpush1.bf16.msra.mxu1 %v4190_v23 }
 0x8ce   :  { %3420 = vmatprep.subr.bf16.mxu1 %v4194_v31 }
 0x8d1   :  { %3422 = vmatpush1.bf16.msra.mxu1 %v4196_v32 }
 0x8d2   :  { %3432 = vmatprep.subr.bf16.mxu1 %v4188_v21 }
 0x8ea   :  { %v4358_v38 = vpop.permute.xlu1 %729 }
 0x8eb   :  { %3148 = vmatmul.mubr.msk.f32.gmra.mrb[14].mxu1 %vm326_vm1, %v4358_v38 }
 0x8ec   :  { %934 = vmatprep.mubr.f32.mxu1 %v4014_v0 }
 0x99f   :  { %v801_v39 = vpop.f32.mrb[12].mxu1 }
 0x9a0   :  { %v810_v40 = vadd.f32 %v801_v39, %v4275_v7  ;;  %v803_v41 = vpop.f32.mrb[13].mxu1 }
 0x9a2   :  { %3633 = vtanh.f32 %v810_v40  ;;  %v3149_v48 = vmul.f32 -1.442695, %v810_v40 }
 0x9ac   :  { %v3634_v42 = vpop.eup %3633 }
 0x9ad   :  { %821 = vrot.lane.b32.xlu0 %v3634_v42, %s4015_s0 }
 0x9be   :  { %v806_v43 = vpop.f32.mrb[14].mxu1 }
 0x9bf   :  { %v807_v44 = vpop.f32.mrb[15].mxu1 }
 0x9c0   :  { %v811_v45 = vadd.f32 %v807_v44, %v4282_v14 }
 0x9c2   :  { %3635 = vtanh.f32 %v811_v45  ;;  %v3150_v55 = vmul.f32 -1.442695, %v811_v45 }
 0x9c3   :  { %3637 = vpow2.f32 %v3149_v48 }
 0x9cc   :  { %v3636_v21 = vpop.eup %3635 }
 0x9cd   :  { %845 = vrot.lane.b32.xlu1 %v3636_v21, %s4015_s0  ;;  %v3638_v52 = vpop.eup %3637 }
 0x9ce   :  { %v815_v53 = vadd.f32 1.0, %v3638_v52 }
 0x9d0   :  { %3639 = vrcp.f32 %v815_v53 }
 0x9d1   :  { %3641 = vpow2.f32 %v3150_v55 }
 0x9da   :  { %v3640_v54 = vpop.eup %3639 }
 0x9db   :  { %v3642_v57 = vpop.eup %3641  ;;  %v819_v4 = vmul.f32 %v3640_v54, %v694_v62 }
 0x9dc   :  { %v839_v58 = vadd.f32 1.0, %v3642_v57 }
 0x9de   :  { %3643 = vrcp.f32 %v839_v58 }
 0x9e8   :  { %v3644_v14 = vpop.eup %3643 }
 0x9e9   :  { %v843_v10 = vmul.f32 %v3644_v14, %v718_v30 }
 0xa1f   :  { %v822_v7 = vpop.permute.xlu0 %821 }
 0xa20   :  { %v824_v56 = vmul.f32 %v3640_v54, %v822_v7 }
 0xa22   :  { %826 = vrot.lane.b32.xlu0 %v824_v56, %s4016_s2 }
 0xa3f   :  { %v846_v60 = vpop.permute.xlu1 %845 }
 0xa40   :  { %v848_v2 = vmul.f32 %v3644_v14, %v846_v60 }
 0xa42   :  { %850 = vrot.lane.b32.xlu1 %v848_v2, %s4016_s2 }
 0xa94   :  { %v827_v6 = vpop.permute.xlu0 %826 }
 0xa95   :  { %v829_v8 = vadd.f32 %v827_v6, %v819_v4 }
 0xa97   :  { %3645 = vtanh.f32 %v829_v8 }
 0xaa1   :  { %v3646_v3 = vpop.eup %3645 }
 0xaa2   :  { %832 = vrot.lane.b32.xlu0 %v3646_v3, %s4015_s0 }
 0xab4   :  { %v851_v11 = vpop.permute.xlu1 %850 }
 0xab5   :  { %v853_v13 = vadd.f32 %v851_v11, %v843_v10 }
 0xab7   :  { %3647 = vtanh.f32 %v853_v13 }
 0xac1   :  { %v3648_v15 = vpop.eup %3647 }
 0xac2   :  { %856 = vrot.lane.b32.xlu1 %v3648_v15, %s4015_s0 }
 0xb14   :  { %v833_v18 = vpop.permute.xlu0 %832 }
 0xb15   :  { %v835_v17 = vmul.f32 %v3640_v54, %v833_v18 }
 0xb17   :  { %862 = vrot.lane.b32.xlu0 %v835_v17, %s4016_s2 }
 0xb34   :  { %v857_v19 = vpop.permute.xlu1 %856 }
 0xb35   :  { %v859_v22 = vmul.f32 %v3644_v14, %v857_v19 }
 0xb37   :  { %864 = vrot.lane.b32.xlu1 %v859_v22, %s4016_s2 }
 0xb89   :  { %v4373_v25 = vpop.permute.xlu0 %862 }
 0xb8a   :  { %3151 = vmatmul.mubr.msk.f32.vlgmr.msra.gmra.mrb[16].mxu1 %vm326_vm1, %v4373_v25 }
 0xb8b   :  { %939 = vmatprep.mubr.f32.mxu1 %v4014_v0  ;;  %3434 = vmatpush1.bf16.msra.mxu1 %v4190_v23 }
 0xb8c   :  { %3436 = vmatprep.subr.bf16.mxu1 %v4194_v31 }
 0xb8f   :  { %3438 = vmatpush1.bf16.msra.mxu1 %v4196_v32 }
 0xba9   :  { %v4381_v62 = vpop.permute.xlu1 %864 }
 0xbaa   :  { %3152 = vmatmul.mubr.msk.f32.gmra.mrb[18].mxu1 %vm326_vm1, %v4381_v62 }
 0xbab   :  { %1204 = vmatprep.mubr.f32.mxu1 %v4014_v0 }
 0xc5d   :  { %v936_v27 = vpop.f32.mrb[16].mxu1 }
 0xc5e   :  { %v945_v28 = vadd.f32 %v936_v27, %v4280_v12  ;;  %v938_v29 = vpop.f32.mrb[17].mxu1 }
 0xc60   :  { %3649 = vtanh.f32 %v945_v28  ;;  %v3153_v36 = vmul.f32 -1.442695, %v945_v28 }
 0xc6a   :  { %v3650_v30 = vpop.eup %3649 }
 0xc6b   :  { %956 = vrot.lane.b32.xlu0 %v3650_v30, %s4015_s0 }
 0xc7d   :  { %v941_v24 = vpop.f32.mrb[18].mxu1 }
 0xc7e   :  { %v942_v33 = vpop.f32.mrb[19].mxu1 }
 0xc7f   :  { %v946_v34 = vadd.f32 %v942_v33, %v4277_v9 }
 0xc81   :  { %3651 = vtanh.f32 %v946_v34  ;;  %v3154_v43 = vmul.f32 -1.442695, %v946_v34 }
 0xc82   :  { %3653 = vpow2.f32 %v3153_v36 }
 0xc8b   :  { %v3652_v35 = vpop.eup %3651 }
 0xc8c   :  { %980 = vrot.lane.b32.xlu1 %v3652_v35, %s4015_s0  ;;  %v3654_v39 = vpop.eup %3653 }
 0xc8d   :  { %v950_v40 = vadd.f32 1.0, %v3654_v39 }
 0xc8f   :  { %3655 = vrcp.f32 %v950_v40 }
 0xc90   :  { %3657 = vpow2.f32 %v3154_v43 }
 0xc99   :  { %v3656_v41 = vpop.eup %3655 }
 0xc9a   :  { %v3658_v44 = vpop.eup %3657  ;;  %v954_v52 = vmul.f32 %v3656_v41, %v829_v8 }
 0xc9b   :  { %v974_v45 = vadd.f32 1.0, %v3658_v44 }
 0xc9d   :  { %3659 = vrcp.f32 %v974_v45 }
 0xca7   :  { %v3660_v9 = vpop.eup %3659 }
 0xca8   :  { %v978_v55 = vmul.f32 %v3660_v9, %v853_v13 }
 0xcdd   :  { %v957_v12 = vpop.permute.xlu0 %956 }
 0xcde   :  { %v959_v42 = vmul.f32 %v3656_v41, %v957_v12 }
 0xce0   :  { %961 = vrot.lane.b32.xlu0 %v959_v42, %s4016_s2 }
 0xcfe   :  { %v981_v21 = vpop.permute.xlu1 %980 }
 0xcff   :  { %v983_v48 = vmul.f32 %v3660_v9, %v981_v21 }
 0xd01   :  { %985 = vrot.lane.b32.xlu1 %v983_v48, %s4016_s2 }
 0xd52   :  { %v962_v53 = vpop.permute.xlu0 %961 }
 0xd53   :  { %v964_v54 = vadd.f32 %v962_v53, %v954_v52 }
 0xd55   :  { %3661 = vtanh.f32 %v964_v54 }
 0xd5f   :  { %v3662_v7 = vpop.eup %3661 }
 0xd60   :  { %967 = vrot.lane.b32.xlu0 %v3662_v7, %s4015_s0 }
 0xd73   :  { %v986_v56 = vpop.permute.xlu1 %985 }
 0xd74   :  { %v988_v57 = vadd.f32 %v986_v56, %v978_v55 }
 0xd76   :  { %3663 = vtanh.f32 %v988_v57 }
 0xd80   :  { %v3664_v58 = vpop.eup %3663 }
 0xd81   :  { %991 = vrot.lane.b32.xlu1 %v3664_v58, %s4015_s0 }
 0xdd2   :  { %v968_v14 = vpop.permute.xlu0 %967 }
 0xdd3   :  { %v970_v60 = vmul.f32 %v3656_v41, %v968_v14 }
 0xdd5   :  { %997 = vrot.lane.b32.xlu0 %v970_v60, %s4016_s2 }
 0xdf3   :  { %v992_v2 = vpop.permute.xlu1 %991 }
 0xdf4   :  { %v994_v4 = vmul.f32 %v3660_v9, %v992_v2 }
 0xdf6   :  { %999 = vrot.lane.b32.xlu1 %v994_v4, %s4016_s2 }
 0xe47   :  { %v4396_v6 = vpop.permute.xlu0 %997 }
 0xe48   :  { %3155 = vmatmul.mubr.msk.f32.vlgmr.msra.gmra.mrb[16].mxu0 %vm326_vm1, %v4396_v6 }
 0xe49   :  { %1074 = vmatprep.mubr.f32.mxu0 %v4014_v0  ;;  %3442 = vmatpush1.bf16.msra.mxu0 %v4190_v23 }
 0xe4a   :  { %3444 = vmatprep.subr.bf16.mxu0 %v4194_v31 }
 0xe4d   :  { %3446 = vmatpush1.bf16.msra.mxu0 %v4196_v32 }
 0xe68   :  { %v4404_v8 = vpop.permute.xlu1 %999 }
 0xe69   :  { %3156 = vmatmul.mubr.msk.f32.gmra.mrb[18].mxu0 %vm326_vm1, %v4404_v8 }
 0xe6a   :  { %1339 = vmatprep.mubr.f32.mxu0 %v4014_v0 }
 0xf1b   :  { %v1071_v3 = vpop.f32.mrb[16].mxu0 }
 0xf1c   :  { %v1080_v10 = vadd.f32 %v1071_v3, %v4284_v16  ;;  %v1073_v11 = vpop.f32.mrb[17].mxu0 }
 0xf1e   :  { %3665 = vtanh.f32 %v1080_v10  ;;  %v3157_v18 = vmul.f32 -1.442695, %v1080_v10 }
 0xf28   :  { %v3666_v13 = vpop.eup %3665 }
 0xf29   :  { %1091 = vrot.lane.b32.xlu0 %v3666_v13, %s4015_s0 }
 0xf3c   :  { %v1076_v23 = vpop.f32.mrb[18].mxu0 }
 0xf3d   :  { %v1077_v15 = vpop.f32.mrb[19].mxu0 }
 0xf3e   :  { %v1081_v31 = vadd.f32 %v1077_v15, %v4273_v5 }
 0xf40   :  { %3667 = vtanh.f32 %v1081_v31  ;;  %v3158_v28 = vmul.f32 -1.442695, %v1081_v31 }
 0xf41   :  { %3669 = vpow2.f32 %v3157_v18 }
 0xf4a   :  { %v3668_v32 = vpop.eup %3667 }
 0xf4b   :  { %1115 = vrot.lane.b32.xlu1 %v3668_v32, %s4015_s0  ;;  %v3670_v17 = vpop.eup %3669 }
 0xf4c   :  { %v1085_v19 = vadd.f32 1.0, %v3670_v17 }
 0xf4e   :  { %3671 = vrcp.f32 %v1085_v19 }
 0xf4f   :  { %3673 = vpow2.f32 %v3158_v28 }
 0xf58   :  { %v3672_v22 = vpop.eup %3671 }
 0xf59   :  { %v3674_v29 = vpop.eup %3673  ;;  %v1089_v34 = vmul.f32 %v3672_v22, %v964_v54 }
 0xf5a   :  { %v1109_v30 = vadd.f32 1.0, %v3674_v29 }
 0xf5c   :  { %3675 = vrcp.f32 %v1109_v30 }
 0xf66   :  { %v3676_v5 = vpop.eup %3675 }
 0xf67   :  { %v1113_v40 = vmul.f32 %v3676_v5, %v988_v57 }
 0xf9b   :  { %v1092_v16 = vpop.permute.xlu0 %1091 }
 0xf9c   :  { %v1094_v27 = vmul.f32 %v3672_v22, %v1092_v16 }
 0xf9e   :  { %1096 = vrot.lane.b32.xlu0 %v1094_v27, %s4016_s2 }
 0xfbd   :  { %v1116_v24 = vpop.permute.xlu1 %1115 }
 0xfbe   :  { %v1118_v33 = vmul.f32 %v3676_v5, %v1116_v24 }
 0xfc0   :  { %1120 = vrot.lane.b32.xlu1 %v1118_v33, %s4016_s2 }
0x1010   :  { %v1097_v35 = vpop.permute.xlu0 %1096 }
0x1011   :  { %v1099_v36 = vadd.f32 %v1097_v35, %v1089_v34 }
0x1013   :  { %3677 = vtanh.f32 %v1099_v36 }
0x101d   :  { %v3678_v39 = vpop.eup %3677 }
0x101e   :  { %1102 = vrot.lane.b32.xlu0 %v3678_v39, %s4015_s0 }
0x1032   :  { %v1121_v41 = vpop.permute.xlu1 %1120 }
0x1033   :  { %v1123_v12 = vadd.f32 %v1121_v41, %v1113_v40 }
0x1035   :  { %3679 = vtanh.f32 %v1123_v12 }
0x103f   :  { %v3680_v42 = vpop.eup %3679 }
0x1040   :  { %1126 = vrot.lane.b32.xlu1 %v3680_v42, %s4015_s0 }
0x1090   :  { %v1103_v43 = vpop.permute.xlu0 %1102 }
0x1091   :  { %v1105_v44 = vmul.f32 %v3672_v22, %v1103_v43 }
0x1093   :  { %1132 = vrot.lane.b32.xlu0 %v1105_v44, %s4016_s2 }
0x10b2   :  { %v1127_v45 = vpop.permute.xlu1 %1126 }
0x10b3   :  { %v1129_v9 = vmul.f32 %v3676_v5, %v1127_v45 }
0x10b5   :  { %1134 = vrot.lane.b32.xlu1 %v1129_v9, %s4016_s2 }
0x1105   :  { %v4419_v21 = vpop.permute.xlu0 %1132 }
0x1106   :  { %3159 = vmatmul.mubr.msk.f32.vlgmr.msra.gmra.mrb[20].mxu1 %vm326_vm1, %v4419_v21 }
0x1107   :  { %1209 = vmatprep.mubr.f32.mxu1 %v4014_v0 }
0x1127   :  { %v4424_v48 = vpop.permute.xlu1 %1134 }
0x1128   :  { %3160 = vmatmul.mubr.msk.f32.gmra.mrb[22].mxu1 %vm326_vm1, %v4424_v48 }
0x11d9   :  { %v1206_v52 = vpop.f32.mrb[20].mxu1 }
0x11da   :  { %v1215_v53 = vadd.f32 %v1206_v52, %v4288_v20  ;;  %v1208_v54 = vpop.f32.mrb[21].mxu1 }
0x11dc   :  { %3681 = vtanh.f32 %v1215_v53  ;;  %v3161_v14 = vmul.f32 -1.442695, %v1215_v53 }
0x11e6   :  { %v3682_v7 = vpop.eup %3681 }
0x11e7   :  { %1226 = vrot.lane.b32.xlu0 %v3682_v7, %s4015_s0 }
0x11fb   :  { %v1211_v55 = vpop.f32.mrb[22].mxu1 }
0x11fc   :  { %v1212_v56 = vpop.f32.mrb[23].mxu1 }
0x11fd   :  { %v1216_v57 = vadd.f32 %v1212_v56, %v4269_v1 }
0x11ff   :  { %3683 = vtanh.f32 %v1216_v57  ;;  %v3162_v10 = vmul.f32 -1.442695, %v1216_v57 }
0x1200   :  { %3685 = vpow2.f32 %v3161_v14 }
0x1209   :  { %v3684_v58 = vpop.eup %3683 }
0x120a   :  { %1250 = vrot.lane.b32.xlu1 %v3684_v58, %s4015_s0  ;;  %v3686_v60 = vpop.eup %3685 }
0x120b   :  { %v1220_v2 = vadd.f32 1.0, %v3686_v60 }
0x120d   :  { %3687 = vrcp.f32 %v1220_v2 }
0x120e   :  { %3689 = vpow2.f32 %v3162_v10  ;;  %v172_v10 = vld [vmem:[#allocation7] sm:$0xff] }
0x1217   :  { %v3688_v4 = vpop.eup %3687 }
0x1218   :  { %v3690_v11 = vpop.eup %3689  ;;  %v1224_v31 = vmul.f32 %v3688_v4, %v1099_v36 }
0x1219   :  { %v1244_v13 = vadd.f32 1.0, %v3690_v11  ;;  %v173_v11 = vld [vmem:[#allocation7 + $0x8] sm:$0xff] }
0x121b   :  { %3691 = vrcp.f32 %v1244_v13  ;;  %v174_v13 = vld [vmem:[#allocation7 + $0x10] sm:$0xff] }
0x1225   :  { %v3692_v1 = vpop.eup %3691 }
0x1226   :  { %v1248_v19 = vmul.f32 %v3692_v1, %v1123_v12 }
0x1259   :  { %v1227_v20 = vpop.permute.xlu0 %1226 }
0x125a   :  { %v1229_v3 = vmul.f32 %v3688_v4, %v1227_v20 }
0x125c   :  { %1231 = vrot.lane.b32.xlu0 %v1229_v3, %s4016_s2 }
0x127c   :  { %v1251_v23 = vpop.permute.xlu1 %1250 }
0x127d   :  { %v1253_v15 = vmul.f32 %v3692_v1, %v1251_v23  ;;  %v175_v23 = vld [vmem:[#allocation7 + $0x18] sm:$0xff] }
0x127f   :  { %1255 = vrot.lane.b32.xlu1 %v1253_v15, %s4016_s2  ;;  %v3451_v15 = vpack.c.bf16 %v175_v23, %v174_v13 }
0x12ce   :  { %v1232_v32 = vpop.permute.xlu0 %1231 }
0x12cf   :  { %v1234_v18 = vadd.f32 %v1232_v32, %v1224_v31 }
0x12d1   :  { %3693 = vtanh.f32 %v1234_v18 }
0x12db   :  { %v3694_v17 = vpop.eup %3693 }
0x12dc   :  { %1237 = vrot.lane.b32.xlu0 %v3694_v17, %s4015_s0  ;;  %v169_v17 = vld [vmem:[#allocation6 + $0x8] sm:$0xff] }
0x12f1   :  { %v1256_v22 = vpop.permute.xlu1 %1255 }
0x12f2   :  { %v1258_v16 = vadd.f32 %v1256_v22, %v1248_v19 }
0x12f4   :  { %3695 = vtanh.f32 %v1258_v16 }
0x12fe   :  { %v3696_v27 = vpop.eup %3695 }
0x12ff   :  { %1261 = vrot.lane.b32.xlu1 %v3696_v27, %s4015_s0  ;;  %v1635_v27 = vld [vmem:[#allocation10 + $0x8] sm:$0xff] }
0x134e   :  { %v1238_v28 = vpop.permute.xlu0 %1237 }
0x134f   :  { %v1240_v29 = vmul.f32 %v3688_v4, %v1238_v28  ;;  %v1637_v28 = vld [vmem:[#allocation10 + $0x18] sm:$0xff] }
0x1351   :  { %1267 = vrot.lane.b32.xlu0 %v1240_v29, %s4016_s2  ;;  %v1634_v29 = vld [vmem:[#allocation10] sm:$0xff] }
0x1371   :  { %v1262_v30 = vpop.permute.xlu1 %1261 }
0x1372   :  { %v1264_v5 = vmul.f32 %v3692_v1, %v1262_v30  ;;  %v3447_v1 = vpack.c.bf16 %v173_v11, %v172_v10  ;;  %v3463_v30 = vpack.c.bf16 %v1637_v28, %v1635_v27 }
0x1374   :  { %1269 = vrot.lane.b32.xlu1 %v1264_v5, %s4016_s2  ;;  %3448 = vmatprep.subr.bf16.mxu1 %v3447_v1  ;;  %v1636_v5 = vld [vmem:[#allocation10 + $0x10] sm:$0xff] }
0x1375   :  { %3450 = vmatpush3.bf16.msra.mxu1 %v3447_v1  ;;  %3464 = vmatprep.subr.bf16.mxu0 %v3463_v30  ;;  %v1642_v1 = vld [vmem:[#allocation12] sm:$0x3] }
0x1376   :  { %3452 = vmatprep.subr.bf16.mxu1 %v3451_v15  ;;  %v1664_v23 = vrot.slane %v1642_v1, %v180_v47 }
0x1379   :  { %3454 = vmatpush3.bf16.msra.mxu1 %v3451_v15  ;;  %v1668_v15 = vrot.slane %v1642_v1, %v184_v49 }
0x13c3   :  { %v4438_v24 = vpop.permute.xlu0 %1267 }
0x13c4   :  { %3163 = vmatmul.mubr.msk.f32.vlgmr.msra.gmra.mrb[20].mxu0 %vm326_vm1, %v4438_v24 }
0x13c5   :  { %1344 = vmatprep.mubr.f32.mxu0 %v4014_v0 }
0x13e6   :  { %v4443_v33 = vpop.permute.xlu1 %1269 }
0x13e7   :  { %3164 = vmatmul.mubr.msk.f32.gmra.mrb[22].mxu0 %vm326_vm1, %v4443_v33 }
0x13e8   :  { %1759 = vmatprep.mubr.f32.mxu0 %v4014_v0 }
0x1497   :  { %v1341_v34 = vpop.f32.mrb[20].mxu0 }
0x1498   :  { %v1350_v35 = vadd.f32 %v1341_v34, %v4292_v26  ;;  %v1343_v36 = vpop.f32.mrb[21].mxu0  ;;  %v3465_v34 = vpack.c.bf16 %v1636_v5, %v1634_v29 }
0x1499   :  { %v1641_v36 = vld [vmem:[#allocation10 + $0x38] sm:$0xff] }
0x149a   :  { %3697 = vtanh.f32 %v1350_v35  ;;  %v3165_v43 = vmul.f32 -1.442695, %v1350_v35  ;;  %v1639_v35 = vld [vmem:[#allocation10 + $0x28] sm:$0xff]  ;;  %3466 = vmatpush1.bf16.msra.mxu0 %v3465_v34 }
0x14a4   :  { %v3698_v39 = vpop.eup %3697 }
0x14a5   :  { %1361 = vrot.lane.b32.xlu1 %v3698_v39, %s4015_s0  ;;  %v3467_v39 = vpack.c.bf16 %v1641_v36, %v1639_v35 }
0x14a7   :  { %3468 = vmatprep.subr.bf16.mxu0 %v3467_v39 }
0x14ba   :  { %v1346_v40 = vpop.f32.mrb[22].mxu0 }
0x14bb   :  { %v1347_v41 = vpop.f32.mrb[23].mxu0  ;;  %v170_v40 = vld [vmem:[#allocation6 + $0x10] sm:$0xff] }
0x14bc   :  { %v1351_v12 = vadd.f32 %v1347_v41, %v4265_v59  ;;  %v171_v41 = vld [vmem:[#allocation6 + $0x18] sm:$0xff] }
0x14be   :  { %3699 = vtanh.f32 %v1351_v12  ;;  %v3166_v53 = vmul.f32 -1.442695, %v1351_v12 }
0x14bf   :  { %3701 = vpow2.f32 %v3165_v43  ;;  %v1644_v43 = vld [vmem:[%s4887_s9 + $0x8] sm:$0xff] }
0x14c8   :  { %v3700_v42 = vpop.eup %3699 }
0x14c9   :  { %1385 = vrot.lane.b32.xlu0 %v3700_v42, %s4015_s0  ;;  %v3702_v44 = vpop.eup %3701  ;;  %v3459_v42 = vpack.c.bf16 %v171_v41, %v170_v40 }
0x14ca   :  { %v1355_v45 = vadd.f32 1.0, %v3702_v44  ;;  %v1646_v44 = vld [vmem:[%s4887_s9 + $0x18] sm:$0xff] }
0x14cc   :  { %3703 = vrcp.f32 %v1355_v45  ;;  %v4469_v45 = vpack.c.bf16 %v1646_v44, %v1644_v43 }
0x14cd   :  { %3705 = vpow2.f32 %v3166_v53 }
0x14d6   :  { %v3704_v9 = vpop.eup %3703 }
0x14d7   :  { %v3706_v54 = vpop.eup %3705  ;;  %v1359_v57 = vmul.f32 %v3704_v9, %v1234_v18  ;;  %v168_v18 = vld [vmem:[#allocation6] sm:$0xff] }
0x14d8   :  { %v1379_v7 = vadd.f32 1.0, %v3706_v54  ;;  %v3455_v19 = vpack.c.bf16 %v169_v17, %v168_v18 }
0x14da   :  { %3707 = vrcp.f32 %v1379_v7  ;;  %3456 = vmatprep.subr.bf16.mxu1 %v3455_v19 }
0x14e4   :  { %v3708_v59 = vpop.eup %3707 }
0x14e5   :  { %v1383_v2 = vmul.f32 %v3708_v59, %v1258_v16 }
0x1517   :  { %v1362_v26 = vpop.permute.xlu1 %1361 }
0x1518   :  { %v1364_v52 = vmul.f32 %v3704_v9, %v1362_v26 }
0x151a   :  { %1366 = vrot.lane.b32.xlu1 %v1364_v52, %s4016_s2 }
0x153b   :  { %v1386_v55 = vpop.permute.xlu0 %1385 }
0x153c   :  { %v1388_v56 = vmul.f32 %v3708_v59, %v1386_v55 }
0x153e   :  { %1390 = vrot.lane.b32.xlu0 %v1388_v56, %s4016_s2 }
0x158c   :  { %v1367_v58 = vpop.permute.xlu1 %1366 }
0x158d   :  { %v1369_v14 = vadd.f32 %v1367_v58, %v1359_v57 }
0x158f   :  { %3709 = vtanh.f32 %v1369_v14 }
0x1599   :  { %v3710_v60 = vpop.eup %3709 }
0x159a   :  { %1372 = vrot.lane.b32.xlu1 %v3710_v60, %s4015_s0 }
0x15b0   :  { %v1391_v4 = vpop.permute.xlu0 %1390 }
0x15b1   :  { %v1393_v20 = vadd.f32 %v1391_v4, %v1383_v2 }
0x15b3   :  { %3711 = vtanh.f32 %v1393_v20 }
0x15bd   :  { %v3712_v3 = vpop.eup %3711 }
0x15be   :  { %1396 = vrot.lane.b32.xlu0 %v3712_v3, %s4015_s0 }
0x160c   :  { %v1373_v31 = vpop.permute.xlu1 %1372 }
0x160d   :  { %v1375_v32 = vmul.f32 %v3704_v9, %v1373_v31 }
0x160f   :  { %1511 = vrot.lane.b32.xlu1 %v1375_v32, %s4016_s2 }
0x1630   :  { %v1397_v22 = vpop.permute.xlu0 %1396 }
0x1631   :  { %v1399_v16 = vmul.f32 %v3708_v59, %v1397_v22 }
0x1633   :  { %1401 = vrot.lane.b32.xlu0 %v1399_v16, %s4016_s2 }
0x16a5   :  { %v1402_v12 = vpop.permute.xlu0 %1401 }
0x16a6   :  { %3295 = vmatprep.mubr.msk.f32.mxu1 %vm326_vm1, %v1402_v12 }
0x16a7   :  { %3296 = vmatmul.mubr.msk.f32.vlgmr.msra.gmra.mrb[24].mxu1 %vm326_vm1, %v4443_v33  ;;  %v3183_v33 = vld [vmem:[#allocation9] ss:$0 sm:$0xff] }
0x16a8   :  { %3458 = vmatpush3.bf16.msra.mxu1 %v3455_v19  ;;  %3298 = vmatprep.mubr.msk.f32.mxu1 %vm326_vm1, %v4424_v48  ;;  %v1643_v48 = vld [vmem:[%s4887_s9] sm:$0xff] }
0x16a9   :  { %3460 = vmatprep.subr.bf16.mxu1 %v3459_v42 }
0x16ab   :  { %3299 = vmatmul.mubr.msk.f32.gmra.mrb[26].mxu1 %vm326_vm1, %v4404_v8  ;;  %v1645_v8 = vld [vmem:[%s4887_s9 + $0x10] sm:$0xff] }
0x16ac   :  { %3301 = vmatprep.mubr.msk.f32.mxu1 %vm326_vm1, %v4381_v62  ;;  %3462 = vmatpush3.bf16.msra.mxu1 %v3459_v42  ;;  %v4490_v62 = vpack.c.bf16 %v1645_v8, %v1643_v48 }
0x16ad   :  { %3472 = vmatprep.subr.bf16.mxu1 %v4469_v45 }
0x16af   :  { %3302 = vmatmul.mubr.msk.f32.gmra.mrb[28].mxu1 %vm326_vm1, %v4358_v38  ;;  %v1650_v38 = vld [vmem:[%s4887_s9 + $0x38] sm:$0xff] }
0x16b0   :  { %3304 = vmatprep.mubr.msk.f32.mxu1 %vm326_vm1, %v4334_v51 }
0x16b3   :  { %3305 = vmatmul.mubr.msk.f32.gmra.mrb[30].mxu1 %vm326_vm1, %v4310_v63  ;;  %v1638_v63 = vld [vmem:[#allocation10 + $0x20] sm:$0xff] }
0x16b4   :  { %3315 = vmatprep.mubr.msk.f32.mxu1 %vm326_vm1, %v4301_v61  ;;  %v1512_v61 = vpop.permute.xlu1 %1511 }
0x16b7   :  { %3316 = vmatmul.mubr.msk.f32.vlgmr.msra.gmra.mrb[24].mxu1 %vm326_vm1, %v4325_v50  ;;  %v1640_v50 = vld [vmem:[#allocation10 + $0x30] sm:$0xff] }
0x16b8   :  { %3318 = vmatprep.mubr.msk.f32.mxu1 %vm326_vm1, %v4349_v37  ;;  %3474 = vmatpush1.bf16.msra.mxu1 %v4490_v62  ;;  %v3469_v51 = vpack.c.bf16 %v1640_v50, %v1638_v63  ;;  %v1648_v37 = vld [vmem:[%s4887_s9 + $0x28] sm:$0xff] }
0x16ba   :  { %3470 = vmatpush1.bf16.msra.mxu0 %v3469_v51 }
0x16bb   :  { %3319 = vmatmul.mubr.msk.f32.gmra.mrb[26].mxu1 %vm326_vm1, %v4373_v25  ;;  %v4513_v25 = vpack.c.bf16 %v1650_v38, %v1648_v37  ;;  %3480 = vmatprep.subr.bf16.mxu0 %v4469_v45 }
0x16bc   :  { %3321 = vmatprep.mubr.msk.f32.mxu1 %vm326_vm1, %v4396_v6  ;;  %v1647_v6 = vld [vmem:[%s4887_s9 + $0x20] sm:$0xff] }
0x16bd   :  { %3476 = vmatprep.subr.bf16.mxu1 %v4513_v25 }
0x16bf   :  { %3322 = vmatmul.mubr.msk.f32.gmra.mrb[28].mxu1 %vm326_vm1, %v4419_v21  ;;  %v1649_v21 = vld [vmem:[%s4887_s9 + $0x30] sm:$0xff] }
0x16c0   :  { %3324 = vmatprep.mubr.msk.f32.mxu1 %vm326_vm1, %v4438_v24  ;;  %v4521_v24 = vpack.c.bf16 %v1649_v21, %v1647_v6 }
0x16c2   :  { %3478 = vmatpush1.bf16.msra.mxu1 %v4521_v24 }
0x16c3   :  { %3325 = vmatmul.mubr.msk.f32.gmra.mrb[30].mxu1 %vm326_vm1, %v1512_v61  ;;  %3488 = vmatprep.subr.bf16.mxu1 %v4469_v45 }
0x16c4   :  { %1872 = vmatprep.mubr.f32.mxu1 %v4014_v0 }
0x16c7   :  { %1873 = vmatmul.mubr.f32.vlgmr.msra.gmra.mrb[32].mxu1 %v4014_v0 }
0x16c8   :  { %1877 = vmatprep.mubr.f32.mxu1 %v4014_v0  ;;  %3490 = vmatpush1.bf16.msra.mxu1 %v4490_v62 }
0x16c9   :  { %3492 = vmatprep.subr.bf16.mxu1 %v4513_v25 }
0x16cb   :  { %1878 = vmatmul.mubr.f32.gmra.mrb[34].mxu1 %v4014_v0 }
0x16cc   :  { %3494 = vmatpush1.bf16.msra.mxu1 %v4521_v24  ;;  %2142 = vmatprep.mubr.f32.mxu1 %v4014_v0 }
0x16cd   :  { %3504 = vmatprep.subr.bf16.mxu1 %v4469_v45 }
0x178a   :  { %v3317_v9 = vpop.f32.mrb[24].mxu1 }
0x178b   :  { %v1581_v26 = vpop.f32.mrb[25].mxu1  ;;  %v1627_v7 = vadd.f32 %v3317_v9, %v3183_v33 }
0x178c   :  { %v1626_v52 = vadd.f32 %v3183_v33, %v1581_v26 }
0x178e   :  { %v3320_v53 = vpop.f32.mrb[26].mxu1  ;;  %3184 = vmatmul.mubr.msk.f32.vlgmr.msra.gmra.mrb[24].mxu0 %vm326_vm1, %v1626_v52 }
0x178f   :  { %v1591_v54 = vpop.f32.mrb[27].mxu1  ;;  %1765 = vmatprep.mubr.f32.mxu0 %v4014_v0  ;;  %3482 = vmatpush1.bf16.msra.mxu0 %v4490_v62  ;;  %v1629_v14 = vadd.f32 %v3320_v53, %v3183_v33 }
0x1790   :  { %3484 = vmatprep.subr.bf16.mxu0 %v4513_v25  ;;  %v1628_v56 = vadd.f32 %v3183_v33, %v1591_v54 }
0x1792   :  { %v3323_v59 = vpop.f32.mrb[28].mxu1  ;;  %3185 = vmatmul.mubr.msk.f32.gmra.mrb[26].mxu0 %vm326_vm1, %v1627_v7 }
0x1793   :  { %v1601_v55 = vpop.f32.mrb[29].mxu1  ;;  %1771 = vmatprep.mubr.f32.mxu0 %v4014_v0  ;;  %3486 = vmatpush1.bf16.msra.mxu0 %v4521_v24  ;;  %v1631_v2 = vadd.f32 %v3323_v59, %v3183_v33 }
0x1794   :  { %3496 = vmatprep.subr.bf16.mxu0 %v4469_v45  ;;  %v1630_v60 = vadd.f32 %v3183_v33, %v1601_v55 }
0x1796   :  { %v3326_v57 = vpop.f32.mrb[30].mxu1  ;;  %3186 = vmatmul.mubr.msk.f32.gmra.mrb[28].mxu0 %vm326_vm1, %v1628_v56 }
0x1797   :  { %v1611_v58 = vpop.f32.mrb[31].mxu1  ;;  %1777 = vmatprep.mubr.f32.mxu0 %v4014_v0  ;;  %v1633_v20 = vadd.f32 %v3326_v57, %v3183_v33 }
0x1798   :  { %v1632_v4 = vadd.f32 %v3183_v33, %v1611_v58 }
0x179a   :  { %3187 = vmatmul.mubr.msk.f32.gmra.mrb[30].mxu0 %vm326_vm1, %v1629_v14  ;;  %v1874_v3 = vpop.f32.mrb[32].mxu1 }
0x179b   :  { %1783 = vmatprep.mubr.f32.mxu0 %v4014_v0  ;;  %v1876_v10 = vpop.f32.mrb[33].mxu1 }
0x179e   :  { %3188 = vmatmul.mubr.msk.f32.gmra.mrb[32].mxu0 %vm326_vm1, %v1630_v60  ;;  %v1879_v11 = vpop.f32.mrb[34].mxu1 }
0x179f   :  { %1789 = vmatprep.mubr.f32.mxu0 %v4014_v0  ;;  %v1880_v13 = vpop.f32.mrb[35].mxu1 }
0x17a2   :  { %3189 = vmatmul.mubr.msk.f32.gmra.mrb[34].mxu0 %vm326_vm1, %v1631_v2 }
0x17a3   :  { %1795 = vmatprep.mubr.f32.mxu0 %v4014_v0 }
0x17a6   :  { %3190 = vmatmul.mubr.msk.f32.gmra.mrb[36].mxu0 %vm326_vm1, %v1632_v4 }
0x17a7   :  { %1801 = vmatprep.mubr.f32.mxu0 %v4014_v0 }
0x17aa   :  { %3191 = vmatmul.mubr.msk.f32.gmra.mrb[38].mxu0 %vm326_vm1, %v1633_v20 }
0x17ab   :  { %2007 = vmatprep.mubr.f32.mxu0 %v4014_v0 }
0x1861   :  { %v1761_v31 = vpop.f32.mrb[24].mxu0 }
0x1862   :  { %v1762_v32 = vadd.f32 %v1761_v31, %v1664_v23  ;;  %v1763_v18 = vpop.f32.mrb[25].mxu0 }
0x1863   :  { %v4559_v17 = vadd.f32 %v1763_v18, %v1668_v15 }
0x1864   :  { %v1883_v19 = vadd.f32 %v1874_v3, %v1762_v32 }
0x1865   :  { %v1767_v22 = vpop.f32.mrb[26].mxu0 }
0x1866   :  { %3713 = vtanh.f32 %v1883_v19  ;;  %v4561_v16 = vadd.f32 %v1767_v22, %v1664_v23  ;;  %v1769_v27 = vpop.f32.mrb[27].mxu0  ;;  %v3192_v9 = vmul.f32 -1.442695, %v1883_v19 }
0x1867   :  { %v4563_v28 = vadd.f32 %v1769_v27, %v1668_v15 }
0x1869   :  { %v1773_v29 = vpop.f32.mrb[28].mxu0 }
0x186a   :  { %v4565_v30 = vadd.f32 %v1773_v29, %v1664_v23  ;;  %v1775_v47 = vpop.f32.mrb[29].mxu0 }
0x186b   :  { %v4567_v5 = vadd.f32 %v1775_v47, %v1668_v15 }
0x186d   :  { %v1779_v46 = vpop.f32.mrb[30].mxu0 }
0x186e   :  { %v4569_v49 = vadd.f32 %v1779_v46, %v1664_v23  ;;  %v1781_v34 = vpop.f32.mrb[31].mxu0 }
0x186f   :  { %v4571_v35 = vadd.f32 %v1781_v34, %v1668_v15 }
0x1870   :  { %v3714_v36 = vpop.eup %3713 }
0x1871   :  { %v1785_v39 = vpop.f32.mrb[32].mxu0  ;;  %1894 = vrot.lane.b32.xlu0 %v3714_v36, %s4015_s0 }
0x1872   :  { %v4574_v40 = vadd.f32 %v1785_v39, %v1664_v23  ;;  %v1787_v41 = vpop.f32.mrb[33].mxu0 }
0x1873   :  { %v4576_v12 = vadd.f32 %v1787_v41, %v1668_v15 }
0x1875   :  { %v1791_v42 = vpop.f32.mrb[34].mxu0 }
0x1876   :  { %v4578_v43 = vadd.f32 %v1791_v42, %v1664_v23  ;;  %v1793_v44 = vpop.f32.mrb[35].mxu0 }
0x1877   :  { %v4580_v48 = vadd.f32 %v1793_v44, %v1668_v15 }
0x1879   :  { %v1797_v8 = vpop.f32.mrb[36].mxu0 }
0x187a   :  { %v4582_v61 = vadd.f32 %v1797_v8, %v1664_v23  ;;  %v1799_v63 = vpop.f32.mrb[37].mxu0 }
0x187b   :  { %v4584_v50 = vadd.f32 %v1799_v63, %v1668_v15 }
0x187d   :  { %v1803_v51 = vpop.f32.mrb[38].mxu0 }
0x187e   :  { %v4586_v37 = vadd.f32 %v1803_v51, %v1664_v23  ;;  %v1805_v38 = vpop.f32.mrb[39].mxu0 }
0x187f   :  { %v1806_v6 = vadd.f32 %v1805_v38, %v1668_v15 }
0x1881   :  { %v1884_v21 = vadd.f32 %v1880_v13, %v1806_v6 }
0x1883   :  { %3715 = vtanh.f32 %v1884_v21  ;;  %v3193_v53 = vmul.f32 -1.442695, %v1884_v21 }
0x1884   :  { %3717 = vpow2.f32 %v3192_v9 }
0x188d   :  { %v3716_v33 = vpop.eup %3715 }
0x188e   :  { %1918 = vrot.lane.b32.xlu1 %v3716_v33, %s4015_s0  ;;  %v3718_v26 = vpop.eup %3717 }
0x188f   :  { %v1888_v52 = vadd.f32 1.0, %v3718_v26 }
0x1891   :  { %3719 = vrcp.f32 %v1888_v52 }
0x1892   :  { %3721 = vpow2.f32 %v3193_v53 }
0x189b   :  { %v3720_v54 = vpop.eup %3719 }
0x189c   :  { %v3722_v55 = vpop.eup %3721  ;;  %v1892_v60 = vmul.f32 0.0, %v3720_v54 }
0x189d   :  { %v1912_v56 = vadd.f32 1.0, %v3722_v55 }
0x189f   :  { %3723 = vrcp.f32 %v1912_v56 }
0x18a9   :  { %v3724_v57 = vpop.eup %3723 }
0x18aa   :  { %v1916_v3 = vmul.f32 0.0, %v3724_v57 }
0x18e3   :  { %v1895_v7 = vpop.permute.xlu0 %1894 }
0x18e4   :  { %v1897_v59 = vmul.f32 %v3720_v54, %v1895_v7 }
0x18e6   :  { %1899 = vrot.lane.b32.xlu0 %v1897_v59, %s4016_s2 }
0x1900   :  { %v1919_v58 = vpop.permute.xlu1 %1918 }
0x1901   :  { %v1921_v14 = vmul.f32 %v3724_v57, %v1919_v58 }
0x1903   :  { %1923 = vrot.lane.b32.xlu1 %v1921_v14, %s4016_s2 }
0x1958   :  { %v1900_v2 = vpop.permute.xlu0 %1899 }
0x1959   :  { %v1902_v4 = vadd.f32 %v1900_v2, %v1892_v60 }
0x195b   :  { %3725 = vtanh.f32 %v1902_v4 }
0x1965   :  { %v3726_v20 = vpop.eup %3725 }
0x1966   :  { %1905 = vrot.lane.b32.xlu0 %v3726_v20, %s4015_s0 }
0x1975   :  { %v1924_v10 = vpop.permute.xlu1 %1923 }
0x1976   :  { %v1926_v11 = vadd.f32 %v1924_v10, %v1916_v3 }
0x1978   :  { %3727 = vtanh.f32 %v1926_v11 }
0x1982   :  { %v3728_v13 = vpop.eup %3727 }
0x1983   :  { %1929 = vrot.lane.b32.xlu1 %v3728_v13, %s4015_s0 }
0x19d8   :  { %v1906_v1 = vpop.permute.xlu0 %1905 }
0x19d9   :  { %v1908_v23 = vmul.f32 %v3720_v54, %v1906_v1 }
0x19db   :  { %1935 = vrot.lane.b32.xlu0 %v1908_v23, %s4016_s2 }
0x19f5   :  { %v1930_v15 = vpop.permute.xlu1 %1929 }
0x19f6   :  { %v1932_v31 = vmul.f32 %v3724_v57, %v1930_v15 }
0x19f8   :  { %1937 = vrot.lane.b32.xlu1 %v1932_v31, %s4016_s2 }
0x1a4d   :  { %v4595_v32 = vpop.permute.xlu0 %1935 }
0x1a4e   :  { %3194 = vmatmul.mubr.msk.f32.vlgmr.msra.gmra.mrb[40].mxu0 %vm326_vm1, %v4595_v32 }
0x1a4f   :  { %2012 = vmatprep.mubr.f32.mxu0 %v4014_v0  ;;  %3498 = vmatpush1.bf16.msra.mxu0 %v4490_v62 }
0x1a50   :  { %3500 = vmatprep.subr.bf16.mxu0 %v4513_v25 }
0x1a53   :  { %3502 = vmatpush1.bf16.msra.mxu0 %v4521_v24 }
0x1a54   :  { %3512 = vmatprep.subr.bf16.mxu0 %v4469_v45 }
0x1a6a   :  { %v4604_v18 = vpop.permute.xlu1 %1937 }
0x1a6b   :  { %3195 = vmatmul.mubr.msk.f32.gmra.mrb[42].mxu0 %vm326_vm1, %v4604_v18 }
0x1a6c   :  { %2277 = vmatprep.mubr.f32.mxu0 %v4014_v0 }
0x1b21   :  { %v2009_v19 = vpop.f32.mrb[40].mxu0 }
0x1b22   :  { %v2018_v22 = vadd.f32 %v2009_v19, %v4561_v16  ;;  %v2011_v27 = vpop.f32.mrb[41].mxu0 }
0x1b24   :  { %3729 = vtanh.f32 %v2018_v22  ;;  %v3196_v39 = vmul.f32 -1.442695, %v2018_v22 }
0x1b2e   :  { %v3730_v29 = vpop.eup %3729 }
0x1b2f   :  { %2029 = vrot.lane.b32.xlu0 %v3730_v29, %s4015_s0 }
0x1b3e   :  { %v2014_v47 = vpop.f32.mrb[42].mxu0 }
0x1b3f   :  { %v2015_v46 = vpop.f32.mrb[43].mxu0 }
0x1b40   :  { %v2019_v34 = vadd.f32 %v2015_v46, %v4584_v50 }
0x1b42   :  { %3731 = vtanh.f32 %v2019_v34  ;;  %v3197_v44 = vmul.f32 -1.442695, %v2019_v34 }
0x1b43   :  { %3733 = vpow2.f32 %v3196_v39 }
0x1b4c   :  { %v3732_v36 = vpop.eup %3731 }
0x1b4d   :  { %2053 = vrot.lane.b32.xlu1 %v3732_v36, %s4015_s0  ;;  %v3734_v41 = vpop.eup %3733 }
0x1b4e   :  { %v2023_v42 = vadd.f32 1.0, %v3734_v41 }
0x1b50   :  { %3735 = vrcp.f32 %v2023_v42 }
0x1b51   :  { %3737 = vpow2.f32 %v3197_v44 }
0x1b5a   :  { %v3736_v16 = vpop.eup %3735 }
0x1b5b   :  { %v3738_v51 = vpop.eup %3737  ;;  %v2027_v33 = vmul.f32 %v3736_v16, %v1902_v4 }
0x1b5c   :  { %v2047_v38 = vadd.f32 1.0, %v3738_v51 }
0x1b5e   :  { %3739 = vrcp.f32 %v2047_v38 }
0x1b68   :  { %v3740_v50 = vpop.eup %3739 }
0x1b69   :  { %v2051_v53 = vmul.f32 %v3740_v50, %v1926_v11 }
0x1ba1   :  { %v2030_v8 = vpop.permute.xlu0 %2029 }
0x1ba2   :  { %v2032_v63 = vmul.f32 %v3736_v16, %v2030_v8 }
0x1ba4   :  { %2034 = vrot.lane.b32.xlu0 %v2032_v63, %s4016_s2 }
0x1bbf   :  { %v2054_v6 = vpop.permute.xlu1 %2053 }
0x1bc0   :  { %v2056_v21 = vmul.f32 %v3740_v50, %v2054_v6 }
0x1bc2   :  { %2058 = vrot.lane.b32.xlu1 %v2056_v21, %s4016_s2 }
0x1c16   :  { %v2035_v9 = vpop.permute.xlu0 %2034 }
0x1c17   :  { %v2037_v26 = vadd.f32 %v2035_v9, %v2027_v33 }
0x1c19   :  { %3741 = vtanh.f32 %v2037_v26 }
0x1c23   :  { %v3742_v52 = vpop.eup %3741 }
0x1c24   :  { %2040 = vrot.lane.b32.xlu0 %v3742_v52, %s4015_s0 }
0x1c34   :  { %v2059_v54 = vpop.permute.xlu1 %2058 }
0x1c35   :  { %v2061_v7 = vadd.f32 %v2059_v54, %v2051_v53 }
0x1c37   :  { %3743 = vtanh.f32 %v2061_v7 }
0x1c41   :  { %v3744_v59 = vpop.eup %3743 }
0x1c42   :  { %2064 = vrot.lane.b32.xlu1 %v3744_v59, %s4015_s0 }
0x1c96   :  { %v2041_v55 = vpop.permute.xlu0 %2040 }
0x1c97   :  { %v2043_v56 = vmul.f32 %v3736_v16, %v2041_v55 }
0x1c99   :  { %2070 = vrot.lane.b32.xlu0 %v2043_v56, %s4016_s2 }
0x1cb4   :  { %v2065_v57 = vpop.permute.xlu1 %2064 }
0x1cb5   :  { %v2067_v58 = vmul.f32 %v3740_v50, %v2065_v57 }
0x1cb7   :  { %2072 = vrot.lane.b32.xlu1 %v2067_v58, %s4016_s2 }
0x1d0b   :  { %v4619_v14 = vpop.permute.xlu0 %2070 }
0x1d0c   :  { %3198 = vmatmul.mubr.msk.f32.vlgmr.msra.gmra.mrb[36].mxu1 %vm326_vm1, %v4619_v14 }
0x1d0d   :  { %2147 = vmatprep.mubr.f32.mxu1 %v4014_v0  ;;  %3506 = vmatpush1.bf16.msra.mxu1 %v4490_v62 }
0x1d0e   :  { %3508 = vmatprep.subr.bf16.mxu1 %v4513_v25 }
0x1d11   :  { %3510 = vmatpush1.bf16.msra.mxu1 %v4521_v24 }
0x1d12   :  { %3520 = vmatprep.subr.bf16.mxu1 %v4469_v45 }
0x1d29   :  { %v4628_v60 = vpop.permute.xlu1 %2072 }
0x1d2a   :  { %3199 = vmatmul.mubr.msk.f32.gmra.mrb[38].mxu1 %vm326_vm1, %v4628_v60 }
0x1d2b   :  { %2412 = vmatprep.mubr.f32.mxu1 %v4014_v0 }
0x1ddf   :  { %v2144_v2 = vpop.f32.mrb[36].mxu1 }
0x1de0   :  { %v2153_v4 = vadd.f32 %v2144_v2, %v4565_v30  ;;  %v2146_v20 = vpop.f32.mrb[37].mxu1 }
0x1de2   :  { %3745 = vtanh.f32 %v2153_v4  ;;  %v3200_v23 = vmul.f32 -1.442695, %v2153_v4 }
0x1dec   :  { %v3746_v3 = vpop.eup %3745 }
0x1ded   :  { %2164 = vrot.lane.b32.xlu0 %v3746_v3, %s4015_s0 }
0x1dfd   :  { %v2149_v10 = vpop.f32.mrb[38].mxu1 }
0x1dfe   :  { %v2150_v11 = vpop.f32.mrb[39].mxu1 }
0x1dff   :  { %v2154_v13 = vadd.f32 %v2150_v11, %v4580_v48 }
0x1e01   :  { %3747 = vtanh.f32 %v2154_v13  ;;  %v3201_v30 = vmul.f32 -1.442695, %v2154_v13 }
0x1e02   :  { %3749 = vpow2.f32 %v3200_v23 }
0x1e0b   :  { %v3748_v1 = vpop.eup %3747 }
0x1e0c   :  { %2188 = vrot.lane.b32.xlu1 %v3748_v1, %s4015_s0  ;;  %v3750_v15 = vpop.eup %3749 }
0x1e0d   :  { %v2158_v31 = vadd.f32 1.0, %v3750_v15 }
0x1e0f   :  { %3751 = vrcp.f32 %v2158_v31 }
0x1e10   :  { %3753 = vpow2.f32 %v3201_v30 }
0x1e19   :  { %v3752_v19 = vpop.eup %3751 }
0x1e1a   :  { %v3754_v29 = vpop.eup %3753  ;;  %v2162_v36 = vmul.f32 %v3752_v19, %v2037_v26 }
0x1e1b   :  { %v2182_v47 = vadd.f32 1.0, %v3754_v29 }
0x1e1d   :  { %3755 = vrcp.f32 %v2182_v47 }
0x1e27   :  { %v3756_v48 = vpop.eup %3755 }
0x1e28   :  { %v2186_v44 = vmul.f32 %v3756_v48, %v2061_v7 }
0x1e5f   :  { %v2165_v22 = vpop.permute.xlu0 %2164 }
0x1e60   :  { %v2167_v27 = vmul.f32 %v3752_v19, %v2165_v22 }
0x1e62   :  { %2169 = vrot.lane.b32.xlu0 %v2167_v27, %s4016_s2 }
0x1e7e   :  { %v2189_v46 = vpop.permute.xlu1 %2188 }
0x1e7f   :  { %v2191_v34 = vmul.f32 %v3756_v48, %v2189_v46 }
0x1e81   :  { %2193 = vrot.lane.b32.xlu1 %v2191_v34, %s4016_s2 }
0x1ed4   :  { %v2170_v39 = vpop.permute.xlu0 %2169 }
0x1ed5   :  { %v2172_v41 = vadd.f32 %v2170_v39, %v2162_v36 }
0x1ed7   :  { %3757 = vtanh.f32 %v2172_v41 }
0x1ee1   :  { %v3758_v42 = vpop.eup %3757 }
0x1ee2   :  { %2175 = vrot.lane.b32.xlu0 %v3758_v42, %s4015_s0 }
0x1ef3   :  { %v2194_v16 = vpop.permute.xlu1 %2193 }
0x1ef4   :  { %v2196_v8 = vadd.f32 %v2194_v16, %v2186_v44 }
0x1ef6   :  { %3759 = vtanh.f32 %v2196_v8 }
0x1f00   :  { %v3760_v63 = vpop.eup %3759 }
0x1f01   :  { %2199 = vrot.lane.b32.xlu1 %v3760_v63, %s4015_s0 }
0x1f54   :  { %v2176_v51 = vpop.permute.xlu0 %2175 }
0x1f55   :  { %v2178_v38 = vmul.f32 %v3752_v19, %v2176_v51 }
0x1f57   :  { %2205 = vrot.lane.b32.xlu0 %v2178_v38, %s4016_s2 }
0x1f73   :  { %v2200_v50 = vpop.permute.xlu1 %2199 }
0x1f74   :  { %v2202_v6 = vmul.f32 %v3756_v48, %v2200_v50 }
0x1f76   :  { %2207 = vrot.lane.b32.xlu1 %v2202_v6, %s4016_s2 }
0x1fc9   :  { %v4643_v21 = vpop.permute.xlu0 %2205 }
0x1fca   :  { %3202 = vmatmul.mubr.msk.f32.vlgmr.msra.gmra.mrb[44].mxu0 %vm326_vm1, %v4643_v21 }
0x1fcb   :  { %2282 = vmatprep.mubr.f32.mxu0 %v4014_v0  ;;  %3514 = vmatpush1.bf16.msra.mxu0 %v4490_v62 }
0x1fcc   :  { %3516 = vmatprep.subr.bf16.mxu0 %v4513_v25 }
0x1fcf   :  { %3518 = vmatpush1.bf16.msra.mxu0 %v4521_v24 }
0x1fd0   :  { %3528 = vmatprep.subr.bf16.mxu0 %v4469_v45 }
0x1fe8   :  { %v4652_v33 = vpop.permute.xlu1 %2207 }
0x1fe9   :  { %3203 = vmatmul.mubr.msk.f32.gmra.mrb[46].mxu0 %vm326_vm1, %v4652_v33 }
0x1fea   :  { %2547 = vmatprep.mubr.f32.mxu0 %v4014_v0 }
0x209d   :  { %v2279_v9 = vpop.f32.mrb[44].mxu0 }
0x209e   :  { %v2288_v26 = vadd.f32 %v2279_v9, %v4569_v49  ;;  %v2281_v52 = vpop.f32.mrb[45].mxu0 }
0x20a0   :  { %3761 = vtanh.f32 %v2288_v26  ;;  %v3204_v55 = vmul.f32 -1.442695, %v2288_v26 }
0x20aa   :  { %v3762_v53 = vpop.eup %3761 }
0x20ab   :  { %2299 = vrot.lane.b32.xlu0 %v3762_v53, %s4015_s0 }
0x20bc   :  { %v2284_v54 = vpop.f32.mrb[46].mxu0 }
0x20bd   :  { %v2285_v7 = vpop.f32.mrb[47].mxu0 }
0x20be   :  { %v2289_v59 = vadd.f32 %v2285_v7, %v4576_v12 }
0x20c0   :  { %3763 = vtanh.f32 %v2289_v59  ;;  %v3205_v2 = vmul.f32 -1.442695, %v2289_v59 }
0x20c1   :  { %3765 = vpow2.f32 %v3204_v55 }
0x20ca   :  { %v3764_v45 = vpop.eup %3763 }
0x20cb   :  { %2323 = vrot.lane.b32.xlu1 %v3764_v45, %s4015_s0  ;;  %v3766_v56 = vpop.eup %3765 }
0x20cc   :  { %v2293_v57 = vadd.f32 1.0, %v3766_v56 }
0x20ce   :  { %3767 = vrcp.f32 %v2293_v57 }
0x20cf   :  { %3769 = vpow2.f32 %v3205_v2 }
0x20d8   :  { %v3768_v58 = vpop.eup %3767 }
0x20d9   :  { %v3770_v20 = vpop.eup %3769  ;;  %v2297_v13 = vmul.f32 %v3768_v58, %v2172_v41 }
0x20da   :  { %v2317_v3 = vadd.f32 1.0, %v3770_v20 }
0x20dc   :  { %3771 = vrcp.f32 %v2317_v3 }
0x20e6   :  { %v3772_v12 = vpop.eup %3771 }
0x20e7   :  { %v2321_v31 = vmul.f32 %v3772_v12, %v2196_v8 }
0x211d   :  { %v2300_v49 = vpop.permute.xlu0 %2299 }
0x211e   :  { %v2302_v4 = vmul.f32 %v3768_v58, %v2300_v49 }
0x2120   :  { %2304 = vrot.lane.b32.xlu0 %v2302_v4, %s4016_s2 }
0x213d   :  { %v2324_v10 = vpop.permute.xlu1 %2323 }
0x213e   :  { %v2326_v11 = vmul.f32 %v3772_v12, %v2324_v10 }
0x2140   :  { %2328 = vrot.lane.b32.xlu1 %v2326_v11, %s4016_s2 }
0x2192   :  { %v2305_v1 = vpop.permute.xlu0 %2304 }
0x2193   :  { %v2307_v23 = vadd.f32 %v2305_v1, %v2297_v13 }
0x2195   :  { %3773 = vtanh.f32 %v2307_v23 }
0x219f   :  { %v3774_v15 = vpop.eup %3773 }
0x21a0   :  { %2310 = vrot.lane.b32.xlu0 %v3774_v15, %s4015_s0 }
0x21b2   :  { %v2329_v19 = vpop.permute.xlu1 %2328 }
0x21b3   :  { %v2331_v30 = vadd.f32 %v2329_v19, %v2321_v31 }
0x21b5   :  { %3775 = vtanh.f32 %v2331_v30 }
0x21bf   :  { %v3776_v22 = vpop.eup %3775 }
0x21c0   :  { %2334 = vrot.lane.b32.xlu1 %v3776_v22, %s4015_s0 }
0x2212   :  { %v2311_v27 = vpop.permute.xlu0 %2310 }
0x2213   :  { %v2313_v29 = vmul.f32 %v3768_v58, %v2311_v27 }
0x2215   :  { %2340 = vrot.lane.b32.xlu0 %v2313_v29, %s4016_s2 }
0x2232   :  { %v2335_v47 = vpop.permute.xlu1 %2334 }
0x2233   :  { %v2337_v48 = vmul.f32 %v3772_v12, %v2335_v47 }
0x2235   :  { %2342 = vrot.lane.b32.xlu1 %v2337_v48, %s4016_s2 }
0x2287   :  { %v4667_v46 = vpop.permute.xlu0 %2340 }
0x2288   :  { %3206 = vmatmul.mubr.msk.f32.vlgmr.msra.gmra.mrb[40].mxu1 %vm326_vm1, %v4667_v46 }
0x2289   :  { %2417 = vmatprep.mubr.f32.mxu1 %v4014_v0  ;;  %3522 = vmatpush1.bf16.msra.mxu1 %v4490_v62 }
0x228a   :  { %3524 = vmatprep.subr.bf16.mxu1 %v4513_v25 }
0x228d   :  { %3526 = vmatpush1.bf16.msra.mxu1 %v4521_v24 }
0x22a7   :  { %v4675_v34 = vpop.permute.xlu1 %2342 }
0x22a8   :  { %3207 = vmatmul.mubr.msk.f32.gmra.mrb[42].mxu1 %vm326_vm1, %v4675_v34 }
0x22a9   :  { %2682 = vmatprep.mubr.f32.mxu1 %v4014_v0 }
0x235b   :  { %v2414_v36 = vpop.f32.mrb[40].mxu1 }
0x235c   :  { %v2423_v39 = vadd.f32 %v2414_v36, %v4574_v40  ;;  %v2416_v41 = vpop.f32.mrb[41].mxu1 }
0x235e   :  { %3777 = vtanh.f32 %v2423_v39  ;;  %v3208_v51 = vmul.f32 -1.442695, %v2423_v39 }
0x2368   :  { %v3778_v42 = vpop.eup %3777 }
0x2369   :  { %2434 = vrot.lane.b32.xlu0 %v3778_v42, %s4015_s0 }
0x237b   :  { %v2419_v44 = vpop.f32.mrb[42].mxu1 }
0x237c   :  { %v2420_v16 = vpop.f32.mrb[43].mxu1 }
0x237d   :  { %v2424_v8 = vadd.f32 %v2420_v16, %v4571_v35 }
0x237f   :  { %3779 = vtanh.f32 %v2424_v8  ;;  %v3209_v26 = vmul.f32 -1.442695, %v2424_v8 }
0x2380   :  { %3781 = vpow2.f32 %v3208_v51 }
0x2389   :  { %v3780_v63 = vpop.eup %3779 }
0x238a   :  { %2458 = vrot.lane.b32.xlu1 %v3780_v63, %s4015_s0  ;;  %v3782_v38 = vpop.eup %3781 }
0x238b   :  { %v2428_v50 = vadd.f32 1.0, %v3782_v38 }
0x238d   :  { %3783 = vrcp.f32 %v2428_v50 }
0x238e   :  { %3785 = vpow2.f32 %v3209_v26 }
0x2397   :  { %v3784_v6 = vpop.eup %3783 }
0x2398   :  { %v3786_v52 = vpop.eup %3785  ;;  %v2432_v59 = vmul.f32 %v3784_v6, %v2307_v23 }
0x2399   :  { %v2452_v53 = vadd.f32 1.0, %v3786_v52 }
0x239b   :  { %3787 = vrcp.f32 %v2452_v53 }
0x23a5   :  { %v3788_v35 = vpop.eup %3787 }
0x23a6   :  { %v2456_v57 = vmul.f32 %v3788_v35, %v2331_v30 }
0x23db   :  { %v2435_v40 = vpop.permute.xlu0 %2434 }
0x23dc   :  { %v2437_v9 = vmul.f32 %v3784_v6, %v2435_v40 }
0x23de   :  { %2439 = vrot.lane.b32.xlu0 %v2437_v9, %s4016_s2 }
0x23fc   :  { %v2459_v54 = vpop.permute.xlu1 %2458 }
0x23fd   :  { %v2461_v7 = vmul.f32 %v3788_v35, %v2459_v54 }
0x23ff   :  { %2463 = vrot.lane.b32.xlu1 %v2461_v7, %s4016_s2 }
0x2450   :  { %v2440_v45 = vpop.permute.xlu0 %2439 }
0x2451   :  { %v2442_v55 = vadd.f32 %v2440_v45, %v2432_v59 }
0x2453   :  { %3789 = vtanh.f32 %v2442_v55 }
0x245d   :  { %v3790_v56 = vpop.eup %3789 }
0x245e   :  { %2445 = vrot.lane.b32.xlu0 %v3790_v56, %s4015_s0 }
0x2471   :  { %v2464_v58 = vpop.permute.xlu1 %2463 }
0x2472   :  { %v2466_v49 = vadd.f32 %v2464_v58, %v2456_v57 }
0x2474   :  { %3791 = vtanh.f32 %v2466_v49 }
0x247e   :  { %v3792_v2 = vpop.eup %3791 }
0x247f   :  { %2469 = vrot.lane.b32.xlu1 %v3792_v2, %s4015_s0 }
0x24d0   :  { %v2446_v4 = vpop.permute.xlu0 %2445 }
0x24d1   :  { %v2448_v20 = vmul.f32 %v3784_v6, %v2446_v4 }
0x24d3   :  { %2475 = vrot.lane.b32.xlu0 %v2448_v20, %s4016_s2 }
0x24f1   :  { %v2470_v3 = vpop.permute.xlu1 %2469 }
0x24f2   :  { %v2472_v12 = vmul.f32 %v3788_v35, %v2470_v3 }
0x24f4   :  { %2477 = vrot.lane.b32.xlu1 %v2472_v12, %s4016_s2 }
0x2545   :  { %v4690_v10 = vpop.permute.xlu0 %2475 }
0x2546   :  { %3210 = vmatmul.mubr.msk.f32.vlgmr.msra.gmra.mrb[48].mxu0 %vm326_vm1, %v4690_v10 }
0x2547   :  { %2552 = vmatprep.mubr.f32.mxu0 %v4014_v0  ;;  %3530 = vmatpush1.bf16.msra.mxu0 %v4490_v62 }
0x2548   :  { %3532 = vmatprep.subr.bf16.mxu0 %v4513_v25 }
0x254b   :  { %3534 = vmatpush1.bf16.msra.mxu0 %v4521_v24 }
0x2566   :  { %v4698_v11 = vpop.permute.xlu1 %2477 }
0x2567   :  { %3211 = vmatmul.mubr.msk.f32.gmra.mrb[50].mxu0 %vm326_vm1, %v4698_v11 }
0x2568   :  { %2817 = vmatprep.mubr.f32.mxu0 %v4014_v0 }
0x2619   :  { %v2549_v13 = vpop.f32.mrb[48].mxu0 }
0x261a   :  { %v2558_v1 = vadd.f32 %v2549_v13, %v4578_v43  ;;  %v2551_v23 = vpop.f32.mrb[49].mxu0 }
0x261c   :  { %3793 = vtanh.f32 %v2558_v1  ;;  %v3212_v19 = vmul.f32 -1.442695, %v2558_v1 }
0x2626   :  { %v3794_v15 = vpop.eup %3793 }
0x2627   :  { %2569 = vrot.lane.b32.xlu0 %v3794_v15, %s4015_s0 }
0x263a   :  { %v2554_v62 = vpop.f32.mrb[50].mxu0 }
0x263b   :  { %v2555_v31 = vpop.f32.mrb[51].mxu0 }
0x263c   :  { %v2559_v25 = vadd.f32 %v2555_v31, %v4567_v5 }
0x263e   :  { %3795 = vtanh.f32 %v2559_v25  ;;  %v3213_v47 = vmul.f32 -1.442695, %v2559_v25 }
0x263f   :  { %3797 = vpow2.f32 %v3212_v19 }
0x2648   :  { %v3796_v24 = vpop.eup %3795 }
0x2649   :  { %2593 = vrot.lane.b32.xlu1 %v3796_v24, %s4015_s0  ;;  %v3798_v30 = vpop.eup %3797 }
0x264a   :  { %v2563_v22 = vadd.f32 1.0, %v3798_v30 }
0x264c   :  { %3799 = vrcp.f32 %v2563_v22 }
0x264d   :  { %3801 = vpow2.f32 %v3213_v47 }
0x2656   :  { %v3800_v27 = vpop.eup %3799 }
0x2657   :  { %v3802_v48 = vpop.eup %3801  ;;  %v2567_v42 = vmul.f32 %v3800_v27, %v2442_v55 }
0x2658   :  { %v2587_v36 = vadd.f32 1.0, %v3802_v48 }
0x265a   :  { %3803 = vrcp.f32 %v2587_v36 }
0x2664   :  { %v3804_v5 = vpop.eup %3803 }
0x2665   :  { %v2591_v63 = vmul.f32 %v3804_v5, %v2466_v49 }
0x2699   :  { %v2570_v43 = vpop.permute.xlu0 %2569 }
0x269a   :  { %v2572_v29 = vmul.f32 %v3800_v27, %v2570_v43  ;;  %v1652_v43 = vld [vmem:[%s4888_s10 + $0x8] sm:$0xff] }
0x269c   :  { %2574 = vrot.lane.b32.xlu0 %v2572_v29, %s4016_s2 }
0x26bb   :  { %v2594_v39 = vpop.permute.xlu1 %2593 }
0x26bc   :  { %v2596_v41 = vmul.f32 %v3804_v5, %v2594_v39  ;;  %v1653_v39 = vld [vmem:[%s4888_s10 + $0x10] sm:$0xff] }
0x26be   :  { %2598 = vrot.lane.b32.xlu1 %v2596_v41, %s4016_s2  ;;  %v1654_v41 = vld [vmem:[%s4888_s10 + $0x18] sm:$0xff] }
0x270e   :  { %v2575_v44 = vpop.permute.xlu0 %2574 }
0x270f   :  { %v2577_v16 = vadd.f32 %v2575_v44, %v2567_v42  ;;  %v4753_v42 = vpack.c.bf16 %v1654_v41, %v1653_v39 }
0x2711   :  { %3805 = vtanh.f32 %v2577_v16 }
0x271b   :  { %v3806_v8 = vpop.eup %3805 }
0x271c   :  { %2580 = vrot.lane.b32.xlu0 %v3806_v8, %s4015_s0 }
0x2730   :  { %v2599_v51 = vpop.permute.xlu1 %2598 }
0x2731   :  { %v2601_v38 = vadd.f32 %v2599_v51, %v2591_v63 }
0x2733   :  { %3807 = vtanh.f32 %v2601_v38 }
0x273d   :  { %v3808_v50 = vpop.eup %3807 }
0x273e   :  { %2604 = vrot.lane.b32.xlu1 %v3808_v50, %s4015_s0 }
0x278e   :  { %v2581_v6 = vpop.permute.xlu0 %2580 }
0x278f   :  { %v2583_v40 = vmul.f32 %v3800_v27, %v2581_v6  ;;  %v1651_v27 = vld [vmem:[%s4888_s10] sm:$0xff] }
0x2790   :  { %v4742_v29 = vpack.c.bf16 %v1652_v43, %v1651_v27 }
0x2791   :  { %2610 = vrot.lane.b32.xlu0 %v2583_v40, %s4016_s2 }
0x2792   :  { %3544 = vmatprep.subr.bf16.mxu0 %v4742_v29 }
0x27b0   :  { %v2605_v9 = vpop.permute.xlu1 %2604 }
0x27b1   :  { %v2607_v26 = vmul.f32 %v3804_v5, %v2605_v9 }
0x27b3   :  { %2612 = vrot.lane.b32.xlu1 %v2607_v26, %s4016_s2 }
0x2803   :  { %v4713_v52 = vpop.permute.xlu0 %2610 }
0x2804   :  { %3214 = vmatmul.mubr.msk.f32.vlgmr.msra.gmra.mrb[44].mxu1 %vm326_vm1, %v4713_v52 }
0x2805   :  { %2687 = vmatprep.mubr.f32.mxu1 %v4014_v0 }
0x2825   :  { %v4718_v53 = vpop.permute.xlu1 %2612 }
0x2826   :  { %3215 = vmatmul.mubr.msk.f32.gmra.mrb[46].mxu1 %vm326_vm1, %v4718_v53 }
0x28d7   :  { %v2684_v35 = vpop.f32.mrb[44].mxu1 }
0x28d8   :  { %v2693_v54 = vadd.f32 %v2684_v35, %v4582_v61  ;;  %v2686_v7 = vpop.f32.mrb[45].mxu1 }
0x28da   :  { %3809 = vtanh.f32 %v2693_v54  ;;  %v3216_v58 = vmul.f32 -1.442695, %v2693_v54 }
0x28e4   :  { %v3810_v59 = vpop.eup %3809 }
0x28e5   :  { %2704 = vrot.lane.b32.xlu0 %v3810_v59, %s4015_s0 }
0x28f9   :  { %v2689_v45 = vpop.f32.mrb[46].mxu1 }
0x28fa   :  { %v2690_v55 = vpop.f32.mrb[47].mxu1 }
0x28fb   :  { %v2694_v56 = vadd.f32 %v2690_v55, %v4563_v28 }
0x28fd   :  { %3811 = vtanh.f32 %v2694_v56  ;;  %v3217_v3 = vmul.f32 -1.442695, %v2694_v56 }
0x28fe   :  { %3813 = vpow2.f32 %v3216_v58 }
0x2907   :  { %v3812_v57 = vpop.eup %3811 }
0x2908   :  { %2728 = vrot.lane.b32.xlu1 %v3812_v57, %s4015_s0  ;;  %v3814_v49 = vpop.eup %3813 }
0x2909   :  { %v2698_v2 = vadd.f32 1.0, %v3814_v49 }
0x290b   :  { %3815 = vrcp.f32 %v2698_v2 }
0x290c   :  { %3817 = vpow2.f32 %v3217_v3 }
0x2915   :  { %v3816_v4 = vpop.eup %3815 }
0x2916   :  { %v3818_v12 = vpop.eup %3817  ;;  %v2702_v15 = vmul.f32 %v3816_v4, %v2577_v16 }
0x2917   :  { %v2722_v13 = vadd.f32 1.0, %v3818_v12 }
0x2919   :  { %3819 = vrcp.f32 %v2722_v13  ;;  %v1655_v13 = vld [vmem:[%s4889_s11] sm:$0xff] }
0x2923   :  { %v3820_v28 = vpop.eup %3819 }
0x2924   :  { %v2726_v24 = vmul.f32 %v3820_v28, %v2601_v38 }
0x2957   :  { %v2705_v61 = vpop.permute.xlu0 %2704 }
0x2958   :  { %v2707_v20 = vmul.f32 %v3816_v4, %v2705_v61 }
0x295a   :  { %2709 = vrot.lane.b32.xlu0 %v2707_v20, %s4016_s2 }
0x297a   :  { %v2729_v1 = vpop.permute.xlu1 %2728 }
0x297b   :  { %v2731_v23 = vmul.f32 %v3820_v28, %v2729_v1  ;;  %v1657_v1 = vld [vmem:[%s4889_s11 + $0x10] sm:$0xff] }
0x297d   :  { %2733 = vrot.lane.b32.xlu1 %v2731_v23, %s4016_s2 }
0x29cc   :  { %v2710_v62 = vpop.permute.xlu0 %2709 }
0x29cd   :  { %v4728_v31 = vadd.f32 %v2710_v62, %v2702_v15  ;;  %v1658_v15 = vld [vmem:[%s4889_s11 + $0x18] sm:$0xff] }
0x29ce   :  { %v3539_v62 = vpack.c.bf16 %v1658_v15, %v1657_v1 }
0x29cf   :  { %3821 = vtanh.f32 %v4728_v31 }
0x29d9   :  { %v3822_v25 = vpop.eup %3821 }
0x29da   :  { %2715 = vrot.lane.b32.xlu0 %v3822_v25, %s4015_s0 }
0x29ef   :  { %v2734_v19 = vpop.permute.xlu1 %2733 }
0x29f0   :  { %v4732_v30 = vadd.f32 %v2734_v19, %v2726_v24 }
0x29f2   :  { %3823 = vtanh.f32 %v4732_v30 }
0x29fc   :  { %v3824_v22 = vpop.eup %3823 }
0x29fd   :  { %2739 = vrot.lane.b32.xlu1 %v3824_v22, %s4015_s0 }
0x2a4c   :  { %v2716_v47 = vpop.permute.xlu0 %2715 }
0x2a4d   :  { %v2718_v48 = vmul.f32 %v3816_v4, %v2716_v47 }
0x2a4f   :  { %2745 = vrot.lane.b32.xlu0 %v2718_v48, %s4016_s2 }
0x2a6f   :  { %v2740_v36 = vpop.permute.xlu1 %2739 }
0x2a70   :  { %v2742_v5 = vmul.f32 %v3820_v28, %v2740_v36  ;;  %v1656_v28 = vld [vmem:[%s4889_s11 + $0x8] sm:$0xff] }
0x2a71   :  { %v3535_v23 = vpack.c.bf16 %v1656_v28, %v1655_v13 }
0x2a72   :  { %2747 = vrot.lane.b32.xlu1 %v2742_v5, %s4016_s2 }
0x2a73   :  { %3536 = vmatprep.subr.bf16.mxu1 %v3535_v23 }
0x2a74   :  { %3538 = vmatpush3.bf16.msra.mxu1 %v3535_v23 }
0x2a75   :  { %3540 = vmatprep.subr.bf16.mxu1 %v3539_v62 }
0x2a78   :  { %3542 = vmatpush3.bf16.msra.mxu1 %v3539_v62 }
0x2a79   :  { %3551 = vmatprep.subr.bf16.mxu1 %v4742_v29 }
0x2ac1   :  { %v4755_v44 = vpop.permute.xlu0 %2745 }
0x2ac2   :  { %3218 = vmatmul.mubr.msk.f32.vlgmr.msra.gmra.mrb[52].mxu0 %vm326_vm1, %v4755_v44 }
0x2ac3   :  { %3546 = vmatpush3.bf16.msra.mxu0 %v4742_v29  ;;  %2822 = vmatprep.mubr.f32.mxu0 %v4014_v0 }
0x2ac4   :  { %3548 = vmatprep.subr.bf16.mxu0 %v4753_v42 }
0x2ac7   :  { %3550 = vmatpush3.bf16.msra.mxu0 %v4753_v42 }
0x2ae4   :  { %v4763_v16 = vpop.permute.xlu1 %2747 }
0x2ae5   :  { %3219 = vmatmul.mubr.msk.f32.gmra.mrb[54].mxu0 %vm326_vm1, %v4763_v16 }
0x2ae6   :  { %3355 = vmatprep.mubr.msk.f32.mxu0 %vm326_vm1, %v4595_v32 }
0x2ae9   :  { %3356 = vmatmul.mubr.msk.f32.vlgmr.msra.gmra.mrb[56].mxu0 %vm326_vm1, %v4619_v14 }
0x2aea   :  { %3358 = vmatprep.mubr.msk.f32.mxu0 %vm326_vm1, %v4643_v21 }
0x2aed   :  { %3359 = vmatmul.mubr.msk.f32.gmra.mrb[58].mxu0 %vm326_vm1, %v4667_v46 }
0x2aee   :  { %3361 = vmatprep.mubr.msk.f32.mxu0 %vm326_vm1, %v4690_v10 }
0x2af1   :  { %3362 = vmatmul.mubr.msk.f32.gmra.mrb[60].mxu0 %vm326_vm1, %v4713_v52 }
0x2b95   :  { %v2819_v0 = vpop.f32.mrb[52].mxu0 }
0x2b96   :  { %v2828_v8 = vadd.f32 %v2819_v0, %v4586_v37  ;;  %v2821_v63 = vpop.f32.mrb[53].mxu0 }
0x2b98   :  { %3825 = vtanh.f32 %v2828_v8  ;;  %v3220_v9 = vmul.f32 -1.442695, %v2828_v8 }
0x2ba2   :  { %v3826_v32 = vpop.eup %3825 }
0x2ba3   :  { %2839 = vrot.lane.b32.xlu1 %v3826_v32, %s4015_s0 }
0x2bb8   :  { %v2824_v14 = vpop.f32.mrb[54].mxu0 }
0x2bb9   :  { %v2825_v51 = vpop.f32.mrb[55].mxu0 }
0x2bba   :  { %v2829_v21 = vadd.f32 %v2825_v51, %v4559_v17 }
0x2bbc   :  { %3827 = vtanh.f32 %v2829_v21  ;;  %v4782_v46 = vpop.f32.mrb[56].mxu0  ;;  %v3221_v7 = vmul.f32 -1.442695, %v2829_v21 }
0x2bbd   :  { %v4784_v38 = vpop.f32.mrb[57].mxu0  ;;  %3829 = vpow2.f32 %v3220_v9 }
0x2bc0   :  { %v4786_v10 = vpop.f32.mrb[58].mxu0 }
0x2bc1   :  { %v4788_v50 = vpop.f32.mrb[59].mxu0 }
0x2bc4   :  { %v4790_v6 = vpop.f32.mrb[60].mxu0 }
0x2bc5   :  { %v4792_v37 = vpop.f32.mrb[61].mxu0 }
0x2bc6   :  { %v3828_v40 = vpop.eup %3827 }
0x2bc7   :  { %2863 = vrot.lane.b32.xlu0 %v3828_v40, %s4015_s0  ;;  %v3830_v26 = vpop.eup %3829 }
0x2bc8   :  { %v2833_v17 = vadd.f32 1.0, %v3830_v26 }
0x2bca   :  { %3831 = vrcp.f32 %v2833_v17 }
0x2bcb   :  { %3833 = vpow2.f32 %v3221_v7 }
0x2bd4   :  { %v3832_v52 = vpop.eup %3831 }
0x2bd5   :  { %v3834_v59 = vpop.eup %3833  ;;  %v2837_v58 = vmul.f32 %v3832_v52, %v4728_v31 }
0x2bd6   :  { %v2857_v45 = vadd.f32 1.0, %v3834_v59 }
0x2bd8   :  { %3835 = vrcp.f32 %v2857_v45 }
0x2be2   :  { %v3836_v55 = vpop.eup %3835 }
0x2be3   :  { %v2861_v61 = vmul.f32 %v3836_v55, %v4732_v30 }
0x2c15   :  { %v2840_v35 = vpop.permute.xlu1 %2839 }
0x2c16   :  { %v2842_v54 = vmul.f32 %v3832_v52, %v2840_v35 }
0x2c18   :  { %2844 = vrot.lane.b32.xlu1 %v2842_v54, %s4016_s2 }
0x2c39   :  { %v2864_v56 = vpop.permute.xlu0 %2863 }
0x2c3a   :  { %v2866_v57 = vmul.f32 %v3836_v55, %v2864_v56 }
0x2c3c   :  { %2868 = vrot.lane.b32.xlu0 %v2866_v57, %s4016_s2 }
0x2c8a   :  { %v2845_v49 = vpop.permute.xlu1 %2844 }
0x2c8b   :  { %v2847_v2 = vadd.f32 %v2845_v49, %v2837_v58 }
0x2c8d   :  { %3837 = vtanh.f32 %v2847_v2 }
0x2c97   :  { %v3838_v4 = vpop.eup %3837 }
0x2c98   :  { %2850 = vrot.lane.b32.xlu1 %v3838_v4, %s4015_s0 }
0x2cae   :  { %v2869_v20 = vpop.permute.xlu0 %2868 }
0x2caf   :  { %v2871_v3 = vadd.f32 %v2869_v20, %v2861_v61 }
0x2cb1   :  { %3839 = vtanh.f32 %v2871_v3 }
0x2cbb   :  { %v3840_v12 = vpop.eup %3839 }
0x2cbc   :  { %2874 = vrot.lane.b32.xlu0 %v3840_v12, %s4015_s0 }
0x2d0a   :  { %v2851_v31 = vpop.permute.xlu1 %2850 }
0x2d0b   :  { %v2853_v25 = vmul.f32 %v3832_v52, %v2851_v31 }
0x2d0d   :  { %2989 = vrot.lane.b32.xlu1 %v2853_v25, %s4016_s2 }
0x2d2e   :  { %v2875_v24 = vpop.permute.xlu0 %2874 }
0x2d2f   :  { %v2877_v19 = vmul.f32 %v3836_v55, %v2875_v24 }
0x2d31   :  { %2879 = vrot.lane.b32.xlu0 %v2877_v19, %s4016_s2 }
0x2da3   :  { %v2880_v30 = vpop.permute.xlu0 %2879 }
0x2da4   :  { %3335 = vmatprep.mubr.msk.f32.mxu1 %vm326_vm1, %v2880_v30 }
0x2da5   :  { %3336 = vmatmul.mubr.msk.f32.vlgmr.msra.gmra.mrb[48].mxu1 %vm326_vm1, %v4763_v16 }
0x2da6   :  { %3553 = vmatpush3.bf16.msra.mxu1 %v4742_v29  ;;  %3338 = vmatprep.mubr.msk.f32.mxu1 %vm326_vm1, %v4718_v53  ;;  %v2990_v53 = vpop.permute.xlu1 %2989 }
0x2da7   :  { %3552 = vmatprep.subr.bf16.mxu1 %v4753_v42 }
0x2da9   :  { %3339 = vmatmul.mubr.msk.f32.gmra.mrb[50].mxu1 %vm326_vm1, %v4698_v11 }
0x2daa   :  { %3341 = vmatprep.mubr.msk.f32.mxu1 %vm326_vm1, %v4675_v34  ;;  %3554 = vmatpush3.bf16.msra.mxu1 %v4753_v42  ;;  %v3238_v34 = vld [vmem:[%s4890_s12] ss:$0 sm:$0xff] }
0x2dad   :  { %3342 = vmatmul.mubr.msk.f32.gmra.mrb[52].mxu1 %vm326_vm1, %v4652_v33 }
0x2dae   :  { %3344 = vmatprep.mubr.msk.f32.mxu1 %vm326_vm1, %v4628_v60 }
0x2db1   :  { %3345 = vmatmul.mubr.msk.f32.gmra.mrb[54].mxu1 %vm326_vm1, %v4604_v18 }
0x2db2   :  { %3364 = vmatprep.mubr.msk.f32.mxu1 %vm326_vm1, %v4755_v44 }
0x2db9   :  { %3365 = vmatmul.mubr.msk.f32.vlgmr.msra.gmra.mrb[54].mxu1 %vm326_vm1, %v2990_v53 }
0x2e78   :  { %v3337_v11 = vpop.f32.mrb[48].mxu1 }
0x2e79   :  { %v3065_v22 = vadd.f32 %v4782_v46, %v3337_v11  ;;  %v2949_v33 = vpop.f32.mrb[49].mxu1 }
0x2e7a   :  { %v3060_v60 = vadd.f32 %v4784_v38, %v2949_v33 }
0x2e7b   :  { %v3105_v27 = vadd.f32 %v3238_v34, %v3065_v22 }
0x2e7c   :  { %v3104_v43 = vadd.f32 %v3238_v34, %v3060_v60  ;;  %v3340_v18 = vpop.f32.mrb[50].mxu1 }
0x2e7d   :  { %3114 = vst.msk [vmem:[%s4891_s13 + $0x8] sm:$0xff] %vm3112_vm2, %v3105_v27  ;;  %v3075_v29 = vadd.f32 %v4786_v10, %v3340_v18  ;;  %v2959_v47 = vpop.f32.mrb[51].mxu1 }
0x2e7e   :  { %3113 = vst.msk [vmem:[%s4891_s13] sm:$0xff] %vm3112_vm2, %v3104_v43  ;;  %v3070_v48 = vadd.f32 %v4788_v50, %v2959_v47 }
0x2e7f   :  { %v3107_v36 = vadd.f32 %v3238_v34, %v3075_v29 }
0x2e80   :  { %v3106_v5 = vadd.f32 %v3238_v34, %v3070_v48  ;;  %v3343_v39 = vpop.f32.mrb[52].mxu1 }
0x2e81   :  { %3116 = vst.msk [vmem:[%s4891_s13 + $0x18] sm:$0xff] %vm3112_vm2, %v3107_v36  ;;  %v3085_v41 = vadd.f32 %v4790_v6, %v3343_v39  ;;  %v2969_v42 = vpop.f32.mrb[53].mxu1 }
0x2e82   :  { %3115 = vst.msk [vmem:[%s4891_s13 + $0x10] sm:$0xff] %vm3112_vm2, %v3106_v5  ;;  %v3080_v44 = vadd.f32 %v4792_v37, %v2969_v42 }
0x2e83   :  { %v3109_v16 = vadd.f32 %v3238_v34, %v3085_v41 }
0x2e84   :  { %v3108_v0 = vadd.f32 %v3238_v34, %v3080_v44 }
0x2e85   :  { %3118 = vst.msk [vmem:[%s4891_s13 + $0x28] sm:$0xff] %vm3112_vm2, %v3109_v16 }
0x2e86   :  { %3117 = vst.msk [vmem:[%s4891_s13 + $0x20] sm:$0xff] %vm3112_vm2, %v3108_v0 }
0x2e8c   :  { %v3366_v8 = vpop.f32.mrb[54].mxu1 }
0x2e8d   :  { %v3111_v63 = vadd.f32 %v3366_v8, %v3238_v34  ;;  %v3089_v32 = vpop.f32.mrb[55].mxu1 }
0x2e8e   :  { %v3110_v14 = vadd.f32 %v3238_v34, %v3089_v32 }
0x2e8f   :  { %3120 = vst.msk [vmem:[%s4891_s13 + $0x38] sm:$0xff] %vm3112_vm2, %v3111_v63 }
0x2e90   :  { %3119 = vst.msk [vmem:[%s4891_s13 + $0x30] sm:$0xff] %vm3112_vm2, %v3110_v14 }
0x2e91   :  { %3125 = vsyncpa [#allocation3], 1 }
0x2e92   :  { %3126 = vsyncpa [#allocation5], 1 }
0x2e93   :  { %3127 = vsyncpa [#allocation8], 1 }
0x2e94   :  { %3128 = vsyncpa [#allocation11], 1 }

</bundles_post_ra>
